<compile_context>
chip_gen: v7x
topology: tpu7x:2x2x1
jax: 0.10.0
libtpu: 0.0.40
codegen_flags: <defaults>
</compile_context>

<pallas_src>
import functools

import jax
import jax.numpy as jnp
from jax import lax
from jax.experimental import pallas as pl
from jax.experimental.pallas import tpu as pltpu

COMPUTE_DTYPE = jnp.bfloat16  # MXU operand dtype (v5e/v6e/v7x bf16 MXU), f32 accum


def _mxu_dot(a, w):
    """Matmul with bf16 MXU operands and f32 accumulation."""
    return jnp.dot(a.astype(COMPUTE_DTYPE), w.astype(COMPUTE_DTYPE),
                   preferred_element_type=jnp.float32)


def _row_tile(n, max_tile=128):
    """Row-tile size (multiple of 8). For small N, split into >=2 grid steps so a
    "parallel" grid axis can shard across the two v7x TensorCores. All tiles stay
    far below the 16/32 MiB scoped-VMEM defaults of v5e/v6e/v7x."""
    if n >= 2 * max_tile:
        return max_tile
    half = (pl.cdiv(n, 2) + 7) // 8 * 8
    return max(8, min(max_tile, half))


# ----------------------------------------------------------------------------
# Pallas kernels
# ----------------------------------------------------------------------------
def _pdist_kernel(xr_ref, xc_ref, sqc_ref, o_ref):
    """Squared pairwise distances for a row tile: ||x_i||^2 + ||x_j||^2 - 2 x_i.x_j.
    dot_general contracts the last axes of both operands -> no transpose."""
    xr = xr_ref[...].astype(jnp.float32)              # (tile_m, F)
    xc = xc_ref[...].astype(jnp.float32)              # (N, F) full
    sq_r = jnp.sum(xr * xr, axis=-1, keepdims=True)   # (tile_m, 1)
    cross = lax.dot_general(xr, xc, (((1,), (1,)), ((), ())),
                            preferred_element_type=jnp.float32)
    o_ref[...] = sq_r + sqc_ref[...] - 2.0 * cross


def _edge_conv_kernel(x_ref, xj_ref, w0_ref, b0_ref, w1_ref, b1_ref, o_ref, *,
                      k, indim):
    """DynamicEdgeConv for a row tile: msg = node_encoder([x_i, x_j - x_i]) per
    edge, 'add' aggregation over the k edges, then ReLU."""
    x = x_ref[...].astype(jnp.float32)        # (tn, indim)
    xj_all = xj_ref[...].astype(jnp.float32)  # (tn, k*indim)
    w0, b0 = w0_ref[...], b0_ref[...]
    w1, b1 = w1_ref[...], b1_ref[...]
    # cat([x_i, x_j - x_i]) @ W0 == x_i @ W0[:indim] + (x_j - x_i) @ W0[indim:]
    xi_part = _mxu_dot(x, w0[0:indim])
    acc = jnp.zeros((x.shape[0], w1.shape[1]), jnp.float32)
    for j in range(k):                        # k is tiny (2-3): static VPU adds
        xj = xj_all[:, j * indim:(j + 1) * indim]
        t = xi_part + _mxu_dot(xj - x, w0[indim:2 * indim]) + b0
        t = jnp.maximum(t, 0.0)
        acc = acc + _mxu_dot(t, w1) + b1      # per-edge message, aggr='add'
    o_ref[...] = jnp.maximum(acc, 0.0)        # relu(edge_conv(x))


def _in_layer_kernel(*refs, k, h_dim, e_dim, alpha, first_layer):
    """One IN message-passing layer, fused for a row tile:
       (layer 0 only) edge_attr = relu(edge_encoder([h_src, h_dst]))
       e_new = relational([h_dst, h_src, edge_attr])        (per edge)
       aggr  = sum_k e_new
       h_new = alpha*h + (1-alpha)*object([h, aggr])
    Outputs: h_new (tn, h_dim) and e_new (tn, k*e_dim)."""
    h_ref, hj_ref = refs[0], refs[1]
    i = 2
    if first_layer:
        we0_r, be0_r, we1_r, be1_r = refs[i:i + 4]
        i += 4
        e_in_ref = None
    else:
        e_in_ref = refs[i]
        i += 1
    wr0_r, br0_r, wr1_r, br1_r = refs[i:i + 4]
    i += 4
    wo0_r, bo0_r, wo1_r, bo1_r = refs[i:i + 4]
    i += 4
    h_out_ref, e_out_ref = refs[i], refs[i + 1]

    h = h_ref[...]            # (tn, h_dim) f32
    hj_all = hj_ref[...]      # (tn, k*h_dim) f32
    wr0, br0, wr1, br1 = wr0_r[...], br0_r[...], wr1_r[...], br1_r[...]
    wo0, bo0, wo1, bo1 = wo0_r[...], bo0_r[...], wo1_r[...], bo1_r[...]

    # The h_dst contribution is identical for all k edges of a node -> hoist.
    rel_dst = _mxu_dot(h, wr0[0:h_dim])
    if first_layer:
        we0, be0, we1, be1 = we0_r[...], be0_r[...], we1_r[...], be1_r[...]
        enc_dst = _mxu_dot(h, we0[h_dim:2 * h_dim])

    aggr = jnp.zeros((h.shape[0], e_dim), jnp.float32)
    for j in range(k):
        hj = hj_all[:, j * h_dim:(j + 1) * h_dim]
        if first_layer:
            # edge_attr = relu(edge_encoder(cat([h_src, h_dst])))
            t = _mxu_dot(hj, we0[0:h_dim]) + enc_dst + be0
            e_j = _mxu_dot(jnp.maximum(t, 0.0), we1) + be1
            e_j = jnp.maximum(e_j, 0.0)
        else:
            e_j = e_in_ref[:, j * e_dim:(j + 1) * e_dim]
        # relational model on cat([h_dst, h_src, edge_attr])
        t = (rel_dst + _mxu_dot(hj, wr0[h_dim:2 * h_dim])
             + _mxu_dot(e_j, wr0[2 * h_dim:2 * h_dim + e_dim]) + br0)
        e_new = _mxu_dot(jnp.maximum(t, 0.0), wr1) + br1
        e_out_ref[:, j * e_dim:(j + 1) * e_dim] = e_new
        aggr = aggr + e_new

    # object model on cat([h, aggr]) -> delta_h, then residual mix
    t = _mxu_dot(h, wo0[0:h_dim]) + _mxu_dot(aggr, wo0[h_dim:h_dim + e_dim]) + bo0
    delta_h = _mxu_dot(jnp.maximum(t, 0.0), wo1) + bo1
    h_out_ref[...] = alpha * h + (1.0 - alpha) * delta_h


def _heads_kernel(*refs, n_b, n_x, h_outdim, out_width):
    """B and X heads fused; one lane-dense 128-wide output slab:
       col 0            = sigmoid(B(h))
       cols 1..h_outdim = X(h)"""
    h_ref = refs[0]
    b_refs = refs[1:1 + 2 * n_b]
    x_refs = refs[1 + 2 * n_b:1 + 2 * (n_b + n_x)]
    o_ref = refs[-1]
    h = h_ref[...]

    def run_mlp(a, prefs):
        n_l = len(prefs) // 2
        for l in range(n_l):
            a = _mxu_dot(a, prefs[2 * l][...]) + prefs[2 * l + 1][...]
            if l < n_l - 1:
                a = jnp.maximum(a, 0.0)
        return a

    beta = jax.nn.sigmoid(run_mlp(h, b_refs))          # (tn, 1)
    h_out = run_mlp(h, x_refs)                         # (tn, h_outdim)
    pad = jnp.zeros((h.shape[0], out_width - 1 - h_outdim), jnp.float32)
    o_ref[...] = jnp.concatenate([beta, h_out, pad], axis=-1)  # one full-width store


# ----------------------------------------------------------------------------
# pallas_call wrappers
# ----------------------------------------------------------------------------
def _flatten(params):
    out = []
    for w, b in params:
        out += [w, b]
    return out


def _const_specs(params):
    specs = []
    for w, b in params:
        specs += [pl.BlockSpec(w.shape, lambda i: (0, 0)),
                  pl.BlockSpec(b.shape, lambda i: (0, 0))]
    return specs


def pairwise_sq_dists(x):
    n, f = x.shape
    tile_m = _row_tile(n)
    sq_col = jnp.sum(x * x, axis=-1)[None, :]          # (1, N), computed once
    return pl.pallas_call(
        _pdist_kernel,
        out_shape=jax.ShapeDtypeStruct((n, n), jnp.float32),
        grid=(pl.cdiv(n, tile_m),),
        in_specs=[pl.BlockSpec((tile_m, f), lambda i: (i, 0)),
                  pl.BlockSpec((n, f), lambda i: (0, 0)),
                  pl.BlockSpec((1, n), lambda i: (0, 0))],
        out_specs=pl.BlockSpec((tile_m, n), lambda i: (i, 0)),
        compiler_params=pltpu.CompilerParams(dimension_semantics=("parallel",)),
    )(x, x, sq_col)


def knn_indices(x, k):
    """kNN neighbor indices (N, k), self-loops excluded."""
    n = x.shape[0]
    d = pairwise_sq_dists(x)
    d = d + jnp.eye(n, dtype=d.dtype) * 1e30
    _, nbr = jax.lax.top_k(-d, k)
    # TODO(synk): for large N, fuse a streaming per-row k-min selection into the
    #             pdist kernel instead of materializing the N x N matrix + top_k.
    return nbr


def edge_conv_forward(x, xj, enc_params, *, k):
    n, indim = x.shape
    (w0, b0), (w1, b1) = enc_params
    h_dim = w1.shape[1]
    tile_n = _row_tile(n)
    return pl.pallas_call(
        functools.partial(_edge_conv_kernel, k=k, indim=indim),
        out_shape=jax.ShapeDtypeStruct((n, h_dim), jnp.float32),
        grid=(pl.cdiv(n, tile_n),),
        in_specs=[pl.BlockSpec((tile_n, indim), lambda i: (i, 0)),
                  pl.BlockSpec((tile_n, k * indim), lambda i: (i, 0)),
                  pl.BlockSpec(w0.shape, lambda i: (0, 0)),
                  pl.BlockSpec(b0.shape, lambda i: (0, 0)),
                  pl.BlockSpec(w1.shape, lambda i: (0, 0)),
                  pl.BlockSpec(b1.shape, lambda i: (0, 0))],
        out_specs=pl.BlockSpec((tile_n, h_dim), lambda i: (i, 0)),
        compiler_params=pltpu.CompilerParams(dimension_semantics=("parallel",)),
    )(x, xj, w0, b0, w1, b1)


def in_layer_forward(h, hj, e_in, enc_params, rel_params, obj_params, *,
                     k, e_dim, alpha, first_layer):
    n, h_dim = h.shape
    tile_n = _row_tile(n)
    inputs = [h, hj]
    in_specs = [pl.BlockSpec((tile_n, h_dim), lambda i: (i, 0)),
                pl.BlockSpec((tile_n, k * h_dim), lambda i: (i, 0))]
    if first_layer:
        inputs += _flatten(enc_params)
        in_specs += _const_specs(enc_params)
    else:
        inputs.append(e_in)
        in_specs.append(pl.BlockSpec((tile_n, k * e_dim), lambda i: (i, 0)))
    inputs += _flatten(rel_params) + _flatten(obj_params)
    in_specs += _const_specs(rel_params) + _const_specs(obj_params)

    h_new, e_new = pl.pallas_call(
        functools.partial(_in_layer_kernel, k=k, h_dim=h_dim, e_dim=e_dim,
                          alpha=alpha, first_layer=first_layer),
        out_shape=(jax.ShapeDtypeStruct((n, h_dim), jnp.float32),
                   jax.ShapeDtypeStruct((n, k * e_dim), jnp.float32)),
        grid=(pl.cdiv(n, tile_n),),
        in_specs=in_specs,
        out_specs=(pl.BlockSpec((tile_n, h_dim), lambda i: (i, 0)),
                   pl.BlockSpec((tile_n, k * e_dim), lambda i: (i, 0))),
        compiler_params=pltpu.CompilerParams(dimension_semantics=("parallel",)),
    )(*inputs)
    return h_new, e_new


def heads_forward(h, b_params, x_params, out_width=128):
    n, h_dim = h.shape
    h_outdim = x_params[-1][0].shape[1]
    tile_n = _row_tile(n)
    inputs = [h] + _flatten(b_params) + _flatten(x_params)
    in_specs = ([pl.BlockSpec((tile_n, h_dim), lambda i: (i, 0))]
                + _const_specs(b_params) + _const_specs(x_params))
    slab = pl.pallas_call(
        functools.partial(_heads_kernel, n_b=len(b_params), n_x=len(x_params),
                          h_outdim=h_outdim, out_width=out_width),
        out_shape=jax.ShapeDtypeStruct((n, out_width), jnp.float32),
        grid=(pl.cdiv(n, tile_n),),
        in_specs=in_specs,
        out_specs=pl.BlockSpec((tile_n, out_width), lambda i: (i, 0)),
        compiler_params=pltpu.CompilerParams(dimension_semantics=("parallel",)),
    )(*inputs)
    beta = slab[:, 0:1] + 1e-11
    h_out = slab[:, 1:1 + h_outdim]
    return beta, h_out


# ----------------------------------------------------------------------------
# Parameter construction (deterministic, synthetic)
# ----------------------------------------------------------------------------
def make_mlp_params(key, in_dim, out_dim, hidden_dim, L):
    dims = [in_dim] + [hidden_dim] * L + [out_dim]
    params = []
    for l in range(len(dims) - 1):
        key, k1 = jax.random.split(key)
        w = (jax.random.normal(k1, (dims[l], dims[l + 1]), jnp.float32)
             / jnp.sqrt(jnp.float32(dims[l])))
        b = jnp.zeros((1, dims[l + 1]), jnp.float32)
        params.append((w, b))
    return params


def init_in_conv_block(key, indim, h_dim, e_dim, hidden_dim, L):
    keys = jax.random.split(key, 2 + 2 * L)
    p = {
        "node_encoder": make_mlp_params(keys[0], 2 * indim, h_dim, hidden_dim, L=1),
        "edge_encoder": make_mlp_params(keys[1], 2 * h_dim, e_dim, hidden_dim, L=1),
        "in_layers": [],
    }
    for i in range(L):
        p["in_layers"].append({
            "relational": make_mlp_params(keys[2 + 2 * i], 2 * h_dim + e_dim,
                                          e_dim, hidden_dim, L=1),
            "object": make_mlp_params(keys[3 + 2 * i], h_dim + e_dim,
                                      h_dim, hidden_dim, L=1),
        })
    return p


def init_point_cloud_tcn(key, node_indim, h_dim=8, e_dim=8, h_outdim=4,
                         hidden_dim=32, N_blocks=2, L=2):
    ks = [N_blocks] + [N_blocks - i for i in range(N_blocks)]
    in_dims = [node_indim] + [h_dim] * N_blocks
    blocks = []
    for indim in in_dims:
        key, kb = jax.random.split(key)
        blocks.append(init_in_conv_block(kb, indim, h_dim, e_dim, hidden_dim, L))
    key, kB, kX = jax.random.split(key, 3)
    return {
        "blocks": blocks,
        "ks": ks,
        "B": make_mlp_params(kB, h_dim, 1, hidden_dim, L=3),
        "X": make_mlp_params(kX, h_dim, h_outdim, hidden_dim, L=3),
    }


# ----------------------------------------------------------------------------
# Forward pass
# ----------------------------------------------------------------------------
def in_conv_block(params, x, k, alpha=0.5):
    n, indim = x.shape
    h_dim = params["node_encoder"][-1][0].shape[1]
    e_dim = params["edge_encoder"][-1][0].shape[1]

    nbr = knn_indices(x, k)                        # (N, k) neighbor (src) indices
    # TODO(synk): neighbor-row gathers stay in XLA; an in-kernel DMA gather via
    #             scalar-prefetched indices would remove these HBM round trips.
    xj = x[nbr].reshape(n, k * indim)              # (N, k*indim)
    h = edge_conv_forward(x, xj, params["node_encoder"], k=k)

    edge_attr = None
    for li, lp in enumerate(params["in_layers"]):
        hj = h[nbr].reshape(n, k * h_dim)          # gather current h at neighbors
        h, edge_attr = in_layer_forward(
            h, hj, edge_attr,
            params["edge_encoder"] if li == 0 else None,
            lp["relational"], lp["object"],
            k=k, e_dim=e_dim, alpha=alpha, first_layer=(li == 0))
    return h


def point_cloud_tcn(params, x, alpha=0.5):
    h = x
    for blk, k in zip(params["blocks"], params["ks"]):
        h = in_conv_block(blk, h, k, alpha)
    beta, h_out = heads_forward(h, params["B"], params["X"])
    return {"W": None, "H": h_out, "B": beta, "P": None}


# ----------------------------------------------------------------------------
if __name__ == "__main__":
    key = jax.random.PRNGKey(0)
    kx, kp = jax.random.split(key)

    N, node_indim = 64, 3          # small point cloud (e.g. 64 hits with x,y,z)
    h_outdim = 4
    x = jax.random.normal(kx, (N, node_indim), jnp.float32)

    params = init_point_cloud_tcn(
        kp, node_indim, h_dim=8, e_dim=8, h_outdim=h_outdim,
        hidden_dim=32, N_blocks=2, L=2,
    )

    fwd = jax.jit(lambda inp: point_cloud_tcn(params, inp))
    out = fwd(x)
    jax.block_until_ready((out["H"], out["B"]))

    assert out["H"].shape == (N, h_outdim)
    assert out["B"].shape == (N, 1)
    assert bool(jnp.all(out["B"] > 0.0)) and bool(jnp.all(out["B"] < 1.0 + 1e-6))
    assert out["W"] is None and out["P"] is None
    print("KERNEL_OK")
</pallas_src>

<mosaic_0001>
module attributes {stable_mosaic.version = 11 : i64} {
  func.func @_pdist_kernel(%arg0: i32, %arg1: memref<32x3xf32, #tpu.memory_space<vmem>>, %arg2: memref<64x3xf32, #tpu.memory_space<vmem>>, %arg3: memref<1x64xf32, #tpu.memory_space<vmem>>, %arg4: memref<32x64xf32, #tpu.memory_space<vmem>>) attributes {dimension_semantics = [#tpu.dimension_semantics<parallel>], iteration_bounds = array<i64: 2>, scalar_prefetch = 0 : i64, scratch_operands = 0 : i64, tpu.core_type = #tpu.core_type<tc>, window_params = [{transform_indices = @transform_0, window_bounds = array<i64: 32, 3>}, {pipeline_mode = #tpu.pipeline_mode<synchronous>, transform_indices = @transform_1, window_bounds = array<i64: 64, 3>}, {pipeline_mode = #tpu.pipeline_mode<synchronous>, transform_indices = @transform_2, window_bounds = array<i64: 1, 64>}, {transform_indices = @transform_3, window_bounds = array<i64: 32, 64>}]} {
    %c0 = arith.constant 0 : index
    %c0_0 = arith.constant 0 : index
    %0 = vector.load %arg1[%c0, %c0_0] : memref<32x3xf32, #tpu.memory_space<vmem>>, vector<32x3xf32>
    %c0_1 = arith.constant 0 : index
    %c0_2 = arith.constant 0 : index
    %1 = vector.load %arg2[%c0_1, %c0_2] : memref<64x3xf32, #tpu.memory_space<vmem>>, vector<64x3xf32>
    %2 = arith.mulf %0, %0 : vector<32x3xf32>
    %cst = arith.constant dense<0.000000e+00> : vector<32xf32>
    %3 = vector.multi_reduction <add>, %2, %cst [1] : vector<32x3xf32> to vector<32xf32>
    %4 = vector.shape_cast %3 : vector<32xf32> to vector<32x1xf32>
    %cst_3 = arith.constant dense<0.000000e+00> : vector<32x64xf32>
    %5 = tpu.matmul %0, %1, %cst_3 {dimension_numbers = #tpu.dot_dimension_numbers<[1], [1], [0], [0], [0, 0, 1, 0], [], []>} : vector<32x3xf32>, vector<64x3xf32>, vector<32x64xf32> -> vector<32x64xf32>
    %c0_4 = arith.constant 0 : index
    %c0_5 = arith.constant 0 : index
    %6 = vector.load %arg3[%c0_4, %c0_5] : memref<1x64xf32, #tpu.memory_space<vmem>>, vector<1x64xf32>
    %7 = vector.broadcast %4 : vector<32x1xf32> to vector<32x64xf32>
    %8 = vector.broadcast %6 : vector<1x64xf32> to vector<32x64xf32>
    %9 = arith.addf %7, %8 : vector<32x64xf32>
    %cst_6 = arith.constant 2.000000e+00 : f32
    %10 = vector.broadcast %cst_6 : f32 to vector<32x64xf32>
    %11 = arith.mulf %10, %5 : vector<32x64xf32>
    %12 = arith.subf %9, %11 : vector<32x64xf32>
    %c0_7 = arith.constant 0 : index
    %c0_8 = arith.constant 0 : index
    %13 = vector.load %arg4[%c0_7, %c0_8] : memref<32x64xf32, #tpu.memory_space<vmem>>, vector<32x64xf32>
    tpu.vector_store %arg4[%c0_7, %c0_8], %12 {strides = array<i32>} : memref<32x64xf32, #tpu.memory_space<vmem>>, vector<32x64xf32>,
    return
  }
  func.func @transform_0(%arg0: i32) -> (i32, i32) {
    %c0_i32 = arith.constant 0 : i32
    %c0_i32_0 = arith.constant 0 : i32
    return %arg0, %c0_i32 : i32, i32
  }
  func.func @transform_1(%arg0: i32) -> (i32, i32) {
    %c0_i32 = arith.constant 0 : i32
    %c0_i32_0 = arith.constant 0 : i32
    %c0_i32_1 = arith.constant 0 : i32
    return %c0_i32, %c0_i32_0 : i32, i32
  }
  func.func @transform_2(%arg0: i32) -> (i32, i32) {
    %c0_i32 = arith.constant 0 : i32
    %c0_i32_0 = arith.constant 0 : i32
    %c0_i32_1 = arith.constant 0 : i32
    return %c0_i32, %c0_i32_0 : i32, i32
  }
  func.func @transform_3(%arg0: i32) -> (i32, i32) {
    %c0_i32 = arith.constant 0 : i32
    %c0_i32_0 = arith.constant 0 : i32
    return %arg0, %c0_i32 : i32, i32
  }
}

module attributes {stable_mosaic.version = 11 : i64} {
  func.func @_edge_conv_kernel(%arg0: i32, %arg1: memref<32x3xf32, #tpu.memory_space<vmem>>, %arg2: memref<32x6xf32, #tpu.memory_space<vmem>>, %arg3: memref<6x32xf32, #tpu.memory_space<vmem>>, %arg4: memref<1x32xf32, #tpu.memory_space<vmem>>, %arg5: memref<32x8xf32, #tpu.memory_space<vmem>>, %arg6: memref<1x8xf32, #tpu.memory_space<vmem>>, %arg7: memref<32x8xf32, #tpu.memory_space<vmem>>) attributes {dimension_semantics = [#tpu.dimension_semantics<parallel>], iteration_bounds = array<i64: 2>, scalar_prefetch = 0 : i64, scratch_operands = 0 : i64, tpu.core_type = #tpu.core_type<tc>, window_params = [{transform_indices = @transform_0, window_bounds = array<i64: 32, 3>}, {transform_indices = @transform_1, window_bounds = array<i64: 32, 6>}, {pipeline_mode = #tpu.pipeline_mode<synchronous>, transform_indices = @transform_2, window_bounds = array<i64: 6, 32>}, {pipeline_mode = #tpu.pipeline_mode<synchronous>, transform_indices = @transform_3, window_bounds = array<i64: 1, 32>}, {pipeline_mode = #tpu.pipeline_mode<synchronous>, transform_indices = @transform_4, window_bounds = array<i64: 32, 8>}, {pipeline_mode = #tpu.pipeline_mode<synchronous>, transform_indices = @transform_5, window_bounds = array<i64: 1, 8>}, {transform_indices = @transform_6, window_bounds = array<i64: 32, 8>}]} {
    %c0 = arith.constant 0 : index
    %c0_0 = arith.constant 0 : index
    %0 = vector.load %arg1[%c0, %c0_0] : memref<32x3xf32, #tpu.memory_space<vmem>>, vector<32x3xf32>
    %c0_1 = arith.constant 0 : index
    %c0_2 = arith.constant 0 : index
    %1 = vector.load %arg2[%c0_1, %c0_2] : memref<32x6xf32, #tpu.memory_space<vmem>>, vector<32x6xf32>
    %c0_3 = arith.constant 0 : index
    %c0_4 = arith.constant 0 : index
    %2 = vector.load %arg3[%c0_3, %c0_4] : memref<6x32xf32, #tpu.memory_space<vmem>>, vector<6x32xf32>
    %c0_5 = arith.constant 0 : index
    %c0_6 = arith.constant 0 : index
    %3 = vector.load %arg4[%c0_5, %c0_6] : memref<1x32xf32, #tpu.memory_space<vmem>>, vector<1x32xf32>
    %c0_7 = arith.constant 0 : index
    %c0_8 = arith.constant 0 : index
    %4 = vector.load %arg5[%c0_7, %c0_8] : memref<32x8xf32, #tpu.memory_space<vmem>>, vector<32x8xf32>
    %c0_9 = arith.constant 0 : index
    %c0_10 = arith.constant 0 : index
    %5 = vector.load %arg6[%c0_9, %c0_10] : memref<1x8xf32, #tpu.memory_space<vmem>>, vector<1x8xf32>
    %6 = vector.extract_strided_slice %2 {offsets = [0, 0], sizes = [3, 32], strides = [1, 1]} : vector<6x32xf32> to vector<3x32xf32>
    %7 = arith.truncf %0 : vector<32x3xf32> to vector<32x3xbf16>
    %8 = arith.truncf %6 : vector<3x32xf32> to vector<3x32xbf16>
    %cst = arith.constant dense<0.000000e+00> : vector<32x32xf32>
    %9 = tpu.matmul %7, %8, %cst {dimension_numbers = #tpu.dot_dimension_numbers<[1], [0], [0], [1], [0, 0, 1, 1], [], []>} : vector<32x3xbf16>, vector<3x32xbf16>, vector<32x32xf32> -> vector<32x32xf32>
    %cst_11 = arith.constant 0.000000e+00 : f32
    %10 = vector.broadcast %cst_11 : f32 to vector<32x8xf32>
    %11 = vector.extract_strided_slice %1 {offsets = [0, 0], sizes = [32, 3], strides = [1, 1]} : vector<32x6xf32> to vector<32x3xf32>
    %12 = arith.subf %11, %0 : vector<32x3xf32>
    %13 = vector.extract_strided_slice %2 {offsets = [3, 0], sizes = [3, 32], strides = [1, 1]} : vector<6x32xf32> to vector<3x32xf32>
    %14 = arith.truncf %12 : vector<32x3xf32> to vector<32x3xbf16>
    %15 = arith.truncf %13 : vector<3x32xf32> to vector<3x32xbf16>
    %cst_12 = arith.constant dense<0.000000e+00> : vector<32x32xf32>
    %16 = tpu.matmul %14, %15, %cst_12 {dimension_numbers = #tpu.dot_dimension_numbers<[1], [0], [0], [1], [0, 0, 1, 1], [], []>} : vector<32x3xbf16>, vector<3x32xbf16>, vector<32x32xf32> -> vector<32x32xf32>
    %17 = arith.addf %9, %16 : vector<32x32xf32>
    %18 = vector.broadcast %3 : vector<1x32xf32> to vector<32x32xf32>
    %19 = arith.addf %17, %18 : vector<32x32xf32>
    %cst_13 = arith.constant 0.000000e+00 : f32
    %20 = vector.broadcast %cst_13 : f32 to vector<32x32xf32>
    %21 = arith.maximumf %19, %20 : vector<32x32xf32>
    %22 = arith.truncf %21 : vector<32x32xf32> to vector<32x32xbf16>
    %23 = arith.truncf %4 : vector<32x8xf32> to vector<32x8xbf16>
    %cst_14 = arith.constant dense<0.000000e+00> : vector<32x8xf32>
    %24 = tpu.matmul %22, %23, %cst_14 {dimension_numbers = #tpu.dot_dimension_numbers<[1], [0], [0], [1], [0, 0, 1, 1], [], []>} : vector<32x32xbf16>, vector<32x8xbf16>, vector<32x8xf32> -> vector<32x8xf32>
    %25 = arith.addf %10, %24 : vector<32x8xf32>
    %26 = vector.broadcast %5 : vector<1x8xf32> to vector<32x8xf32>
    %27 = arith.addf %25, %26 : vector<32x8xf32>
    %28 = vector.extract_strided_slice %1 {offsets = [0, 3], sizes = [32, 3], strides = [1, 1]} : vector<32x6xf32> to vector<32x3xf32>
    %29 = arith.subf %28, %0 : vector<32x3xf32>
    %30 = vector.extract_strided_slice %2 {offsets = [3, 0], sizes = [3, 32], strides = [1, 1]} : vector<6x32xf32> to vector<3x32xf32>
    %31 = arith.truncf %29 : vector<32x3xf32> to vector<32x3xbf16>
    %32 = arith.truncf %30 : vector<3x32xf32> to vector<3x32xbf16>
    %cst_15 = arith.constant dense<0.000000e+00> : vector<32x32xf32>
    %33 = tpu.matmul %31, %32, %cst_15 {dimension_numbers = #tpu.dot_dimension_numbers<[1], [0], [0], [1], [0, 0, 1, 1], [], []>} : vector<32x3xbf16>, vector<3x32xbf16>, vector<32x32xf32> -> vector<32x32xf32>
    %34 = arith.addf %9, %33 : vector<32x32xf32>
    %35 = vector.broadcast %3 : vector<1x32xf32> to vector<32x32xf32>
    %36 = arith.addf %34, %35 : vector<32x32xf32>
    %cst_16 = arith.constant 0.000000e+00 : f32
    %37 = vector.broadcast %cst_16 : f32 to vector<32x32xf32>
    %38 = arith.maximumf %36, %37 : vector<32x32xf32>
    %39 = arith.truncf %38 : vector<32x32xf32> to vector<32x32xbf16>
    %40 = arith.truncf %4 : vector<32x8xf32> to vector<32x8xbf16>
    %cst_17 = arith.constant dense<0.000000e+00> : vector<32x8xf32>
    %41 = tpu.matmul %39, %40, %cst_17 {dimension_numbers = #tpu.dot_dimension_numbers<[1], [0], [0], [1], [0, 0, 1, 1], [], []>} : vector<32x32xbf16>, vector<32x8xbf16>, vector<32x8xf32> -> vector<32x8xf32>
    %42 = arith.addf %27, %41 : vector<32x8xf32>
    %43 = vector.broadcast %5 : vector<1x8xf32> to vector<32x8xf32>
    %44 = arith.addf %42, %43 : vector<32x8xf32>
    %cst_18 = arith.constant 0.000000e+00 : f32
    %45 = vector.broadcast %cst_18 : f32 to vector<32x8xf32>
    %46 = arith.maximumf %44, %45 : vector<32x8xf32>
    %c0_19 = arith.constant 0 : index
    %c0_20 = arith.constant 0 : index
    %47 = vector.load %arg7[%c0_19, %c0_20] : memref<32x8xf32, #tpu.memory_space<vmem>>, vector<32x8xf32>
    tpu.vector_store %arg7[%c0_19, %c0_20], %46 {strides = array<i32>} : memref<32x8xf32, #tpu.memory_space<vmem>>, vector<32x8xf32>,
    return
  }
  func.func @transform_0(%arg0: i32) -> (i32, i32) {
    %c0_i32 = arith.constant 0 : i32
    %c0_i32_0 = arith.constant 0 : i32
    return %arg0, %c0_i32 : i32, i32
  }
  func.func @transform_1(%arg0: i32) -> (i32, i32) {
    %c0_i32 = arith.constant 0 : i32
    %c0_i32_0 = arith.constant 0 : i32
    return %arg0, %c0_i32 : i32, i32
  }
  func.func @transform_2(%arg0: i32) -> (i32, i32) {
    %c0_i32 = arith.constant 0 : i32
    %c0_i32_0 = arith.constant 0 : i32
    %c0_i32_1 = arith.constant 0 : i32
    return %c0_i32, %c0_i32_0 : i32, i32
  }
  func.func @transform_3(%arg0: i32) -> (i32, i32) {
    %c0_i32 = arith.constant 0 : i32
    %c0_i32_0 = arith.constant 0 : i32
    %c0_i32_1 = arith.constant 0 : i32
    return %c0_i32, %c0_i32_0 : i32, i32
  }
  func.func @transform_4(%arg0: i32) -> (i32, i32) {
    %c0_i32 = arith.constant 0 : i32
    %c0_i32_0 = arith.constant 0 : i32
    %c0_i32_1 = arith.constant 0 : i32
    return %c0_i32, %c0_i32_0 : i32, i32
  }
  func.func @transform_5(%arg0: i32) -> (i32, i32) {
    %c0_i32 = arith.constant 0 : i32
    %c0_i32_0 = arith.constant 0 : i32
    %c0_i32_1 = arith.constant 0 : i32
    return %c0_i32, %c0_i32_0 : i32, i32
  }
  func.func @transform_6(%arg0: i32) -> (i32, i32) {
    %c0_i32 = arith.constant 0 : i32
    %c0_i32_0 = arith.constant 0 : i32
    return %arg0, %c0_i32 : i32, i32
  }
}

module attributes {stable_mosaic.version = 11 : i64} {
  func.func @_in_layer_kernel(%arg0: i32, %arg1: memref<32x8xf32, #tpu.memory_space<vmem>>, %arg2: memref<32x16xf32, #tpu.memory_space<vmem>>, %arg3: memref<16x32xf32, #tpu.memory_space<vmem>>, %arg4: memref<1x32xf32, #tpu.memory_space<vmem>>, %arg5: memref<32x8xf32, #tpu.memory_space<vmem>>, %arg6: memref<1x8xf32, #tpu.memory_space<vmem>>, %arg7: memref<24x32xf32, #tpu.memory_space<vmem>>, %arg8: memref<1x32xf32, #tpu.memory_space<vmem>>, %arg9: memref<32x8xf32, #tpu.memory_space<vmem>>, %arg10: memref<1x8xf32, #tpu.memory_space<vmem>>, %arg11: memref<16x32xf32, #tpu.memory_space<vmem>>, %arg12: memref<1x32xf32, #tpu.memory_space<vmem>>, %arg13: memref<32x8xf32, #tpu.memory_space<vmem>>, %arg14: memref<1x8xf32, #tpu.memory_space<vmem>>, %arg15: memref<32x8xf32, #tpu.memory_space<vmem>>, %arg16: memref<32x16xf32, #tpu.memory_space<vmem>>) attributes {dimension_semantics = [#tpu.dimension_semantics<parallel>], iteration_bounds = array<i64: 2>, scalar_prefetch = 0 : i64, scratch_operands = 0 : i64, tpu.core_type = #tpu.core_type<tc>, window_params = [{transform_indices = @transform_0, window_bounds = array<i64: 32, 8>}, {transform_indices = @transform_1, window_bounds = array<i64: 32, 16>}, {pipeline_mode = #tpu.pipeline_mode<synchronous>, transform_indices = @transform_2, window_bounds = array<i64: 16, 32>}, {pipeline_mode = #tpu.pipeline_mode<synchronous>, transform_indices = @transform_3, window_bounds = array<i64: 1, 32>}, {pipeline_mode = #tpu.pipeline_mode<synchronous>, transform_indices = @transform_4, window_bounds = array<i64: 32, 8>}, {pipeline_mode = #tpu.pipeline_mode<synchronous>, transform_indices = @transform_5, window_bounds = array<i64: 1, 8>}, {pipeline_mode = #tpu.pipeline_mode<synchronous>, transform_indices = @transform_6, window_bounds = array<i64: 24, 32>}, {pipeline_mode = #tpu.pipeline_mode<synchronous>, transform_indices = @transform_7, window_bounds = array<i64: 1, 32>}, {pipeline_mode = #tpu.pipeline_mode<synchronous>, transform_indices = @transform_8, window_bounds = array<i64: 32, 8>}, {pipeline_mode = #tpu.pipeline_mode<synchronous>, transform_indices = @transform_9, window_bounds = array<i64: 1, 8>}, {pipeline_mode = #tpu.pipeline_mode<synchronous>, transform_indices = @transform_10, window_bounds = array<i64: 16, 32>}, {pipeline_mode = #tpu.pipeline_mode<synchronous>, transform_indices = @transform_11, window_bounds = array<i64: 1, 32>}, {pipeline_mode = #tpu.pipeline_mode<synchronous>, transform_indices = @transform_12, window_bounds = array<i64: 32, 8>}, {pipeline_mode = #tpu.pipeline_mode<synchronous>, transform_indices = @transform_13, window_bounds = array<i64: 1, 8>}, {transform_indices = @transform_14, window_bounds = array<i64: 32, 8>}, {transform_indices = @transform_15, window_bounds = array<i64: 32, 16>}]} {
    %c0 = arith.constant 0 : index
    %c0_0 = arith.constant 0 : index
    %0 = vector.load %arg1[%c0, %c0_0] : memref<32x8xf32, #tpu.memory_space<vmem>>, vector<32x8xf32>
    %c0_1 = arith.constant 0 : index
    %c0_2 = arith.constant 0 : index
    %1 = vector.load %arg2[%c0_1, %c0_2] : memref<32x16xf32, #tpu.memory_space<vmem>>, vector<32x16xf32>
    %c0_3 = arith.constant 0 : index
    %c0_4 = arith.constant 0 : index
    %2 = vector.load %arg7[%c0_3, %c0_4] : memref<24x32xf32, #tpu.memory_space<vmem>>, vector<24x32xf32>
    %c0_5 = arith.constant 0 : index
    %c0_6 = arith.constant 0 : index
    %3 = vector.load %arg8[%c0_5, %c0_6] : memref<1x32xf32, #tpu.memory_space<vmem>>, vector<1x32xf32>
    %c0_7 = arith.constant 0 : index
    %c0_8 = arith.constant 0 : index
    %4 = vector.load %arg9[%c0_7, %c0_8] : memref<32x8xf32, #tpu.memory_space<vmem>>, vector<32x8xf32>
    %c0_9 = arith.constant 0 : index
    %c0_10 = arith.constant 0 : index
    %5 = vector.load %arg10[%c0_9, %c0_10] : memref<1x8xf32, #tpu.memory_space<vmem>>, vector<1x8xf32>
    %c0_11 = arith.constant 0 : index
    %c0_12 = arith.constant 0 : index
    %6 = vector.load %arg11[%c0_11, %c0_12] : memref<16x32xf32, #tpu.memory_space<vmem>>, vector<16x32xf32>
    %c0_13 = arith.constant 0 : index
    %c0_14 = arith.constant 0 : index
    %7 = vector.load %arg12[%c0_13, %c0_14] : memref<1x32xf32, #tpu.memory_space<vmem>>, vector<1x32xf32>
    %c0_15 = arith.constant 0 : index
    %c0_16 = arith.constant 0 : index
    %8 = vector.load %arg13[%c0_15, %c0_16] : memref<32x8xf32, #tpu.memory_space<vmem>>, vector<32x8xf32>
    %c0_17 = arith.constant 0 : index
    %c0_18 = arith.constant 0 : index
    %9 = vector.load %arg14[%c0_17, %c0_18] : memref<1x8xf32, #tpu.memory_space<vmem>>, vector<1x8xf32>
    %10 = vector.extract_strided_slice %2 {offsets = [0, 0], sizes = [8, 32], strides = [1, 1]} : vector<24x32xf32> to vector<8x32xf32>
    %11 = arith.truncf %0 : vector<32x8xf32> to vector<32x8xbf16>
    %12 = arith.truncf %10 : vector<8x32xf32> to vector<8x32xbf16>
    %cst = arith.constant dense<0.000000e+00> : vector<32x32xf32>
    %13 = tpu.matmul %11, %12, %cst {dimension_numbers = #tpu.dot_dimension_numbers<[1], [0], [0], [1], [0, 0, 1, 1], [], []>} : vector<32x8xbf16>, vector<8x32xbf16>, vector<32x32xf32> -> vector<32x32xf32>
    %c0_19 = arith.constant 0 : index
    %c0_20 = arith.constant 0 : index
    %14 = vector.load %arg3[%c0_19, %c0_20] : memref<16x32xf32, #tpu.memory_space<vmem>>, vector<16x32xf32>
    %c0_21 = arith.constant 0 : index
    %c0_22 = arith.constant 0 : index
    %15 = vector.load %arg4[%c0_21, %c0_22] : memref<1x32xf32, #tpu.memory_space<vmem>>, vector<1x32xf32>
    %c0_23 = arith.constant 0 : index
    %c0_24 = arith.constant 0 : index
    %16 = vector.load %arg5[%c0_23, %c0_24] : memref<32x8xf32, #tpu.memory_space<vmem>>, vector<32x8xf32>
    %c0_25 = arith.constant 0 : index
    %c0_26 = arith.constant 0 : index
    %17 = vector.load %arg6[%c0_25, %c0_26] : memref<1x8xf32, #tpu.memory_space<vmem>>, vector<1x8xf32>
    %18 = vector.extract_strided_slice %14 {offsets = [8, 0], sizes = [8, 32], strides = [1, 1]} : vector<16x32xf32> to vector<8x32xf32>
    %19 = arith.truncf %0 : vector<32x8xf32> to vector<32x8xbf16>
    %20 = arith.truncf %18 : vector<8x32xf32> to vector<8x32xbf16>
    %cst_27 = arith.constant dense<0.000000e+00> : vector<32x32xf32>
    %21 = tpu.matmul %19, %20, %cst_27 {dimension_numbers = #tpu.dot_dimension_numbers<[1], [0], [0], [1], [0, 0, 1, 1], [], []>} : vector<32x8xbf16>, vector<8x32xbf16>, vector<32x32xf32> -> vector<32x32xf32>
    %cst_28 = arith.constant 0.000000e+00 : f32
    %22 = vector.broadcast %cst_28 : f32 to vector<32x8xf32>
    %23 = vector.extract_strided_slice %1 {offsets = [0, 0], sizes = [32, 8], strides = [1, 1]} : vector<32x16xf32> to vector<32x8xf32>
    %24 = vector.extract_strided_slice %14 {offsets = [0, 0], sizes = [8, 32], strides = [1, 1]} : vector<16x32xf32> to vector<8x32xf32>
    %25 = arith.truncf %23 : vector<32x8xf32> to vector<32x8xbf16>
    %26 = arith.truncf %24 : vector<8x32xf32> to vector<8x32xbf16>
    %cst_29 = arith.constant dense<0.000000e+00> : vector<32x32xf32>
    %27 = tpu.matmul %25, %26, %cst_29 {dimension_numbers = #tpu.dot_dimension_numbers<[1], [0], [0], [1], [0, 0, 1, 1], [], []>} : vector<32x8xbf16>, vector<8x32xbf16>, vector<32x32xf32> -> vector<32x32xf32>
    %28 = arith.addf %27, %21 : vector<32x32xf32>
    %29 = vector.broadcast %15 : vector<1x32xf32> to vector<32x32xf32>
    %30 = arith.addf %28, %29 : vector<32x32xf32>
    %cst_30 = arith.constant 0.000000e+00 : f32
    %31 = vector.broadcast %cst_30 : f32 to vector<32x32xf32>
    %32 = arith.maximumf %30, %31 : vector<32x32xf32>
    %33 = arith.truncf %32 : vector<32x32xf32> to vector<32x32xbf16>
    %34 = arith.truncf %16 : vector<32x8xf32> to vector<32x8xbf16>
    %cst_31 = arith.constant dense<0.000000e+00> : vector<32x8xf32>
    %35 = tpu.matmul %33, %34, %cst_31 {dimension_numbers = #tpu.dot_dimension_numbers<[1], [0], [0], [1], [0, 0, 1, 1], [], []>} : vector<32x32xbf16>, vector<32x8xbf16>, vector<32x8xf32> -> vector<32x8xf32>
    %36 = vector.broadcast %17 : vector<1x8xf32> to vector<32x8xf32>
    %37 = arith.addf %35, %36 : vector<32x8xf32>
    %cst_32 = arith.constant 0.000000e+00 : f32
    %38 = vector.broadcast %cst_32 : f32 to vector<32x8xf32>
    %39 = arith.maximumf %37, %38 : vector<32x8xf32>
    %40 = vector.extract_strided_slice %2 {offsets = [8, 0], sizes = [8, 32], strides = [1, 1]} : vector<24x32xf32> to vector<8x32xf32>
    %41 = arith.truncf %23 : vector<32x8xf32> to vector<32x8xbf16>
    %42 = arith.truncf %40 : vector<8x32xf32> to vector<8x32xbf16>
    %cst_33 = arith.constant dense<0.000000e+00> : vector<32x32xf32>
    %43 = tpu.matmul %41, %42, %cst_33 {dimension_numbers = #tpu.dot_dimension_numbers<[1], [0], [0], [1], [0, 0, 1, 1], [], []>} : vector<32x8xbf16>, vector<8x32xbf16>, vector<32x32xf32> -> vector<32x32xf32>
    %44 = arith.addf %13, %43 : vector<32x32xf32>
    %45 = vector.extract_strided_slice %2 {offsets = [16, 0], sizes = [8, 32], strides = [1, 1]} : vector<24x32xf32> to vector<8x32xf32>
    %46 = arith.truncf %39 : vector<32x8xf32> to vector<32x8xbf16>
    %47 = arith.truncf %45 : vector<8x32xf32> to vector<8x32xbf16>
    %cst_34 = arith.constant dense<0.000000e+00> : vector<32x32xf32>
    %48 = tpu.matmul %46, %47, %cst_34 {dimension_numbers = #tpu.dot_dimension_numbers<[1], [0], [0], [1], [0, 0, 1, 1], [], []>} : vector<32x8xbf16>, vector<8x32xbf16>, vector<32x32xf32> -> vector<32x32xf32>
    %49 = arith.addf %44, %48 : vector<32x32xf32>
    %50 = vector.broadcast %3 : vector<1x32xf32> to vector<32x32xf32>
    %51 = arith.addf %49, %50 : vector<32x32xf32>
    %cst_35 = arith.constant 0.000000e+00 : f32
    %52 = vector.broadcast %cst_35 : f32 to vector<32x32xf32>
    %53 = arith.maximumf %51, %52 : vector<32x32xf32>
    %54 = arith.truncf %53 : vector<32x32xf32> to vector<32x32xbf16>
    %55 = arith.truncf %4 : vector<32x8xf32> to vector<32x8xbf16>
    %cst_36 = arith.constant dense<0.000000e+00> : vector<32x8xf32>
    %56 = tpu.matmul %54, %55, %cst_36 {dimension_numbers = #tpu.dot_dimension_numbers<[1], [0], [0], [1], [0, 0, 1, 1], [], []>} : vector<32x32xbf16>, vector<32x8xbf16>, vector<32x8xf32> -> vector<32x8xf32>
    %57 = vector.broadcast %5 : vector<1x8xf32> to vector<32x8xf32>
    %58 = arith.addf %56, %57 : vector<32x8xf32>
    %c0_37 = arith.constant 0 : index
    %c0_38 = arith.constant 0 : index
    %59 = vector.load %arg16[%c0_37, %c0_38] : memref<32x16xf32, #tpu.memory_space<vmem>>, vector<32x8xf32>
    tpu.vector_store %arg16[%c0_37, %c0_38], %58 {strides = array<i32>} : memref<32x16xf32, #tpu.memory_space<vmem>>, vector<32x8xf32>,
    %60 = arith.addf %22, %58 : vector<32x8xf32>
    %61 = vector.extract_strided_slice %1 {offsets = [0, 8], sizes = [32, 8], strides = [1, 1]} : vector<32x16xf32> to vector<32x8xf32>
    %62 = vector.extract_strided_slice %14 {offsets = [0, 0], sizes = [8, 32], strides = [1, 1]} : vector<16x32xf32> to vector<8x32xf32>
    %63 = arith.truncf %61 : vector<32x8xf32> to vector<32x8xbf16>
    %64 = arith.truncf %62 : vector<8x32xf32> to vector<8x32xbf16>
    %cst_39 = arith.constant dense<0.000000e+00> : vector<32x32xf32>
    %65 = tpu.matmul %63, %64, %cst_39 {dimension_numbers = #tpu.dot_dimension_numbers<[1], [0], [0], [1], [0, 0, 1, 1], [], []>} : vector<32x8xbf16>, vector<8x32xbf16>, vector<32x32xf32> -> vector<32x32xf32>
    %66 = arith.addf %65, %21 : vector<32x32xf32>
    %67 = vector.broadcast %15 : vector<1x32xf32> to vector<32x32xf32>
    %68 = arith.addf %66, %67 : vector<32x32xf32>
    %cst_40 = arith.constant 0.000000e+00 : f32
    %69 = vector.broadcast %cst_40 : f32 to vector<32x32xf32>
    %70 = arith.maximumf %68, %69 : vector<32x32xf32>
    %71 = arith.truncf %70 : vector<32x32xf32> to vector<32x32xbf16>
    %72 = arith.truncf %16 : vector<32x8xf32> to vector<32x8xbf16>
    %cst_41 = arith.constant dense<0.000000e+00> : vector<32x8xf32>
    %73 = tpu.matmul %71, %72, %cst_41 {dimension_numbers = #tpu.dot_dimension_numbers<[1], [0], [0], [1], [0, 0, 1, 1], [], []>} : vector<32x32xbf16>, vector<32x8xbf16>, vector<32x8xf32> -> vector<32x8xf32>
    %74 = vector.broadcast %17 : vector<1x8xf32> to vector<32x8xf32>
    %75 = arith.addf %73, %74 : vector<32x8xf32>
    %cst_42 = arith.constant 0.000000e+00 : f32
    %76 = vector.broadcast %cst_42 : f32 to vector<32x8xf32>
    %77 = arith.maximumf %75, %76 : vector<32x8xf32>
    %78 = vector.extract_strided_slice %2 {offsets = [8, 0], sizes = [8, 32], strides = [1, 1]} : vector<24x32xf32> to vector<8x32xf32>
    %79 = arith.truncf %61 : vector<32x8xf32> to vector<32x8xbf16>
    %80 = arith.truncf %78 : vector<8x32xf32> to vector<8x32xbf16>
    %cst_43 = arith.constant dense<0.000000e+00> : vector<32x32xf32>
    %81 = tpu.matmul %79, %80, %cst_43 {dimension_numbers = #tpu.dot_dimension_numbers<[1], [0], [0], [1], [0, 0, 1, 1], [], []>} : vector<32x8xbf16>, vector<8x32xbf16>, vector<32x32xf32> -> vector<32x32xf32>
    %82 = arith.addf %13, %81 : vector<32x32xf32>
    %83 = vector.extract_strided_slice %2 {offsets = [16, 0], sizes = [8, 32], strides = [1, 1]} : vector<24x32xf32> to vector<8x32xf32>
    %84 = arith.truncf %77 : vector<32x8xf32> to vector<32x8xbf16>
    %85 = arith.truncf %83 : vector<8x32xf32> to vector<8x32xbf16>
    %cst_44 = arith.constant dense<0.000000e+00> : vector<32x32xf32>
    %86 = tpu.matmul %84, %85, %cst_44 {dimension_numbers = #tpu.dot_dimension_numbers<[1], [0], [0], [1], [0, 0, 1, 1], [], []>} : vector<32x8xbf16>, vector<8x32xbf16>, vector<32x32xf32> -> vector<32x32xf32>
    %87 = arith.addf %82, %86 : vector<32x32xf32>
    %88 = vector.broadcast %3 : vector<1x32xf32> to vector<32x32xf32>
    %89 = arith.addf %87, %88 : vector<32x32xf32>
    %cst_45 = arith.constant 0.000000e+00 : f32
    %90 = vector.broadcast %cst_45 : f32 to vector<32x32xf32>
    %91 = arith.maximumf %89, %90 : vector<32x32xf32>
    %92 = arith.truncf %91 : vector<32x32xf32> to vector<32x32xbf16>
    %93 = arith.truncf %4 : vector<32x8xf32> to vector<32x8xbf16>
    %cst_46 = arith.constant dense<0.000000e+00> : vector<32x8xf32>
    %94 = tpu.matmul %92, %93, %cst_46 {dimension_numbers = #tpu.dot_dimension_numbers<[1], [0], [0], [1], [0, 0, 1, 1], [], []>} : vector<32x32xbf16>, vector<32x8xbf16>, vector<32x8xf32> -> vector<32x8xf32>
    %95 = vector.broadcast %5 : vector<1x8xf32> to vector<32x8xf32>
    %96 = arith.addf %94, %95 : vector<32x8xf32>
    %c0_47 = arith.constant 0 : index
    %c8 = arith.constant 8 : index
    %97 = vector.load %arg16[%c0_47, %c8] : memref<32x16xf32, #tpu.memory_space<vmem>>, vector<32x8xf32>
    tpu.vector_store %arg16[%c0_47, %c8], %96 {strides = array<i32>} : memref<32x16xf32, #tpu.memory_space<vmem>>, vector<32x8xf32>,
    %98 = arith.addf %60, %96 : vector<32x8xf32>
    %99 = vector.extract_strided_slice %6 {offsets = [0, 0], sizes = [8, 32], strides = [1, 1]} : vector<16x32xf32> to vector<8x32xf32>
    %100 = arith.truncf %0 : vector<32x8xf32> to vector<32x8xbf16>
    %101 = arith.truncf %99 : vector<8x32xf32> to vector<8x32xbf16>
    %cst_48 = arith.constant dense<0.000000e+00> : vector<32x32xf32>
    %102 = tpu.matmul %100, %101, %cst_48 {dimension_numbers = #tpu.dot_dimension_numbers<[1], [0], [0], [1], [0, 0, 1, 1], [], []>} : vector<32x8xbf16>, vector<8x32xbf16>, vector<32x32xf32> -> vector<32x32xf32>
    %103 = vector.extract_strided_slice %6 {offsets = [8, 0], sizes = [8, 32], strides = [1, 1]} : vector<16x32xf32> to vector<8x32xf32>
    %104 = arith.truncf %98 : vector<32x8xf32> to vector<32x8xbf16>
    %105 = arith.truncf %103 : vector<8x32xf32> to vector<8x32xbf16>
    %cst_49 = arith.constant dense<0.000000e+00> : vector<32x32xf32>
    %106 = tpu.matmul %104, %105, %cst_49 {dimension_numbers = #tpu.dot_dimension_numbers<[1], [0], [0], [1], [0, 0, 1, 1], [], []>} : vector<32x8xbf16>, vector<8x32xbf16>, vector<32x32xf32> -> vector<32x32xf32>
    %107 = arith.addf %102, %106 : vector<32x32xf32>
    %108 = vector.broadcast %7 : vector<1x32xf32> to vector<32x32xf32>
    %109 = arith.addf %107, %108 : vector<32x32xf32>
    %cst_50 = arith.constant 0.000000e+00 : f32
    %110 = vector.broadcast %cst_50 : f32 to vector<32x32xf32>
    %111 = arith.maximumf %109, %110 : vector<32x32xf32>
    %112 = arith.truncf %111 : vector<32x32xf32> to vector<32x32xbf16>
    %113 = arith.truncf %8 : vector<32x8xf32> to vector<32x8xbf16>
    %cst_51 = arith.constant dense<0.000000e+00> : vector<32x8xf32>
    %114 = tpu.matmul %112, %113, %cst_51 {dimension_numbers = #tpu.dot_dimension_numbers<[1], [0], [0], [1], [0, 0, 1, 1], [], []>} : vector<32x32xbf16>, vector<32x8xbf16>, vector<32x8xf32> -> vector<32x8xf32>
    %115 = vector.broadcast %9 : vector<1x8xf32> to vector<32x8xf32>
    %116 = arith.addf %114, %115 : vector<32x8xf32>
    %cst_52 = arith.constant 5.000000e-01 : f32
    %117 = vector.broadcast %cst_52 : f32 to vector<32x8xf32>
    %118 = arith.mulf %117, %0 : vector<32x8xf32>
    %cst_53 = arith.constant 5.000000e-01 : f32
    %119 = vector.broadcast %cst_53 : f32 to vector<32x8xf32>
    %120 = arith.mulf %119, %116 : vector<32x8xf32>
    %121 = arith.addf %118, %120 : vector<32x8xf32>
    %c0_54 = arith.constant 0 : index
    %c0_55 = arith.constant 0 : index
    %122 = vector.load %arg15[%c0_54, %c0_55] : memref<32x8xf32, #tpu.memory_space<vmem>>, vector<32x8xf32>
    tpu.vector_store %arg15[%c0_54, %c0_55], %121 {strides = array<i32>} : memref<32x8xf32, #tpu.memory_space<vmem>>, vector<32x8xf32>,
    return
  }
  func.func @transform_0(%arg0: i32) -> (i32, i32) {
    %c0_i32 = arith.constant 0 : i32
    %c0_i32_0 = arith.constant 0 : i32
    return %arg0, %c0_i32 : i32, i32
  }
  func.func @transform_1(%arg0: i32) -> (i32, i32) {
    %c0_i32 = arith.constant 0 : i32
    %c0_i32_0 = arith.constant 0 : i32
    return %arg0, %c0_i32 : i32, i32
  }
  func.func @transform_2(%arg0: i32) -> (i32, i32) {
    %c0_i32 = arith.constant 0 : i32
    %c0_i32_0 = arith.constant 0 : i32
    %c0_i32_1 = arith.constant 0 : i32
    return %c0_i32, %c0_i32_0 : i32, i32
  }
  func.func @transform_3(%arg0: i32) -> (i32, i32) {
    %c0_i32 = arith.constant 0 : i32
    %c0_i32_0 = arith.constant 0 : i32
    %c0_i32_1 = arith.constant 0 : i32
    return %c0_i32, %c0_i32_0 : i32, i32
  }
  func.func @transform_4(%arg0: i32) -> (i32, i32) {
    %c0_i32 = arith.constant 0 : i32
    %c0_i32_0 = arith.constant 0 : i32
    %c0_i32_1 = arith.constant 0 : i32
    return %c0_i32, %c0_i32_0 : i32, i32
  }
  func.func @transform_5(%arg0: i32) -> (i32, i32) {
    %c0_i32 = arith.constant 0 : i32
    %c0_i32_0 = arith.constant 0 : i32
    %c0_i32_1 = arith.constant 0 : i32
    return %c0_i32, %c0_i32_0 : i32, i32
  }
  func.func @transform_6(%arg0: i32) -> (i32, i32) {
    %c0_i32 = arith.constant 0 : i32
    %c0_i32_0 = arith.constant 0 : i32
    %c0_i32_1 = arith.constant 0 : i32
    return %c0_i32, %c0_i32_0 : i32, i32
  }
  func.func @transform_7(%arg0: i32) -> (i32, i32) {
    %c0_i32 = arith.constant 0 : i32
    %c0_i32_0 = arith.constant 0 : i32
    %c0_i32_1 = arith.constant 0 : i32
    return %c0_i32, %c0_i32_0 : i32, i32
  }
  func.func @transform_8(%arg0: i32) -> (i32, i32) {
    %c0_i32 = arith.constant 0 : i32
    %c0_i32_0 = arith.constant 0 : i32
    %c0_i32_1 = arith.constant 0 : i32
    return %c0_i32, %c0_i32_0 : i32, i32
  }
  func.func @transform_9(%arg0: i32) -> (i32, i32) {
    %c0_i32 = arith.constant 0 : i32
    %c0_i32_0 = arith.constant 0 : i32
    %c0_i32_1 = arith.constant 0 : i32
    return %c0_i32, %c0_i32_0 : i32, i32
  }
  func.func @transform_10(%arg0: i32) -> (i32, i32) {
    %c0_i32 = arith.constant 0 : i32
    %c0_i32_0 = arith.constant 0 : i32
    %c0_i32_1 = arith.constant 0 : i32
    return %c0_i32, %c0_i32_0 : i32, i32
  }
  func.func @transform_11(%arg0: i32) -> (i32, i32) {
    %c0_i32 = arith.constant 0 : i32
    %c0_i32_0 = arith.constant 0 : i32
    %c0_i32_1 = arith.constant 0 : i32
    return %c0_i32, %c0_i32_0 : i32, i32
  }
  func.func @transform_12(%arg0: i32) -> (i32, i32) {
    %c0_i32 = arith.constant 0 : i32
    %c0_i32_0 = arith.constant 0 : i32
    %c0_i32_1 = arith.constant 0 : i32
    return %c0_i32, %c0_i32_0 : i32, i32
  }
  func.func @transform_13(%arg0: i32) -> (i32, i32) {
    %c0_i32 = arith.constant 0 : i32
    %c0_i32_0 = arith.constant 0 : i32
    %c0_i32_1 = arith.constant 0 : i32
    return %c0_i32, %c0_i32_0 : i32, i32
  }
  func.func @transform_14(%arg0: i32) -> (i32, i32) {
    %c0_i32 = arith.constant 0 : i32
    %c0_i32_0 = arith.constant 0 : i32
    return %arg0, %c0_i32 : i32, i32
  }
  func.func @transform_15(%arg0: i32) -> (i32, i32) {
    %c0_i32 = arith.constant 0 : i32
    %c0_i32_0 = arith.constant 0 : i32
    return %arg0, %c0_i32 : i32, i32
  }
}

module attributes {stable_mosaic.version = 11 : i64} {
  func.func @_in_layer_kernel(%arg0: i32, %arg1: memref<32x8xf32, #tpu.memory_space<vmem>>, %arg2: memref<32x16xf32, #tpu.memory_space<vmem>>, %arg3: memref<32x16xf32, #tpu.memory_space<vmem>>, %arg4: memref<24x32xf32, #tpu.memory_space<vmem>>, %arg5: memref<1x32xf32, #tpu.memory_space<vmem>>, %arg6: memref<32x8xf32, #tpu.memory_space<vmem>>, %arg7: memref<1x8xf32, #tpu.memory_space<vmem>>, %arg8: memref<16x32xf32, #tpu.memory_space<vmem>>, %arg9: memref<1x32xf32, #tpu.memory_space<vmem>>, %arg10: memref<32x8xf32, #tpu.memory_space<vmem>>, %arg11: memref<1x8xf32, #tpu.memory_space<vmem>>, %arg12: memref<32x8xf32, #tpu.memory_space<vmem>>, %arg13: memref<32x16xf32, #tpu.memory_space<vmem>>) attributes {dimension_semantics = [#tpu.dimension_semantics<parallel>], iteration_bounds = array<i64: 2>, scalar_prefetch = 0 : i64, scratch_operands = 0 : i64, tpu.core_type = #tpu.core_type<tc>, window_params = [{transform_indices = @transform_0, window_bounds = array<i64: 32, 8>}, {transform_indices = @transform_1, window_bounds = array<i64: 32, 16>}, {transform_indices = @transform_2, window_bounds = array<i64: 32, 16>}, {pipeline_mode = #tpu.pipeline_mode<synchronous>, transform_indices = @transform_3, window_bounds = array<i64: 24, 32>}, {pipeline_mode = #tpu.pipeline_mode<synchronous>, transform_indices = @transform_4, window_bounds = array<i64: 1, 32>}, {pipeline_mode = #tpu.pipeline_mode<synchronous>, transform_indices = @transform_5, window_bounds = array<i64: 32, 8>}, {pipeline_mode = #tpu.pipeline_mode<synchronous>, transform_indices = @transform_6, window_bounds = array<i64: 1, 8>}, {pipeline_mode = #tpu.pipeline_mode<synchronous>, transform_indices = @transform_7, window_bounds = array<i64: 16, 32>}, {pipeline_mode = #tpu.pipeline_mode<synchronous>, transform_indices = @transform_8, window_bounds = array<i64: 1, 32>}, {pipeline_mode = #tpu.pipeline_mode<synchronous>, transform_indices = @transform_9, window_bounds = array<i64: 32, 8>}, {pipeline_mode = #tpu.pipeline_mode<synchronous>, transform_indices = @transform_10, window_bounds = array<i64: 1, 8>}, {transform_indices = @transform_11, window_bounds = array<i64: 32, 8>}, {transform_indices = @transform_12, window_bounds = array<i64: 32, 16>}]} {
    %c0 = arith.constant 0 : index
    %c0_0 = arith.constant 0 : index
    %0 = vector.load %arg1[%c0, %c0_0] : memref<32x8xf32, #tpu.memory_space<vmem>>, vector<32x8xf32>
    %c0_1 = arith.constant 0 : index
    %c0_2 = arith.constant 0 : index
    %1 = vector.load %arg2[%c0_1, %c0_2] : memref<32x16xf32, #tpu.memory_space<vmem>>, vector<32x16xf32>
    %c0_3 = arith.constant 0 : index
    %c0_4 = arith.constant 0 : index
    %2 = vector.load %arg4[%c0_3, %c0_4] : memref<24x32xf32, #tpu.memory_space<vmem>>, vector<24x32xf32>
    %c0_5 = arith.constant 0 : index
    %c0_6 = arith.constant 0 : index
    %3 = vector.load %arg5[%c0_5, %c0_6] : memref<1x32xf32, #tpu.memory_space<vmem>>, vector<1x32xf32>
    %c0_7 = arith.constant 0 : index
    %c0_8 = arith.constant 0 : index
    %4 = vector.load %arg6[%c0_7, %c0_8] : memref<32x8xf32, #tpu.memory_space<vmem>>, vector<32x8xf32>
    %c0_9 = arith.constant 0 : index
    %c0_10 = arith.constant 0 : index
    %5 = vector.load %arg7[%c0_9, %c0_10] : memref<1x8xf32, #tpu.memory_space<vmem>>, vector<1x8xf32>
    %c0_11 = arith.constant 0 : index
    %c0_12 = arith.constant 0 : index
    %6 = vector.load %arg8[%c0_11, %c0_12] : memref<16x32xf32, #tpu.memory_space<vmem>>, vector<16x32xf32>
    %c0_13 = arith.constant 0 : index
    %c0_14 = arith.constant 0 : index
    %7 = vector.load %arg9[%c0_13, %c0_14] : memref<1x32xf32, #tpu.memory_space<vmem>>, vector<1x32xf32>
    %c0_15 = arith.constant 0 : index
    %c0_16 = arith.constant 0 : index
    %8 = vector.load %arg10[%c0_15, %c0_16] : memref<32x8xf32, #tpu.memory_space<vmem>>, vector<32x8xf32>
    %c0_17 = arith.constant 0 : index
    %c0_18 = arith.constant 0 : index
    %9 = vector.load %arg11[%c0_17, %c0_18] : memref<1x8xf32, #tpu.memory_space<vmem>>, vector<1x8xf32>
    %10 = vector.extract_strided_slice %2 {offsets = [0, 0], sizes = [8, 32], strides = [1, 1]} : vector<24x32xf32> to vector<8x32xf32>
    %11 = arith.truncf %0 : vector<32x8xf32> to vector<32x8xbf16>
    %12 = arith.truncf %10 : vector<8x32xf32> to vector<8x32xbf16>
    %cst = arith.constant dense<0.000000e+00> : vector<32x32xf32>
    %13 = tpu.matmul %11, %12, %cst {dimension_numbers = #tpu.dot_dimension_numbers<[1], [0], [0], [1], [0, 0, 1, 1], [], []>} : vector<32x8xbf16>, vector<8x32xbf16>, vector<32x32xf32> -> vector<32x32xf32>
    %cst_19 = arith.constant 0.000000e+00 : f32
    %14 = vector.broadcast %cst_19 : f32 to vector<32x8xf32>
    %15 = vector.extract_strided_slice %1 {offsets = [0, 0], sizes = [32, 8], strides = [1, 1]} : vector<32x16xf32> to vector<32x8xf32>
    %c0_20 = arith.constant 0 : index
    %c0_21 = arith.constant 0 : index
    %16 = vector.load %arg3[%c0_20, %c0_21] : memref<32x16xf32, #tpu.memory_space<vmem>>, vector<32x8xf32>
    %17 = vector.extract_strided_slice %2 {offsets = [8, 0], sizes = [8, 32], strides = [1, 1]} : vector<24x32xf32> to vector<8x32xf32>
    %18 = arith.truncf %15 : vector<32x8xf32> to vector<32x8xbf16>
    %19 = arith.truncf %17 : vector<8x32xf32> to vector<8x32xbf16>
    %cst_22 = arith.constant dense<0.000000e+00> : vector<32x32xf32>
    %20 = tpu.matmul %18, %19, %cst_22 {dimension_numbers = #tpu.dot_dimension_numbers<[1], [0], [0], [1], [0, 0, 1, 1], [], []>} : vector<32x8xbf16>, vector<8x32xbf16>, vector<32x32xf32> -> vector<32x32xf32>
    %21 = arith.addf %13, %20 : vector<32x32xf32>
    %22 = vector.extract_strided_slice %2 {offsets = [16, 0], sizes = [8, 32], strides = [1, 1]} : vector<24x32xf32> to vector<8x32xf32>
    %23 = arith.truncf %16 : vector<32x8xf32> to vector<32x8xbf16>
    %24 = arith.truncf %22 : vector<8x32xf32> to vector<8x32xbf16>
    %cst_23 = arith.constant dense<0.000000e+00> : vector<32x32xf32>
    %25 = tpu.matmul %23, %24, %cst_23 {dimension_numbers = #tpu.dot_dimension_numbers<[1], [0], [0], [1], [0, 0, 1, 1], [], []>} : vector<32x8xbf16>, vector<8x32xbf16>, vector<32x32xf32> -> vector<32x32xf32>
    %26 = arith.addf %21, %25 : vector<32x32xf32>
    %27 = vector.broadcast %3 : vector<1x32xf32> to vector<32x32xf32>
    %28 = arith.addf %26, %27 : vector<32x32xf32>
    %cst_24 = arith.constant 0.000000e+00 : f32
    %29 = vector.broadcast %cst_24 : f32 to vector<32x32xf32>
    %30 = arith.maximumf %28, %29 : vector<32x32xf32>
    %31 = arith.truncf %30 : vector<32x32xf32> to vector<32x32xbf16>
    %32 = arith.truncf %4 : vector<32x8xf32> to vector<32x8xbf16>
    %cst_25 = arith.constant dense<0.000000e+00> : vector<32x8xf32>
    %33 = tpu.matmul %31, %32, %cst_25 {dimension_numbers = #tpu.dot_dimension_numbers<[1], [0], [0], [1], [0, 0, 1, 1], [], []>} : vector<32x32xbf16>, vector<32x8xbf16>, vector<32x8xf32> -> vector<32x8xf32>
    %34 = vector.broadcast %5 : vector<1x8xf32> to vector<32x8xf32>
    %35 = arith.addf %33, %34 : vector<32x8xf32>
    %c0_26 = arith.constant 0 : index
    %c0_27 = arith.constant 0 : index
    %36 = vector.load %arg13[%c0_26, %c0_27] : memref<32x16xf32, #tpu.memory_space<vmem>>, vector<32x8xf32>
    tpu.vector_store %arg13[%c0_26, %c0_27], %35 {strides = array<i32>} : memref<32x16xf32, #tpu.memory_space<vmem>>, vector<32x8xf32>,
    %37 = arith.addf %14, %35 : vector<32x8xf32>
    %38 = vector.extract_strided_slice %1 {offsets = [0, 8], sizes = [32, 8], strides = [1, 1]} : vector<32x16xf32> to vector<32x8xf32>
    %c0_28 = arith.constant 0 : index
    %c8 = arith.constant 8 : index
    %39 = vector.load %arg3[%c0_28, %c8] : memref<32x16xf32, #tpu.memory_space<vmem>>, vector<32x8xf32>
    %40 = vector.extract_strided_slice %2 {offsets = [8, 0], sizes = [8, 32], strides = [1, 1]} : vector<24x32xf32> to vector<8x32xf32>
    %41 = arith.truncf %38 : vector<32x8xf32> to vector<32x8xbf16>
    %42 = arith.truncf %40 : vector<8x32xf32> to vector<8x32xbf16>
    %cst_29 = arith.constant dense<0.000000e+00> : vector<32x32xf32>
    %43 = tpu.matmul %41, %42, %cst_29 {dimension_numbers = #tpu.dot_dimension_numbers<[1], [0], [0], [1], [0, 0, 1, 1], [], []>} : vector<32x8xbf16>, vector<8x32xbf16>, vector<32x32xf32> -> vector<32x32xf32>
    %44 = arith.addf %13, %43 : vector<32x32xf32>
    %45 = vector.extract_strided_slice %2 {offsets = [16, 0], sizes = [8, 32], strides = [1, 1]} : vector<24x32xf32> to vector<8x32xf32>
    %46 = arith.truncf %39 : vector<32x8xf32> to vector<32x8xbf16>
    %47 = arith.truncf %45 : vector<8x32xf32> to vector<8x32xbf16>
    %cst_30 = arith.constant dense<0.000000e+00> : vector<32x32xf32>
    %48 = tpu.matmul %46, %47, %cst_30 {dimension_numbers = #tpu.dot_dimension_numbers<[1], [0], [0], [1], [0, 0, 1, 1], [], []>} : vector<32x8xbf16>, vector<8x32xbf16>, vector<32x32xf32> -> vector<32x32xf32>
    %49 = arith.addf %44, %48 : vector<32x32xf32>
    %50 = vector.broadcast %3 : vector<1x32xf32> to vector<32x32xf32>
    %51 = arith.addf %49, %50 : vector<32x32xf32>
    %cst_31 = arith.constant 0.000000e+00 : f32
    %52 = vector.broadcast %cst_31 : f32 to vector<32x32xf32>
    %53 = arith.maximumf %51, %52 : vector<32x32xf32>
    %54 = arith.truncf %53 : vector<32x32xf32> to vector<32x32xbf16>
    %55 = arith.truncf %4 : vector<32x8xf32> to vector<32x8xbf16>
    %cst_32 = arith.constant dense<0.000000e+00> : vector<32x8xf32>
    %56 = tpu.matmul %54, %55, %cst_32 {dimension_numbers = #tpu.dot_dimension_numbers<[1], [0], [0], [1], [0, 0, 1, 1], [], []>} : vector<32x32xbf16>, vector<32x8xbf16>, vector<32x8xf32> -> vector<32x8xf32>
    %57 = vector.broadcast %5 : vector<1x8xf32> to vector<32x8xf32>
    %58 = arith.addf %56, %57 : vector<32x8xf32>
    %c0_33 = arith.constant 0 : index
    %c8_34 = arith.constant 8 : index
    %59 = vector.load %arg13[%c0_33, %c8_34] : memref<32x16xf32, #tpu.memory_space<vmem>>, vector<32x8xf32>
    tpu.vector_store %arg13[%c0_33, %c8_34], %58 {strides = array<i32>} : memref<32x16xf32, #tpu.memory_space<vmem>>, vector<32x8xf32>,
    %60 = arith.addf %37, %58 : vector<32x8xf32>
    %61 = vector.extract_strided_slice %6 {offsets = [0, 0], sizes = [8, 32], strides = [1, 1]} : vector<16x32xf32> to vector<8x32xf32>
    %62 = arith.truncf %0 : vector<32x8xf32> to vector<32x8xbf16>
    %63 = arith.truncf %61 : vector<8x32xf32> to vector<8x32xbf16>
    %cst_35 = arith.constant dense<0.000000e+00> : vector<32x32xf32>
    %64 = tpu.matmul %62, %63, %cst_35 {dimension_numbers = #tpu.dot_dimension_numbers<[1], [0], [0], [1], [0, 0, 1, 1], [], []>} : vector<32x8xbf16>, vector<8x32xbf16>, vector<32x32xf32> -> vector<32x32xf32>
    %65 = vector.extract_strided_slice %6 {offsets = [8, 0], sizes = [8, 32], strides = [1, 1]} : vector<16x32xf32> to vector<8x32xf32>
    %66 = arith.truncf %60 : vector<32x8xf32> to vector<32x8xbf16>
    %67 = arith.truncf %65 : vector<8x32xf32> to vector<8x32xbf16>
    %cst_36 = arith.constant dense<0.000000e+00> : vector<32x32xf32>
    %68 = tpu.matmul %66, %67, %cst_36 {dimension_numbers = #tpu.dot_dimension_numbers<[1], [0], [0], [1], [0, 0, 1, 1], [], []>} : vector<32x8xbf16>, vector<8x32xbf16>, vector<32x32xf32> -> vector<32x32xf32>
    %69 = arith.addf %64, %68 : vector<32x32xf32>
    %70 = vector.broadcast %7 : vector<1x32xf32> to vector<32x32xf32>
    %71 = arith.addf %69, %70 : vector<32x32xf32>
    %cst_37 = arith.constant 0.000000e+00 : f32
    %72 = vector.broadcast %cst_37 : f32 to vector<32x32xf32>
    %73 = arith.maximumf %71, %72 : vector<32x32xf32>
    %74 = arith.truncf %73 : vector<32x32xf32> to vector<32x32xbf16>
    %75 = arith.truncf %8 : vector<32x8xf32> to vector<32x8xbf16>
    %cst_38 = arith.constant dense<0.000000e+00> : vector<32x8xf32>
    %76 = tpu.matmul %74, %75, %cst_38 {dimension_numbers = #tpu.dot_dimension_numbers<[1], [0], [0], [1], [0, 0, 1, 1], [], []>} : vector<32x32xbf16>, vector<32x8xbf16>, vector<32x8xf32> -> vector<32x8xf32>
    %77 = vector.broadcast %9 : vector<1x8xf32> to vector<32x8xf32>
    %78 = arith.addf %76, %77 : vector<32x8xf32>
    %cst_39 = arith.constant 5.000000e-01 : f32
    %79 = vector.broadcast %cst_39 : f32 to vector<32x8xf32>
    %80 = arith.mulf %79, %0 : vector<32x8xf32>
    %cst_40 = arith.constant 5.000000e-01 : f32
    %81 = vector.broadcast %cst_40 : f32 to vector<32x8xf32>
    %82 = arith.mulf %81, %78 : vector<32x8xf32>
    %83 = arith.addf %80, %82 : vector<32x8xf32>
    %c0_41 = arith.constant 0 : index
    %c0_42 = arith.constant 0 : index
    %84 = vector.load %arg12[%c0_41, %c0_42] : memref<32x8xf32, #tpu.memory_space<vmem>>, vector<32x8xf32>
    tpu.vector_store %arg12[%c0_41, %c0_42], %83 {strides = array<i32>} : memref<32x8xf32, #tpu.memory_space<vmem>>, vector<32x8xf32>,
    return
  }
  func.func @transform_0(%arg0: i32) -> (i32, i32) {
    %c0_i32 = arith.constant 0 : i32
    %c0_i32_0 = arith.constant 0 : i32
    return %arg0, %c0_i32 : i32, i32
  }
  func.func @transform_1(%arg0: i32) -> (i32, i32) {
    %c0_i32 = arith.constant 0 : i32
    %c0_i32_0 = arith.constant 0 : i32
    return %arg0, %c0_i32 : i32, i32
  }
  func.func @transform_2(%arg0: i32) -> (i32, i32) {
    %c0_i32 = arith.constant 0 : i32
    %c0_i32_0 = arith.constant 0 : i32
    return %arg0, %c0_i32 : i32, i32
  }
  func.func @transform_3(%arg0: i32) -> (i32, i32) {
    %c0_i32 = arith.constant 0 : i32
    %c0_i32_0 = arith.constant 0 : i32
    %c0_i32_1 = arith.constant 0 : i32
    return %c0_i32, %c0_i32_0 : i32, i32
  }
  func.func @transform_4(%arg0: i32) -> (i32, i32) {
    %c0_i32 = arith.constant 0 : i32
    %c0_i32_0 = arith.constant 0 : i32
    %c0_i32_1 = arith.constant 0 : i32
    return %c0_i32, %c0_i32_0 : i32, i32
  }
  func.func @transform_5(%arg0: i32) -> (i32, i32) {
    %c0_i32 = arith.constant 0 : i32
    %c0_i32_0 = arith.constant 0 : i32
    %c0_i32_1 = arith.constant 0 : i32
    return %c0_i32, %c0_i32_0 : i32, i32
  }
  func.func @transform_6(%arg0: i32) -> (i32, i32) {
    %c0_i32 = arith.constant 0 : i32
    %c0_i32_0 = arith.constant 0 : i32
    %c0_i32_1 = arith.constant 0 : i32
    return %c0_i32, %c0_i32_0 : i32, i32
  }
  func.func @transform_7(%arg0: i32) -> (i32, i32) {
    %c0_i32 = arith.constant 0 : i32
    %c0_i32_0 = arith.constant 0 : i32
    %c0_i32_1 = arith.constant 0 : i32
    return %c0_i32, %c0_i32_0 : i32, i32
  }
  func.func @transform_8(%arg0: i32) -> (i32, i32) {
    %c0_i32 = arith.constant 0 : i32
    %c0_i32_0 = arith.constant 0 : i32
    %c0_i32_1 = arith.constant 0 : i32
    return %c0_i32, %c0_i32_0 : i32, i32
  }
  func.func @transform_9(%arg0: i32) -> (i32, i32) {
    %c0_i32 = arith.constant 0 : i32
    %c0_i32_0 = arith.constant 0 : i32
    %c0_i32_1 = arith.constant 0 : i32
    return %c0_i32, %c0_i32_0 : i32, i32
  }
  func.func @transform_10(%arg0: i32) -> (i32, i32) {
    %c0_i32 = arith.constant 0 : i32
    %c0_i32_0 = arith.constant 0 : i32
    %c0_i32_1 = arith.constant 0 : i32
    return %c0_i32, %c0_i32_0 : i32, i32
  }
  func.func @transform_11(%arg0: i32) -> (i32, i32) {
    %c0_i32 = arith.constant 0 : i32
    %c0_i32_0 = arith.constant 0 : i32
    return %arg0, %c0_i32 : i32, i32
  }
  func.func @transform_12(%arg0: i32) -> (i32, i32) {
    %c0_i32 = arith.constant 0 : i32
    %c0_i32_0 = arith.constant 0 : i32
    return %arg0, %c0_i32 : i32, i32
  }
}

module attributes {stable_mosaic.version = 11 : i64} {
  func.func @_pdist_kernel(%arg0: i32, %arg1: memref<32x8xf32, #tpu.memory_space<vmem>>, %arg2: memref<64x8xf32, #tpu.memory_space<vmem>>, %arg3: memref<1x64xf32, #tpu.memory_space<vmem>>, %arg4: memref<32x64xf32, #tpu.memory_space<vmem>>) attributes {dimension_semantics = [#tpu.dimension_semantics<parallel>], iteration_bounds = array<i64: 2>, scalar_prefetch = 0 : i64, scratch_operands = 0 : i64, tpu.core_type = #tpu.core_type<tc>, window_params = [{transform_indices = @transform_0, window_bounds = array<i64: 32, 8>}, {pipeline_mode = #tpu.pipeline_mode<synchronous>, transform_indices = @transform_1, window_bounds = array<i64: 64, 8>}, {pipeline_mode = #tpu.pipeline_mode<synchronous>, transform_indices = @transform_2, window_bounds = array<i64: 1, 64>}, {transform_indices = @transform_3, window_bounds = array<i64: 32, 64>}]} {
    %c0 = arith.constant 0 : index
    %c0_0 = arith.constant 0 : index
    %0 = vector.load %arg1[%c0, %c0_0] : memref<32x8xf32, #tpu.memory_space<vmem>>, vector<32x8xf32>
    %c0_1 = arith.constant 0 : index
    %c0_2 = arith.constant 0 : index
    %1 = vector.load %arg2[%c0_1, %c0_2] : memref<64x8xf32, #tpu.memory_space<vmem>>, vector<64x8xf32>
    %2 = arith.mulf %0, %0 : vector<32x8xf32>
    %cst = arith.constant dense<0.000000e+00> : vector<32xf32>
    %3 = vector.multi_reduction <add>, %2, %cst [1] : vector<32x8xf32> to vector<32xf32>
    %4 = vector.shape_cast %3 : vector<32xf32> to vector<32x1xf32>
    %cst_3 = arith.constant dense<0.000000e+00> : vector<32x64xf32>
    %5 = tpu.matmul %0, %1, %cst_3 {dimension_numbers = #tpu.dot_dimension_numbers<[1], [1], [0], [0], [0, 0, 1, 0], [], []>} : vector<32x8xf32>, vector<64x8xf32>, vector<32x64xf32> -> vector<32x64xf32>
    %c0_4 = arith.constant 0 : index
    %c0_5 = arith.constant 0 : index
    %6 = vector.load %arg3[%c0_4, %c0_5] : memref<1x64xf32, #tpu.memory_space<vmem>>, vector<1x64xf32>
    %7 = vector.broadcast %4 : vector<32x1xf32> to vector<32x64xf32>
    %8 = vector.broadcast %6 : vector<1x64xf32> to vector<32x64xf32>
    %9 = arith.addf %7, %8 : vector<32x64xf32>
    %cst_6 = arith.constant 2.000000e+00 : f32
    %10 = vector.broadcast %cst_6 : f32 to vector<32x64xf32>
    %11 = arith.mulf %10, %5 : vector<32x64xf32>
    %12 = arith.subf %9, %11 : vector<32x64xf32>
    %c0_7 = arith.constant 0 : index
    %c0_8 = arith.constant 0 : index
    %13 = vector.load %arg4[%c0_7, %c0_8] : memref<32x64xf32, #tpu.memory_space<vmem>>, vector<32x64xf32>
    tpu.vector_store %arg4[%c0_7, %c0_8], %12 {strides = array<i32>} : memref<32x64xf32, #tpu.memory_space<vmem>>, vector<32x64xf32>,
    return
  }
  func.func @transform_0(%arg0: i32) -> (i32, i32) {
    %c0_i32 = arith.constant 0 : i32
    %c0_i32_0 = arith.constant 0 : i32
    return %arg0, %c0_i32 : i32, i32
  }
  func.func @transform_1(%arg0: i32) -> (i32, i32) {
    %c0_i32 = arith.constant 0 : i32
    %c0_i32_0 = arith.constant 0 : i32
    %c0_i32_1 = arith.constant 0 : i32
    return %c0_i32, %c0_i32_0 : i32, i32
  }
  func.func @transform_2(%arg0: i32) -> (i32, i32) {
    %c0_i32 = arith.constant 0 : i32
    %c0_i32_0 = arith.constant 0 : i32
    %c0_i32_1 = arith.constant 0 : i32
    return %c0_i32, %c0_i32_0 : i32, i32
  }
  func.func @transform_3(%arg0: i32) -> (i32, i32) {
    %c0_i32 = arith.constant 0 : i32
    %c0_i32_0 = arith.constant 0 : i32
    return %arg0, %c0_i32 : i32, i32
  }
}

module attributes {stable_mosaic.version = 11 : i64} {
  func.func @_edge_conv_kernel(%arg0: i32, %arg1: memref<32x8xf32, #tpu.memory_space<vmem>>, %arg2: memref<32x16xf32, #tpu.memory_space<vmem>>, %arg3: memref<16x32xf32, #tpu.memory_space<vmem>>, %arg4: memref<1x32xf32, #tpu.memory_space<vmem>>, %arg5: memref<32x8xf32, #tpu.memory_space<vmem>>, %arg6: memref<1x8xf32, #tpu.memory_space<vmem>>, %arg7: memref<32x8xf32, #tpu.memory_space<vmem>>) attributes {dimension_semantics = [#tpu.dimension_semantics<parallel>], iteration_bounds = array<i64: 2>, scalar_prefetch = 0 : i64, scratch_operands = 0 : i64, tpu.core_type = #tpu.core_type<tc>, window_params = [{transform_indices = @transform_0, window_bounds = array<i64: 32, 8>}, {transform_indices = @transform_1, window_bounds = array<i64: 32, 16>}, {pipeline_mode = #tpu.pipeline_mode<synchronous>, transform_indices = @transform_2, window_bounds = array<i64: 16, 32>}, {pipeline_mode = #tpu.pipeline_mode<synchronous>, transform_indices = @transform_3, window_bounds = array<i64: 1, 32>}, {pipeline_mode = #tpu.pipeline_mode<synchronous>, transform_indices = @transform_4, window_bounds = array<i64: 32, 8>}, {pipeline_mode = #tpu.pipeline_mode<synchronous>, transform_indices = @transform_5, window_bounds = array<i64: 1, 8>}, {transform_indices = @transform_6, window_bounds = array<i64: 32, 8>}]} {
    %c0 = arith.constant 0 : index
    %c0_0 = arith.constant 0 : index
    %0 = vector.load %arg1[%c0, %c0_0] : memref<32x8xf32, #tpu.memory_space<vmem>>, vector<32x8xf32>
    %c0_1 = arith.constant 0 : index
    %c0_2 = arith.constant 0 : index
    %1 = vector.load %arg2[%c0_1, %c0_2] : memref<32x16xf32, #tpu.memory_space<vmem>>, vector<32x16xf32>
    %c0_3 = arith.constant 0 : index
    %c0_4 = arith.constant 0 : index
    %2 = vector.load %arg3[%c0_3, %c0_4] : memref<16x32xf32, #tpu.memory_space<vmem>>, vector<16x32xf32>
    %c0_5 = arith.constant 0 : index
    %c0_6 = arith.constant 0 : index
    %3 = vector.load %arg4[%c0_5, %c0_6] : memref<1x32xf32, #tpu.memory_space<vmem>>, vector<1x32xf32>
    %c0_7 = arith.constant 0 : index
    %c0_8 = arith.constant 0 : index
    %4 = vector.load %arg5[%c0_7, %c0_8] : memref<32x8xf32, #tpu.memory_space<vmem>>, vector<32x8xf32>
    %c0_9 = arith.constant 0 : index
    %c0_10 = arith.constant 0 : index
    %5 = vector.load %arg6[%c0_9, %c0_10] : memref<1x8xf32, #tpu.memory_space<vmem>>, vector<1x8xf32>
    %6 = vector.extract_strided_slice %2 {offsets = [0, 0], sizes = [8, 32], strides = [1, 1]} : vector<16x32xf32> to vector<8x32xf32>
    %7 = arith.truncf %0 : vector<32x8xf32> to vector<32x8xbf16>
    %8 = arith.truncf %6 : vector<8x32xf32> to vector<8x32xbf16>
    %cst = arith.constant dense<0.000000e+00> : vector<32x32xf32>
    %9 = tpu.matmul %7, %8, %cst {dimension_numbers = #tpu.dot_dimension_numbers<[1], [0], [0], [1], [0, 0, 1, 1], [], []>} : vector<32x8xbf16>, vector<8x32xbf16>, vector<32x32xf32> -> vector<32x32xf32>
    %cst_11 = arith.constant 0.000000e+00 : f32
    %10 = vector.broadcast %cst_11 : f32 to vector<32x8xf32>
    %11 = vector.extract_strided_slice %1 {offsets = [0, 0], sizes = [32, 8], strides = [1, 1]} : vector<32x16xf32> to vector<32x8xf32>
    %12 = arith.subf %11, %0 : vector<32x8xf32>
    %13 = vector.extract_strided_slice %2 {offsets = [8, 0], sizes = [8, 32], strides = [1, 1]} : vector<16x32xf32> to vector<8x32xf32>
    %14 = arith.truncf %12 : vector<32x8xf32> to vector<32x8xbf16>
    %15 = arith.truncf %13 : vector<8x32xf32> to vector<8x32xbf16>
    %cst_12 = arith.constant dense<0.000000e+00> : vector<32x32xf32>
    %16 = tpu.matmul %14, %15, %cst_12 {dimension_numbers = #tpu.dot_dimension_numbers<[1], [0], [0], [1], [0, 0, 1, 1], [], []>} : vector<32x8xbf16>, vector<8x32xbf16>, vector<32x32xf32> -> vector<32x32xf32>
    %17 = arith.addf %9, %16 : vector<32x32xf32>
    %18 = vector.broadcast %3 : vector<1x32xf32> to vector<32x32xf32>
    %19 = arith.addf %17, %18 : vector<32x32xf32>
    %cst_13 = arith.constant 0.000000e+00 : f32
    %20 = vector.broadcast %cst_13 : f32 to vector<32x32xf32>
    %21 = arith.maximumf %19, %20 : vector<32x32xf32>
    %22 = arith.truncf %21 : vector<32x32xf32> to vector<32x32xbf16>
    %23 = arith.truncf %4 : vector<32x8xf32> to vector<32x8xbf16>
    %cst_14 = arith.constant dense<0.000000e+00> : vector<32x8xf32>
    %24 = tpu.matmul %22, %23, %cst_14 {dimension_numbers = #tpu.dot_dimension_numbers<[1], [0], [0], [1], [0, 0, 1, 1], [], []>} : vector<32x32xbf16>, vector<32x8xbf16>, vector<32x8xf32> -> vector<32x8xf32>
    %25 = arith.addf %10, %24 : vector<32x8xf32>
    %26 = vector.broadcast %5 : vector<1x8xf32> to vector<32x8xf32>
    %27 = arith.addf %25, %26 : vector<32x8xf32>
    %28 = vector.extract_strided_slice %1 {offsets = [0, 8], sizes = [32, 8], strides = [1, 1]} : vector<32x16xf32> to vector<32x8xf32>
    %29 = arith.subf %28, %0 : vector<32x8xf32>
    %30 = vector.extract_strided_slice %2 {offsets = [8, 0], sizes = [8, 32], strides = [1, 1]} : vector<16x32xf32> to vector<8x32xf32>
    %31 = arith.truncf %29 : vector<32x8xf32> to vector<32x8xbf16>
    %32 = arith.truncf %30 : vector<8x32xf32> to vector<8x32xbf16>
    %cst_15 = arith.constant dense<0.000000e+00> : vector<32x32xf32>
    %33 = tpu.matmul %31, %32, %cst_15 {dimension_numbers = #tpu.dot_dimension_numbers<[1], [0], [0], [1], [0, 0, 1, 1], [], []>} : vector<32x8xbf16>, vector<8x32xbf16>, vector<32x32xf32> -> vector<32x32xf32>
    %34 = arith.addf %9, %33 : vector<32x32xf32>
    %35 = vector.broadcast %3 : vector<1x32xf32> to vector<32x32xf32>
    %36 = arith.addf %34, %35 : vector<32x32xf32>
    %cst_16 = arith.constant 0.000000e+00 : f32
    %37 = vector.broadcast %cst_16 : f32 to vector<32x32xf32>
    %38 = arith.maximumf %36, %37 : vector<32x32xf32>
    %39 = arith.truncf %38 : vector<32x32xf32> to vector<32x32xbf16>
    %40 = arith.truncf %4 : vector<32x8xf32> to vector<32x8xbf16>
    %cst_17 = arith.constant dense<0.000000e+00> : vector<32x8xf32>
    %41 = tpu.matmul %39, %40, %cst_17 {dimension_numbers = #tpu.dot_dimension_numbers<[1], [0], [0], [1], [0, 0, 1, 1], [], []>} : vector<32x32xbf16>, vector<32x8xbf16>, vector<32x8xf32> -> vector<32x8xf32>
    %42 = arith.addf %27, %41 : vector<32x8xf32>
    %43 = vector.broadcast %5 : vector<1x8xf32> to vector<32x8xf32>
    %44 = arith.addf %42, %43 : vector<32x8xf32>
    %cst_18 = arith.constant 0.000000e+00 : f32
    %45 = vector.broadcast %cst_18 : f32 to vector<32x8xf32>
    %46 = arith.maximumf %44, %45 : vector<32x8xf32>
    %c0_19 = arith.constant 0 : index
    %c0_20 = arith.constant 0 : index
    %47 = vector.load %arg7[%c0_19, %c0_20] : memref<32x8xf32, #tpu.memory_space<vmem>>, vector<32x8xf32>
    tpu.vector_store %arg7[%c0_19, %c0_20], %46 {strides = array<i32>} : memref<32x8xf32, #tpu.memory_space<vmem>>, vector<32x8xf32>,
    return
  }
  func.func @transform_0(%arg0: i32) -> (i32, i32) {
    %c0_i32 = arith.constant 0 : i32
    %c0_i32_0 = arith.constant 0 : i32
    return %arg0, %c0_i32 : i32, i32
  }
  func.func @transform_1(%arg0: i32) -> (i32, i32) {
    %c0_i32 = arith.constant 0 : i32
    %c0_i32_0 = arith.constant 0 : i32
    return %arg0, %c0_i32 : i32, i32
  }
  func.func @transform_2(%arg0: i32) -> (i32, i32) {
    %c0_i32 = arith.constant 0 : i32
    %c0_i32_0 = arith.constant 0 : i32
    %c0_i32_1 = arith.constant 0 : i32
    return %c0_i32, %c0_i32_0 : i32, i32
  }
  func.func @transform_3(%arg0: i32) -> (i32, i32) {
    %c0_i32 = arith.constant 0 : i32
    %c0_i32_0 = arith.constant 0 : i32
    %c0_i32_1 = arith.constant 0 : i32
    return %c0_i32, %c0_i32_0 : i32, i32
  }
  func.func @transform_4(%arg0: i32) -> (i32, i32) {
    %c0_i32 = arith.constant 0 : i32
    %c0_i32_0 = arith.constant 0 : i32
    %c0_i32_1 = arith.constant 0 : i32
    return %c0_i32, %c0_i32_0 : i32, i32
  }
  func.func @transform_5(%arg0: i32) -> (i32, i32) {
    %c0_i32 = arith.constant 0 : i32
    %c0_i32_0 = arith.constant 0 : i32
    %c0_i32_1 = arith.constant 0 : i32
    return %c0_i32, %c0_i32_0 : i32, i32
  }
  func.func @transform_6(%arg0: i32) -> (i32, i32) {
    %c0_i32 = arith.constant 0 : i32
    %c0_i32_0 = arith.constant 0 : i32
    return %arg0, %c0_i32 : i32, i32
  }
}

module attributes {stable_mosaic.version = 11 : i64} {
  func.func @_edge_conv_kernel(%arg0: i32, %arg1: memref<32x8xf32, #tpu.memory_space<vmem>>, %arg2: memref<32x8xf32, #tpu.memory_space<vmem>>, %arg3: memref<16x32xf32, #tpu.memory_space<vmem>>, %arg4: memref<1x32xf32, #tpu.memory_space<vmem>>, %arg5: memref<32x8xf32, #tpu.memory_space<vmem>>, %arg6: memref<1x8xf32, #tpu.memory_space<vmem>>, %arg7: memref<32x8xf32, #tpu.memory_space<vmem>>) attributes {dimension_semantics = [#tpu.dimension_semantics<parallel>], iteration_bounds = array<i64: 2>, scalar_prefetch = 0 : i64, scratch_operands = 0 : i64, tpu.core_type = #tpu.core_type<tc>, window_params = [{transform_indices = @transform_0, window_bounds = array<i64: 32, 8>}, {transform_indices = @transform_1, window_bounds = array<i64: 32, 8>}, {pipeline_mode = #tpu.pipeline_mode<synchronous>, transform_indices = @transform_2, window_bounds = array<i64: 16, 32>}, {pipeline_mode = #tpu.pipeline_mode<synchronous>, transform_indices = @transform_3, window_bounds = array<i64: 1, 32>}, {pipeline_mode = #tpu.pipeline_mode<synchronous>, transform_indices = @transform_4, window_bounds = array<i64: 32, 8>}, {pipeline_mode = #tpu.pipeline_mode<synchronous>, transform_indices = @transform_5, window_bounds = array<i64: 1, 8>}, {transform_indices = @transform_6, window_bounds = array<i64: 32, 8>}]} {
    %c0 = arith.constant 0 : index
    %c0_0 = arith.constant 0 : index
    %0 = vector.load %arg1[%c0, %c0_0] : memref<32x8xf32, #tpu.memory_space<vmem>>, vector<32x8xf32>
    %c0_1 = arith.constant 0 : index
    %c0_2 = arith.constant 0 : index
    %1 = vector.load %arg2[%c0_1, %c0_2] : memref<32x8xf32, #tpu.memory_space<vmem>>, vector<32x8xf32>
    %c0_3 = arith.constant 0 : index
    %c0_4 = arith.constant 0 : index
    %2 = vector.load %arg3[%c0_3, %c0_4] : memref<16x32xf32, #tpu.memory_space<vmem>>, vector<16x32xf32>
    %c0_5 = arith.constant 0 : index
    %c0_6 = arith.constant 0 : index
    %3 = vector.load %arg4[%c0_5, %c0_6] : memref<1x32xf32, #tpu.memory_space<vmem>>, vector<1x32xf32>
    %c0_7 = arith.constant 0 : index
    %c0_8 = arith.constant 0 : index
    %4 = vector.load %arg5[%c0_7, %c0_8] : memref<32x8xf32, #tpu.memory_space<vmem>>, vector<32x8xf32>
    %c0_9 = arith.constant 0 : index
    %c0_10 = arith.constant 0 : index
    %5 = vector.load %arg6[%c0_9, %c0_10] : memref<1x8xf32, #tpu.memory_space<vmem>>, vector<1x8xf32>
    %6 = vector.extract_strided_slice %2 {offsets = [0, 0], sizes = [8, 32], strides = [1, 1]} : vector<16x32xf32> to vector<8x32xf32>
    %7 = arith.truncf %0 : vector<32x8xf32> to vector<32x8xbf16>
    %8 = arith.truncf %6 : vector<8x32xf32> to vector<8x32xbf16>
    %cst = arith.constant dense<0.000000e+00> : vector<32x32xf32>
    %9 = tpu.matmul %7, %8, %cst {dimension_numbers = #tpu.dot_dimension_numbers<[1], [0], [0], [1], [0, 0, 1, 1], [], []>} : vector<32x8xbf16>, vector<8x32xbf16>, vector<32x32xf32> -> vector<32x32xf32>
    %cst_11 = arith.constant 0.000000e+00 : f32
    %10 = vector.broadcast %cst_11 : f32 to vector<32x8xf32>
    %11 = arith.subf %1, %0 : vector<32x8xf32>
    %12 = vector.extract_strided_slice %2 {offsets = [8, 0], sizes = [8, 32], strides = [1, 1]} : vector<16x32xf32> to vector<8x32xf32>
    %13 = arith.truncf %11 : vector<32x8xf32> to vector<32x8xbf16>
    %14 = arith.truncf %12 : vector<8x32xf32> to vector<8x32xbf16>
    %cst_12 = arith.constant dense<0.000000e+00> : vector<32x32xf32>
    %15 = tpu.matmul %13, %14, %cst_12 {dimension_numbers = #tpu.dot_dimension_numbers<[1], [0], [0], [1], [0, 0, 1, 1], [], []>} : vector<32x8xbf16>, vector<8x32xbf16>, vector<32x32xf32> -> vector<32x32xf32>
    %16 = arith.addf %9, %15 : vector<32x32xf32>
    %17 = vector.broadcast %3 : vector<1x32xf32> to vector<32x32xf32>
    %18 = arith.addf %16, %17 : vector<32x32xf32>
    %cst_13 = arith.constant 0.000000e+00 : f32
    %19 = vector.broadcast %cst_13 : f32 to vector<32x32xf32>
    %20 = arith.maximumf %18, %19 : vector<32x32xf32>
    %21 = arith.truncf %20 : vector<32x32xf32> to vector<32x32xbf16>
    %22 = arith.truncf %4 : vector<32x8xf32> to vector<32x8xbf16>
    %cst_14 = arith.constant dense<0.000000e+00> : vector<32x8xf32>
    %23 = tpu.matmul %21, %22, %cst_14 {dimension_numbers = #tpu.dot_dimension_numbers<[1], [0], [0], [1], [0, 0, 1, 1], [], []>} : vector<32x32xbf16>, vector<32x8xbf16>, vector<32x8xf32> -> vector<32x8xf32>
    %24 = arith.addf %10, %23 : vector<32x8xf32>
    %25 = vector.broadcast %5 : vector<1x8xf32> to vector<32x8xf32>
    %26 = arith.addf %24, %25 : vector<32x8xf32>
    %cst_15 = arith.constant 0.000000e+00 : f32
    %27 = vector.broadcast %cst_15 : f32 to vector<32x8xf32>
    %28 = arith.maximumf %26, %27 : vector<32x8xf32>
    %c0_16 = arith.constant 0 : index
    %c0_17 = arith.constant 0 : index
    %29 = vector.load %arg7[%c0_16, %c0_17] : memref<32x8xf32, #tpu.memory_space<vmem>>, vector<32x8xf32>
    tpu.vector_store %arg7[%c0_16, %c0_17], %28 {strides = array<i32>} : memref<32x8xf32, #tpu.memory_space<vmem>>, vector<32x8xf32>,
    return
  }
  func.func @transform_0(%arg0: i32) -> (i32, i32) {
    %c0_i32 = arith.constant 0 : i32
    %c0_i32_0 = arith.constant 0 : i32
    return %arg0, %c0_i32 : i32, i32
  }
  func.func @transform_1(%arg0: i32) -> (i32, i32) {
    %c0_i32 = arith.constant 0 : i32
    %c0_i32_0 = arith.constant 0 : i32
    return %arg0, %c0_i32 : i32, i32
  }
  func.func @transform_2(%arg0: i32) -> (i32, i32) {
    %c0_i32 = arith.constant 0 : i32
    %c0_i32_0 = arith.constant 0 : i32
    %c0_i32_1 = arith.constant 0 : i32
    return %c0_i32, %c0_i32_0 : i32, i32
  }
  func.func @transform_3(%arg0: i32) -> (i32, i32) {
    %c0_i32 = arith.constant 0 : i32
    %c0_i32_0 = arith.constant 0 : i32
    %c0_i32_1 = arith.constant 0 : i32
    return %c0_i32, %c0_i32_0 : i32, i32
  }
  func.func @transform_4(%arg0: i32) -> (i32, i32) {
    %c0_i32 = arith.constant 0 : i32
    %c0_i32_0 = arith.constant 0 : i32
    %c0_i32_1 = arith.constant 0 : i32
    return %c0_i32, %c0_i32_0 : i32, i32
  }
  func.func @transform_5(%arg0: i32) -> (i32, i32) {
    %c0_i32 = arith.constant 0 : i32
    %c0_i32_0 = arith.constant 0 : i32
    %c0_i32_1 = arith.constant 0 : i32
    return %c0_i32, %c0_i32_0 : i32, i32
  }
  func.func @transform_6(%arg0: i32) -> (i32, i32) {
    %c0_i32 = arith.constant 0 : i32
    %c0_i32_0 = arith.constant 0 : i32
    return %arg0, %c0_i32 : i32, i32
  }
}

module attributes {stable_mosaic.version = 11 : i64} {
  func.func @_in_layer_kernel(%arg0: i32, %arg1: memref<32x8xf32, #tpu.memory_space<vmem>>, %arg2: memref<32x8xf32, #tpu.memory_space<vmem>>, %arg3: memref<16x32xf32, #tpu.memory_space<vmem>>, %arg4: memref<1x32xf32, #tpu.memory_space<vmem>>, %arg5: memref<32x8xf32, #tpu.memory_space<vmem>>, %arg6: memref<1x8xf32, #tpu.memory_space<vmem>>, %arg7: memref<24x32xf32, #tpu.memory_space<vmem>>, %arg8: memref<1x32xf32, #tpu.memory_space<vmem>>, %arg9: memref<32x8xf32, #tpu.memory_space<vmem>>, %arg10: memref<1x8xf32, #tpu.memory_space<vmem>>, %arg11: memref<16x32xf32, #tpu.memory_space<vmem>>, %arg12: memref<1x32xf32, #tpu.memory_space<vmem>>, %arg13: memref<32x8xf32, #tpu.memory_space<vmem>>, %arg14: memref<1x8xf32, #tpu.memory_space<vmem>>, %arg15: memref<32x8xf32, #tpu.memory_space<vmem>>, %arg16: memref<32x8xf32, #tpu.memory_space<vmem>>) attributes {dimension_semantics = [#tpu.dimension_semantics<parallel>], iteration_bounds = array<i64: 2>, scalar_prefetch = 0 : i64, scratch_operands = 0 : i64, tpu.core_type = #tpu.core_type<tc>, window_params = [{transform_indices = @transform_0, window_bounds = array<i64: 32, 8>}, {transform_indices = @transform_1, window_bounds = array<i64: 32, 8>}, {pipeline_mode = #tpu.pipeline_mode<synchronous>, transform_indices = @transform_2, window_bounds = array<i64: 16, 32>}, {pipeline_mode = #tpu.pipeline_mode<synchronous>, transform_indices = @transform_3, window_bounds = array<i64: 1, 32>}, {pipeline_mode = #tpu.pipeline_mode<synchronous>, transform_indices = @transform_4, window_bounds = array<i64: 32, 8>}, {pipeline_mode = #tpu.pipeline_mode<synchronous>, transform_indices = @transform_5, window_bounds = array<i64: 1, 8>}, {pipeline_mode = #tpu.pipeline_mode<synchronous>, transform_indices = @transform_6, window_bounds = array<i64: 24, 32>}, {pipeline_mode = #tpu.pipeline_mode<synchronous>, transform_indices = @transform_7, window_bounds = array<i64: 1, 32>}, {pipeline_mode = #tpu.pipeline_mode<synchronous>, transform_indices = @transform_8, window_bounds = array<i64: 32, 8>}, {pipeline_mode = #tpu.pipeline_mode<synchronous>, transform_indices = @transform_9, window_bounds = array<i64: 1, 8>}, {pipeline_mode = #tpu.pipeline_mode<synchronous>, transform_indices = @transform_10, window_bounds = array<i64: 16, 32>}, {pipeline_mode = #tpu.pipeline_mode<synchronous>, transform_indices = @transform_11, window_bounds = array<i64: 1, 32>}, {pipeline_mode = #tpu.pipeline_mode<synchronous>, transform_indices = @transform_12, window_bounds = array<i64: 32, 8>}, {pipeline_mode = #tpu.pipeline_mode<synchronous>, transform_indices = @transform_13, window_bounds = array<i64: 1, 8>}, {transform_indices = @transform_14, window_bounds = array<i64: 32, 8>}, {transform_indices = @transform_15, window_bounds = array<i64: 32, 8>}]} {
    %c0 = arith.constant 0 : index
    %c0_0 = arith.constant 0 : index
    %0 = vector.load %arg1[%c0, %c0_0] : memref<32x8xf32, #tpu.memory_space<vmem>>, vector<32x8xf32>
    %c0_1 = arith.constant 0 : index
    %c0_2 = arith.constant 0 : index
    %1 = vector.load %arg2[%c0_1, %c0_2] : memref<32x8xf32, #tpu.memory_space<vmem>>, vector<32x8xf32>
    %c0_3 = arith.constant 0 : index
    %c0_4 = arith.constant 0 : index
    %2 = vector.load %arg7[%c0_3, %c0_4] : memref<24x32xf32, #tpu.memory_space<vmem>>, vector<24x32xf32>
    %c0_5 = arith.constant 0 : index
    %c0_6 = arith.constant 0 : index
    %3 = vector.load %arg8[%c0_5, %c0_6] : memref<1x32xf32, #tpu.memory_space<vmem>>, vector<1x32xf32>
    %c0_7 = arith.constant 0 : index
    %c0_8 = arith.constant 0 : index
    %4 = vector.load %arg9[%c0_7, %c0_8] : memref<32x8xf32, #tpu.memory_space<vmem>>, vector<32x8xf32>
    %c0_9 = arith.constant 0 : index
    %c0_10 = arith.constant 0 : index
    %5 = vector.load %arg10[%c0_9, %c0_10] : memref<1x8xf32, #tpu.memory_space<vmem>>, vector<1x8xf32>
    %c0_11 = arith.constant 0 : index
    %c0_12 = arith.constant 0 : index
    %6 = vector.load %arg11[%c0_11, %c0_12] : memref<16x32xf32, #tpu.memory_space<vmem>>, vector<16x32xf32>
    %c0_13 = arith.constant 0 : index
    %c0_14 = arith.constant 0 : index
    %7 = vector.load %arg12[%c0_13, %c0_14] : memref<1x32xf32, #tpu.memory_space<vmem>>, vector<1x32xf32>
    %c0_15 = arith.constant 0 : index
    %c0_16 = arith.constant 0 : index
    %8 = vector.load %arg13[%c0_15, %c0_16] : memref<32x8xf32, #tpu.memory_space<vmem>>, vector<32x8xf32>
    %c0_17 = arith.constant 0 : index
    %c0_18 = arith.constant 0 : index
    %9 = vector.load %arg14[%c0_17, %c0_18] : memref<1x8xf32, #tpu.memory_space<vmem>>, vector<1x8xf32>
    %10 = vector.extract_strided_slice %2 {offsets = [0, 0], sizes = [8, 32], strides = [1, 1]} : vector<24x32xf32> to vector<8x32xf32>
    %11 = arith.truncf %0 : vector<32x8xf32> to vector<32x8xbf16>
    %12 = arith.truncf %10 : vector<8x32xf32> to vector<8x32xbf16>
    %cst = arith.constant dense<0.000000e+00> : vector<32x32xf32>
    %13 = tpu.matmul %11, %12, %cst {dimension_numbers = #tpu.dot_dimension_numbers<[1], [0], [0], [1], [0, 0, 1, 1], [], []>} : vector<32x8xbf16>, vector<8x32xbf16>, vector<32x32xf32> -> vector<32x32xf32>
    %c0_19 = arith.constant 0 : index
    %c0_20 = arith.constant 0 : index
    %14 = vector.load %arg3[%c0_19, %c0_20] : memref<16x32xf32, #tpu.memory_space<vmem>>, vector<16x32xf32>
    %c0_21 = arith.constant 0 : index
    %c0_22 = arith.constant 0 : index
    %15 = vector.load %arg4[%c0_21, %c0_22] : memref<1x32xf32, #tpu.memory_space<vmem>>, vector<1x32xf32>
    %c0_23 = arith.constant 0 : index
    %c0_24 = arith.constant 0 : index
    %16 = vector.load %arg5[%c0_23, %c0_24] : memref<32x8xf32, #tpu.memory_space<vmem>>, vector<32x8xf32>
    %c0_25 = arith.constant 0 : index
    %c0_26 = arith.constant 0 : index
    %17 = vector.load %arg6[%c0_25, %c0_26] : memref<1x8xf32, #tpu.memory_space<vmem>>, vector<1x8xf32>
    %18 = vector.extract_strided_slice %14 {offsets = [8, 0], sizes = [8, 32], strides = [1, 1]} : vector<16x32xf32> to vector<8x32xf32>
    %19 = arith.truncf %0 : vector<32x8xf32> to vector<32x8xbf16>
    %20 = arith.truncf %18 : vector<8x32xf32> to vector<8x32xbf16>
    %cst_27 = arith.constant dense<0.000000e+00> : vector<32x32xf32>
    %21 = tpu.matmul %19, %20, %cst_27 {dimension_numbers = #tpu.dot_dimension_numbers<[1], [0], [0], [1], [0, 0, 1, 1], [], []>} : vector<32x8xbf16>, vector<8x32xbf16>, vector<32x32xf32> -> vector<32x32xf32>
    %cst_28 = arith.constant 0.000000e+00 : f32
    %22 = vector.broadcast %cst_28 : f32 to vector<32x8xf32>
    %23 = vector.extract_strided_slice %14 {offsets = [0, 0], sizes = [8, 32], strides = [1, 1]} : vector<16x32xf32> to vector<8x32xf32>
    %24 = arith.truncf %1 : vector<32x8xf32> to vector<32x8xbf16>
    %25 = arith.truncf %23 : vector<8x32xf32> to vector<8x32xbf16>
    %cst_29 = arith.constant dense<0.000000e+00> : vector<32x32xf32>
    %26 = tpu.matmul %24, %25, %cst_29 {dimension_numbers = #tpu.dot_dimension_numbers<[1], [0], [0], [1], [0, 0, 1, 1], [], []>} : vector<32x8xbf16>, vector<8x32xbf16>, vector<32x32xf32> -> vector<32x32xf32>
    %27 = arith.addf %26, %21 : vector<32x32xf32>
    %28 = vector.broadcast %15 : vector<1x32xf32> to vector<32x32xf32>
    %29 = arith.addf %27, %28 : vector<32x32xf32>
    %cst_30 = arith.constant 0.000000e+00 : f32
    %30 = vector.broadcast %cst_30 : f32 to vector<32x32xf32>
    %31 = arith.maximumf %29, %30 : vector<32x32xf32>
    %32 = arith.truncf %31 : vector<32x32xf32> to vector<32x32xbf16>
    %33 = arith.truncf %16 : vector<32x8xf32> to vector<32x8xbf16>
    %cst_31 = arith.constant dense<0.000000e+00> : vector<32x8xf32>
    %34 = tpu.matmul %32, %33, %cst_31 {dimension_numbers = #tpu.dot_dimension_numbers<[1], [0], [0], [1], [0, 0, 1, 1], [], []>} : vector<32x32xbf16>, vector<32x8xbf16>, vector<32x8xf32> -> vector<32x8xf32>
    %35 = vector.broadcast %17 : vector<1x8xf32> to vector<32x8xf32>
    %36 = arith.addf %34, %35 : vector<32x8xf32>
    %cst_32 = arith.constant 0.000000e+00 : f32
    %37 = vector.broadcast %cst_32 : f32 to vector<32x8xf32>
    %38 = arith.maximumf %36, %37 : vector<32x8xf32>
    %39 = vector.extract_strided_slice %2 {offsets = [8, 0], sizes = [8, 32], strides = [1, 1]} : vector<24x32xf32> to vector<8x32xf32>
    %40 = arith.truncf %1 : vector<32x8xf32> to vector<32x8xbf16>
    %41 = arith.truncf %39 : vector<8x32xf32> to vector<8x32xbf16>
    %cst_33 = arith.constant dense<0.000000e+00> : vector<32x32xf32>
    %42 = tpu.matmul %40, %41, %cst_33 {dimension_numbers = #tpu.dot_dimension_numbers<[1], [0], [0], [1], [0, 0, 1, 1], [], []>} : vector<32x8xbf16>, vector<8x32xbf16>, vector<32x32xf32> -> vector<32x32xf32>
    %43 = arith.addf %13, %42 : vector<32x32xf32>
    %44 = vector.extract_strided_slice %2 {offsets = [16, 0], sizes = [8, 32], strides = [1, 1]} : vector<24x32xf32> to vector<8x32xf32>
    %45 = arith.truncf %38 : vector<32x8xf32> to vector<32x8xbf16>
    %46 = arith.truncf %44 : vector<8x32xf32> to vector<8x32xbf16>
    %cst_34 = arith.constant dense<0.000000e+00> : vector<32x32xf32>
    %47 = tpu.matmul %45, %46, %cst_34 {dimension_numbers = #tpu.dot_dimension_numbers<[1], [0], [0], [1], [0, 0, 1, 1], [], []>} : vector<32x8xbf16>, vector<8x32xbf16>, vector<32x32xf32> -> vector<32x32xf32>
    %48 = arith.addf %43, %47 : vector<32x32xf32>
    %49 = vector.broadcast %3 : vector<1x32xf32> to vector<32x32xf32>
    %50 = arith.addf %48, %49 : vector<32x32xf32>
    %cst_35 = arith.constant 0.000000e+00 : f32
    %51 = vector.broadcast %cst_35 : f32 to vector<32x32xf32>
    %52 = arith.maximumf %50, %51 : vector<32x32xf32>
    %53 = arith.truncf %52 : vector<32x32xf32> to vector<32x32xbf16>
    %54 = arith.truncf %4 : vector<32x8xf32> to vector<32x8xbf16>
    %cst_36 = arith.constant dense<0.000000e+00> : vector<32x8xf32>
    %55 = tpu.matmul %53, %54, %cst_36 {dimension_numbers = #tpu.dot_dimension_numbers<[1], [0], [0], [1], [0, 0, 1, 1], [], []>} : vector<32x32xbf16>, vector<32x8xbf16>, vector<32x8xf32> -> vector<32x8xf32>
    %56 = vector.broadcast %5 : vector<1x8xf32> to vector<32x8xf32>
    %57 = arith.addf %55, %56 : vector<32x8xf32>
    %c0_37 = arith.constant 0 : index
    %c0_38 = arith.constant 0 : index
    %58 = vector.load %arg16[%c0_37, %c0_38] : memref<32x8xf32, #tpu.memory_space<vmem>>, vector<32x8xf32>
    tpu.vector_store %arg16[%c0_37, %c0_38], %57 {strides = array<i32>} : memref<32x8xf32, #tpu.memory_space<vmem>>, vector<32x8xf32>,
    %59 = arith.addf %22, %57 : vector<32x8xf32>
    %60 = vector.extract_strided_slice %6 {offsets = [0, 0], sizes = [8, 32], strides = [1, 1]} : vector<16x32xf32> to vector<8x32xf32>
    %61 = arith.truncf %0 : vector<32x8xf32> to vector<32x8xbf16>
    %62 = arith.truncf %60 : vector<8x32xf32> to vector<8x32xbf16>
    %cst_39 = arith.constant dense<0.000000e+00> : vector<32x32xf32>
    %63 = tpu.matmul %61, %62, %cst_39 {dimension_numbers = #tpu.dot_dimension_numbers<[1], [0], [0], [1], [0, 0, 1, 1], [], []>} : vector<32x8xbf16>, vector<8x32xbf16>, vector<32x32xf32> -> vector<32x32xf32>
    %64 = vector.extract_strided_slice %6 {offsets = [8, 0], sizes = [8, 32], strides = [1, 1]} : vector<16x32xf32> to vector<8x32xf32>
    %65 = arith.truncf %59 : vector<32x8xf32> to vector<32x8xbf16>
    %66 = arith.truncf %64 : vector<8x32xf32> to vector<8x32xbf16>
    %cst_40 = arith.constant dense<0.000000e+00> : vector<32x32xf32>
    %67 = tpu.matmul %65, %66, %cst_40 {dimension_numbers = #tpu.dot_dimension_numbers<[1], [0], [0], [1], [0, 0, 1, 1], [], []>} : vector<32x8xbf16>, vector<8x32xbf16>, vector<32x32xf32> -> vector<32x32xf32>
    %68 = arith.addf %63, %67 : vector<32x32xf32>
    %69 = vector.broadcast %7 : vector<1x32xf32> to vector<32x32xf32>
    %70 = arith.addf %68, %69 : vector<32x32xf32>
    %cst_41 = arith.constant 0.000000e+00 : f32
    %71 = vector.broadcast %cst_41 : f32 to vector<32x32xf32>
    %72 = arith.maximumf %70, %71 : vector<32x32xf32>
    %73 = arith.truncf %72 : vector<32x32xf32> to vector<32x32xbf16>
    %74 = arith.truncf %8 : vector<32x8xf32> to vector<32x8xbf16>
    %cst_42 = arith.constant dense<0.000000e+00> : vector<32x8xf32>
    %75 = tpu.matmul %73, %74, %cst_42 {dimension_numbers = #tpu.dot_dimension_numbers<[1], [0], [0], [1], [0, 0, 1, 1], [], []>} : vector<32x32xbf16>, vector<32x8xbf16>, vector<32x8xf32> -> vector<32x8xf32>
    %76 = vector.broadcast %9 : vector<1x8xf32> to vector<32x8xf32>
    %77 = arith.addf %75, %76 : vector<32x8xf32>
    %cst_43 = arith.constant 5.000000e-01 : f32
    %78 = vector.broadcast %cst_43 : f32 to vector<32x8xf32>
    %79 = arith.mulf %78, %0 : vector<32x8xf32>
    %cst_44 = arith.constant 5.000000e-01 : f32
    %80 = vector.broadcast %cst_44 : f32 to vector<32x8xf32>
    %81 = arith.mulf %80, %77 : vector<32x8xf32>
    %82 = arith.addf %79, %81 : vector<32x8xf32>
    %c0_45 = arith.constant 0 : index
    %c0_46 = arith.constant 0 : index
    %83 = vector.load %arg15[%c0_45, %c0_46] : memref<32x8xf32, #tpu.memory_space<vmem>>, vector<32x8xf32>
    tpu.vector_store %arg15[%c0_45, %c0_46], %82 {strides = array<i32>} : memref<32x8xf32, #tpu.memory_space<vmem>>, vector<32x8xf32>,
    return
  }
  func.func @transform_0(%arg0: i32) -> (i32, i32) {
    %c0_i32 = arith.constant 0 : i32
    %c0_i32_0 = arith.constant 0 : i32
    return %arg0, %c0_i32 : i32, i32
  }
  func.func @transform_1(%arg0: i32) -> (i32, i32) {
    %c0_i32 = arith.constant 0 : i32
    %c0_i32_0 = arith.constant 0 : i32
    return %arg0, %c0_i32 : i32, i32
  }
  func.func @transform_2(%arg0: i32) -> (i32, i32) {
    %c0_i32 = arith.constant 0 : i32
    %c0_i32_0 = arith.constant 0 : i32
    %c0_i32_1 = arith.constant 0 : i32
    return %c0_i32, %c0_i32_0 : i32, i32
  }
  func.func @transform_3(%arg0: i32) -> (i32, i32) {
    %c0_i32 = arith.constant 0 : i32
    %c0_i32_0 = arith.constant 0 : i32
    %c0_i32_1 = arith.constant 0 : i32
    return %c0_i32, %c0_i32_0 : i32, i32
  }
  func.func @transform_4(%arg0: i32) -> (i32, i32) {
    %c0_i32 = arith.constant 0 : i32
    %c0_i32_0 = arith.constant 0 : i32
    %c0_i32_1 = arith.constant 0 : i32
    return %c0_i32, %c0_i32_0 : i32, i32
  }
  func.func @transform_5(%arg0: i32) -> (i32, i32) {
    %c0_i32 = arith.constant 0 : i32
    %c0_i32_0 = arith.constant 0 : i32
    %c0_i32_1 = arith.constant 0 : i32
    return %c0_i32, %c0_i32_0 : i32, i32
  }
  func.func @transform_6(%arg0: i32) -> (i32, i32) {
    %c0_i32 = arith.constant 0 : i32
    %c0_i32_0 = arith.constant 0 : i32
    %c0_i32_1 = arith.constant 0 : i32
    return %c0_i32, %c0_i32_0 : i32, i32
  }
  func.func @transform_7(%arg0: i32) -> (i32, i32) {
    %c0_i32 = arith.constant 0 : i32
    %c0_i32_0 = arith.constant 0 : i32
    %c0_i32_1 = arith.constant 0 : i32
    return %c0_i32, %c0_i32_0 : i32, i32
  }
  func.func @transform_8(%arg0: i32) -> (i32, i32) {
    %c0_i32 = arith.constant 0 : i32
    %c0_i32_0 = arith.constant 0 : i32
    %c0_i32_1 = arith.constant 0 : i32
    return %c0_i32, %c0_i32_0 : i32, i32
  }
  func.func @transform_9(%arg0: i32) -> (i32, i32) {
    %c0_i32 = arith.constant 0 : i32
    %c0_i32_0 = arith.constant 0 : i32
    %c0_i32_1 = arith.constant 0 : i32
    return %c0_i32, %c0_i32_0 : i32, i32
  }
  func.func @transform_10(%arg0: i32) -> (i32, i32) {
    %c0_i32 = arith.constant 0 : i32
    %c0_i32_0 = arith.constant 0 : i32
    %c0_i32_1 = arith.constant 0 : i32
    return %c0_i32, %c0_i32_0 : i32, i32
  }
  func.func @transform_11(%arg0: i32) -> (i32, i32) {
    %c0_i32 = arith.constant 0 : i32
    %c0_i32_0 = arith.constant 0 : i32
    %c0_i32_1 = arith.constant 0 : i32
    return %c0_i32, %c0_i32_0 : i32, i32
  }
  func.func @transform_12(%arg0: i32) -> (i32, i32) {
    %c0_i32 = arith.constant 0 : i32
    %c0_i32_0 = arith.constant 0 : i32
    %c0_i32_1 = arith.constant 0 : i32
    return %c0_i32, %c0_i32_0 : i32, i32
  }
  func.func @transform_13(%arg0: i32) -> (i32, i32) {
    %c0_i32 = arith.constant 0 : i32
    %c0_i32_0 = arith.constant 0 : i32
    %c0_i32_1 = arith.constant 0 : i32
    return %c0_i32, %c0_i32_0 : i32, i32
  }
  func.func @transform_14(%arg0: i32) -> (i32, i32) {
    %c0_i32 = arith.constant 0 : i32
    %c0_i32_0 = arith.constant 0 : i32
    return %arg0, %c0_i32 : i32, i32
  }
  func.func @transform_15(%arg0: i32) -> (i32, i32) {
    %c0_i32 = arith.constant 0 : i32
    %c0_i32_0 = arith.constant 0 : i32
    return %arg0, %c0_i32 : i32, i32
  }
}

module attributes {stable_mosaic.version = 11 : i64} {
  func.func @_in_layer_kernel(%arg0: i32, %arg1: memref<32x8xf32, #tpu.memory_space<vmem>>, %arg2: memref<32x8xf32, #tpu.memory_space<vmem>>, %arg3: memref<32x8xf32, #tpu.memory_space<vmem>>, %arg4: memref<24x32xf32, #tpu.memory_space<vmem>>, %arg5: memref<1x32xf32, #tpu.memory_space<vmem>>, %arg6: memref<32x8xf32, #tpu.memory_space<vmem>>, %arg7: memref<1x8xf32, #tpu.memory_space<vmem>>, %arg8: memref<16x32xf32, #tpu.memory_space<vmem>>, %arg9: memref<1x32xf32, #tpu.memory_space<vmem>>, %arg10: memref<32x8xf32, #tpu.memory_space<vmem>>, %arg11: memref<1x8xf32, #tpu.memory_space<vmem>>, %arg12: memref<32x8xf32, #tpu.memory_space<vmem>>, %arg13: memref<32x8xf32, #tpu.memory_space<vmem>>) attributes {dimension_semantics = [#tpu.dimension_semantics<parallel>], iteration_bounds = array<i64: 2>, scalar_prefetch = 0 : i64, scratch_operands = 0 : i64, tpu.core_type = #tpu.core_type<tc>, window_params = [{transform_indices = @transform_0, window_bounds = array<i64: 32, 8>}, {transform_indices = @transform_1, window_bounds = array<i64: 32, 8>}, {transform_indices = @transform_2, window_bounds = array<i64: 32, 8>}, {pipeline_mode = #tpu.pipeline_mode<synchronous>, transform_indices = @transform_3, window_bounds = array<i64: 24, 32>}, {pipeline_mode = #tpu.pipeline_mode<synchronous>, transform_indices = @transform_4, window_bounds = array<i64: 1, 32>}, {pipeline_mode = #tpu.pipeline_mode<synchronous>, transform_indices = @transform_5, window_bounds = array<i64: 32, 8>}, {pipeline_mode = #tpu.pipeline_mode<synchronous>, transform_indices = @transform_6, window_bounds = array<i64: 1, 8>}, {pipeline_mode = #tpu.pipeline_mode<synchronous>, transform_indices = @transform_7, window_bounds = array<i64: 16, 32>}, {pipeline_mode = #tpu.pipeline_mode<synchronous>, transform_indices = @transform_8, window_bounds = array<i64: 1, 32>}, {pipeline_mode = #tpu.pipeline_mode<synchronous>, transform_indices = @transform_9, window_bounds = array<i64: 32, 8>}, {pipeline_mode = #tpu.pipeline_mode<synchronous>, transform_indices = @transform_10, window_bounds = array<i64: 1, 8>}, {transform_indices = @transform_11, window_bounds = array<i64: 32, 8>}, {transform_indices = @transform_12, window_bounds = array<i64: 32, 8>}]} {
    %c0 = arith.constant 0 : index
    %c0_0 = arith.constant 0 : index
    %0 = vector.load %arg1[%c0, %c0_0] : memref<32x8xf32, #tpu.memory_space<vmem>>, vector<32x8xf32>
    %c0_1 = arith.constant 0 : index
    %c0_2 = arith.constant 0 : index
    %1 = vector.load %arg2[%c0_1, %c0_2] : memref<32x8xf32, #tpu.memory_space<vmem>>, vector<32x8xf32>
    %c0_3 = arith.constant 0 : index
    %c0_4 = arith.constant 0 : index
    %2 = vector.load %arg4[%c0_3, %c0_4] : memref<24x32xf32, #tpu.memory_space<vmem>>, vector<24x32xf32>
    %c0_5 = arith.constant 0 : index
    %c0_6 = arith.constant 0 : index
    %3 = vector.load %arg5[%c0_5, %c0_6] : memref<1x32xf32, #tpu.memory_space<vmem>>, vector<1x32xf32>
    %c0_7 = arith.constant 0 : index
    %c0_8 = arith.constant 0 : index
    %4 = vector.load %arg6[%c0_7, %c0_8] : memref<32x8xf32, #tpu.memory_space<vmem>>, vector<32x8xf32>
    %c0_9 = arith.constant 0 : index
    %c0_10 = arith.constant 0 : index
    %5 = vector.load %arg7[%c0_9, %c0_10] : memref<1x8xf32, #tpu.memory_space<vmem>>, vector<1x8xf32>
    %c0_11 = arith.constant 0 : index
    %c0_12 = arith.constant 0 : index
    %6 = vector.load %arg8[%c0_11, %c0_12] : memref<16x32xf32, #tpu.memory_space<vmem>>, vector<16x32xf32>
    %c0_13 = arith.constant 0 : index
    %c0_14 = arith.constant 0 : index
    %7 = vector.load %arg9[%c0_13, %c0_14] : memref<1x32xf32, #tpu.memory_space<vmem>>, vector<1x32xf32>
    %c0_15 = arith.constant 0 : index
    %c0_16 = arith.constant 0 : index
    %8 = vector.load %arg10[%c0_15, %c0_16] : memref<32x8xf32, #tpu.memory_space<vmem>>, vector<32x8xf32>
    %c0_17 = arith.constant 0 : index
    %c0_18 = arith.constant 0 : index
    %9 = vector.load %arg11[%c0_17, %c0_18] : memref<1x8xf32, #tpu.memory_space<vmem>>, vector<1x8xf32>
    %10 = vector.extract_strided_slice %2 {offsets = [0, 0], sizes = [8, 32], strides = [1, 1]} : vector<24x32xf32> to vector<8x32xf32>
    %11 = arith.truncf %0 : vector<32x8xf32> to vector<32x8xbf16>
    %12 = arith.truncf %10 : vector<8x32xf32> to vector<8x32xbf16>
    %cst = arith.constant dense<0.000000e+00> : vector<32x32xf32>
    %13 = tpu.matmul %11, %12, %cst {dimension_numbers = #tpu.dot_dimension_numbers<[1], [0], [0], [1], [0, 0, 1, 1], [], []>} : vector<32x8xbf16>, vector<8x32xbf16>, vector<32x32xf32> -> vector<32x32xf32>
    %cst_19 = arith.constant 0.000000e+00 : f32
    %14 = vector.broadcast %cst_19 : f32 to vector<32x8xf32>
    %c0_20 = arith.constant 0 : index
    %c0_21 = arith.constant 0 : index
    %15 = vector.load %arg3[%c0_20, %c0_21] : memref<32x8xf32, #tpu.memory_space<vmem>>, vector<32x8xf32>
    %16 = vector.extract_strided_slice %2 {offsets = [8, 0], sizes = [8, 32], strides = [1, 1]} : vector<24x32xf32> to vector<8x32xf32>
    %17 = arith.truncf %1 : vector<32x8xf32> to vector<32x8xbf16>
    %18 = arith.truncf %16 : vector<8x32xf32> to vector<8x32xbf16>
    %cst_22 = arith.constant dense<0.000000e+00> : vector<32x32xf32>
    %19 = tpu.matmul %17, %18, %cst_22 {dimension_numbers = #tpu.dot_dimension_numbers<[1], [0], [0], [1], [0, 0, 1, 1], [], []>} : vector<32x8xbf16>, vector<8x32xbf16>, vector<32x32xf32> -> vector<32x32xf32>
    %20 = arith.addf %13, %19 : vector<32x32xf32>
    %21 = vector.extract_strided_slice %2 {offsets = [16, 0], sizes = [8, 32], strides = [1, 1]} : vector<24x32xf32> to vector<8x32xf32>
    %22 = arith.truncf %15 : vector<32x8xf32> to vector<32x8xbf16>
    %23 = arith.truncf %21 : vector<8x32xf32> to vector<8x32xbf16>
    %cst_23 = arith.constant dense<0.000000e+00> : vector<32x32xf32>
    %24 = tpu.matmul %22, %23, %cst_23 {dimension_numbers = #tpu.dot_dimension_numbers<[1], [0], [0], [1], [0, 0, 1, 1], [], []>} : vector<32x8xbf16>, vector<8x32xbf16>, vector<32x32xf32> -> vector<32x32xf32>
    %25 = arith.addf %20, %24 : vector<32x32xf32>
    %26 = vector.broadcast %3 : vector<1x32xf32> to vector<32x32xf32>
    %27 = arith.addf %25, %26 : vector<32x32xf32>
    %cst_24 = arith.constant 0.000000e+00 : f32
    %28 = vector.broadcast %cst_24 : f32 to vector<32x32xf32>
    %29 = arith.maximumf %27, %28 : vector<32x32xf32>
    %30 = arith.truncf %29 : vector<32x32xf32> to vector<32x32xbf16>
    %31 = arith.truncf %4 : vector<32x8xf32> to vector<32x8xbf16>
    %cst_25 = arith.constant dense<0.000000e+00> : vector<32x8xf32>
    %32 = tpu.matmul %30, %31, %cst_25 {dimension_numbers = #tpu.dot_dimension_numbers<[1], [0], [0], [1], [0, 0, 1, 1], [], []>} : vector<32x32xbf16>, vector<32x8xbf16>, vector<32x8xf32> -> vector<32x8xf32>
    %33 = vector.broadcast %5 : vector<1x8xf32> to vector<32x8xf32>
    %34 = arith.addf %32, %33 : vector<32x8xf32>
    %c0_26 = arith.constant 0 : index
    %c0_27 = arith.constant 0 : index
    %35 = vector.load %arg13[%c0_26, %c0_27] : memref<32x8xf32, #tpu.memory_space<vmem>>, vector<32x8xf32>
    tpu.vector_store %arg13[%c0_26, %c0_27], %34 {strides = array<i32>} : memref<32x8xf32, #tpu.memory_space<vmem>>, vector<32x8xf32>,
    %36 = arith.addf %14, %34 : vector<32x8xf32>
    %37 = vector.extract_strided_slice %6 {offsets = [0, 0], sizes = [8, 32], strides = [1, 1]} : vector<16x32xf32> to vector<8x32xf32>
    %38 = arith.truncf %0 : vector<32x8xf32> to vector<32x8xbf16>
    %39 = arith.truncf %37 : vector<8x32xf32> to vector<8x32xbf16>
    %cst_28 = arith.constant dense<0.000000e+00> : vector<32x32xf32>
    %40 = tpu.matmul %38, %39, %cst_28 {dimension_numbers = #tpu.dot_dimension_numbers<[1], [0], [0], [1], [0, 0, 1, 1], [], []>} : vector<32x8xbf16>, vector<8x32xbf16>, vector<32x32xf32> -> vector<32x32xf32>
    %41 = vector.extract_strided_slice %6 {offsets = [8, 0], sizes = [8, 32], strides = [1, 1]} : vector<16x32xf32> to vector<8x32xf32>
    %42 = arith.truncf %36 : vector<32x8xf32> to vector<32x8xbf16>
    %43 = arith.truncf %41 : vector<8x32xf32> to vector<8x32xbf16>
    %cst_29 = arith.constant dense<0.000000e+00> : vector<32x32xf32>
    %44 = tpu.matmul %42, %43, %cst_29 {dimension_numbers = #tpu.dot_dimension_numbers<[1], [0], [0], [1], [0, 0, 1, 1], [], []>} : vector<32x8xbf16>, vector<8x32xbf16>, vector<32x32xf32> -> vector<32x32xf32>
    %45 = arith.addf %40, %44 : vector<32x32xf32>
    %46 = vector.broadcast %7 : vector<1x32xf32> to vector<32x32xf32>
    %47 = arith.addf %45, %46 : vector<32x32xf32>
    %cst_30 = arith.constant 0.000000e+00 : f32
    %48 = vector.broadcast %cst_30 : f32 to vector<32x32xf32>
    %49 = arith.maximumf %47, %48 : vector<32x32xf32>
    %50 = arith.truncf %49 : vector<32x32xf32> to vector<32x32xbf16>
    %51 = arith.truncf %8 : vector<32x8xf32> to vector<32x8xbf16>
    %cst_31 = arith.constant dense<0.000000e+00> : vector<32x8xf32>
    %52 = tpu.matmul %50, %51, %cst_31 {dimension_numbers = #tpu.dot_dimension_numbers<[1], [0], [0], [1], [0, 0, 1, 1], [], []>} : vector<32x32xbf16>, vector<32x8xbf16>, vector<32x8xf32> -> vector<32x8xf32>
    %53 = vector.broadcast %9 : vector<1x8xf32> to vector<32x8xf32>
    %54 = arith.addf %52, %53 : vector<32x8xf32>
    %cst_32 = arith.constant 5.000000e-01 : f32
    %55 = vector.broadcast %cst_32 : f32 to vector<32x8xf32>
    %56 = arith.mulf %55, %0 : vector<32x8xf32>
    %cst_33 = arith.constant 5.000000e-01 : f32
    %57 = vector.broadcast %cst_33 : f32 to vector<32x8xf32>
    %58 = arith.mulf %57, %54 : vector<32x8xf32>
    %59 = arith.addf %56, %58 : vector<32x8xf32>
    %c0_34 = arith.constant 0 : index
    %c0_35 = arith.constant 0 : index
    %60 = vector.load %arg12[%c0_34, %c0_35] : memref<32x8xf32, #tpu.memory_space<vmem>>, vector<32x8xf32>
    tpu.vector_store %arg12[%c0_34, %c0_35], %59 {strides = array<i32>} : memref<32x8xf32, #tpu.memory_space<vmem>>, vector<32x8xf32>,
    return
  }
  func.func @transform_0(%arg0: i32) -> (i32, i32) {
    %c0_i32 = arith.constant 0 : i32
    %c0_i32_0 = arith.constant 0 : i32
    return %arg0, %c0_i32 : i32, i32
  }
  func.func @transform_1(%arg0: i32) -> (i32, i32) {
    %c0_i32 = arith.constant 0 : i32
    %c0_i32_0 = arith.constant 0 : i32
    return %arg0, %c0_i32 : i32, i32
  }
  func.func @transform_2(%arg0: i32) -> (i32, i32) {
    %c0_i32 = arith.constant 0 : i32
    %c0_i32_0 = arith.constant 0 : i32
    return %arg0, %c0_i32 : i32, i32
  }
  func.func @transform_3(%arg0: i32) -> (i32, i32) {
    %c0_i32 = arith.constant 0 : i32
    %c0_i32_0 = arith.constant 0 : i32
    %c0_i32_1 = arith.constant 0 : i32
    return %c0_i32, %c0_i32_0 : i32, i32
  }
  func.func @transform_4(%arg0: i32) -> (i32, i32) {
    %c0_i32 = arith.constant 0 : i32
    %c0_i32_0 = arith.constant 0 : i32
    %c0_i32_1 = arith.constant 0 : i32
    return %c0_i32, %c0_i32_0 : i32, i32
  }
  func.func @transform_5(%arg0: i32) -> (i32, i32) {
    %c0_i32 = arith.constant 0 : i32
    %c0_i32_0 = arith.constant 0 : i32
    %c0_i32_1 = arith.constant 0 : i32
    return %c0_i32, %c0_i32_0 : i32, i32
  }
  func.func @transform_6(%arg0: i32) -> (i32, i32) {
    %c0_i32 = arith.constant 0 : i32
    %c0_i32_0 = arith.constant 0 : i32
    %c0_i32_1 = arith.constant 0 : i32
    return %c0_i32, %c0_i32_0 : i32, i32
  }
  func.func @transform_7(%arg0: i32) -> (i32, i32) {
    %c0_i32 = arith.constant 0 : i32
    %c0_i32_0 = arith.constant 0 : i32
    %c0_i32_1 = arith.constant 0 : i32
    return %c0_i32, %c0_i32_0 : i32, i32
  }
  func.func @transform_8(%arg0: i32) -> (i32, i32) {
    %c0_i32 = arith.constant 0 : i32
    %c0_i32_0 = arith.constant 0 : i32
    %c0_i32_1 = arith.constant 0 : i32
    return %c0_i32, %c0_i32_0 : i32, i32
  }
  func.func @transform_9(%arg0: i32) -> (i32, i32) {
    %c0_i32 = arith.constant 0 : i32
    %c0_i32_0 = arith.constant 0 : i32
    %c0_i32_1 = arith.constant 0 : i32
    return %c0_i32, %c0_i32_0 : i32, i32
  }
  func.func @transform_10(%arg0: i32) -> (i32, i32) {
    %c0_i32 = arith.constant 0 : i32
    %c0_i32_0 = arith.constant 0 : i32
    %c0_i32_1 = arith.constant 0 : i32
    return %c0_i32, %c0_i32_0 : i32, i32
  }
  func.func @transform_11(%arg0: i32) -> (i32, i32) {
    %c0_i32 = arith.constant 0 : i32
    %c0_i32_0 = arith.constant 0 : i32
    return %arg0, %c0_i32 : i32, i32
  }
  func.func @transform_12(%arg0: i32) -> (i32, i32) {
    %c0_i32 = arith.constant 0 : i32
    %c0_i32_0 = arith.constant 0 : i32
    return %arg0, %c0_i32 : i32, i32
  }
}

module attributes {stable_mosaic.version = 11 : i64} {
  func.func @_heads_kernel(%arg0: i32, %arg1: memref<32x8xf32, #tpu.memory_space<vmem>>, %arg2: memref<8x32xf32, #tpu.memory_space<vmem>>, %arg3: memref<1x32xf32, #tpu.memory_space<vmem>>, %arg4: memref<32x32xf32, #tpu.memory_space<vmem>>, %arg5: memref<1x32xf32, #tpu.memory_space<vmem>>, %arg6: memref<32x32xf32, #tpu.memory_space<vmem>>, %arg7: memref<1x32xf32, #tpu.memory_space<vmem>>, %arg8: memref<32x1xf32, #tpu.memory_space<vmem>>, %arg9: memref<1x1xf32, #tpu.memory_space<vmem>>, %arg10: memref<8x32xf32, #tpu.memory_space<vmem>>, %arg11: memref<1x32xf32, #tpu.memory_space<vmem>>, %arg12: memref<32x32xf32, #tpu.memory_space<vmem>>, %arg13: memref<1x32xf32, #tpu.memory_space<vmem>>, %arg14: memref<32x32xf32, #tpu.memory_space<vmem>>, %arg15: memref<1x32xf32, #tpu.memory_space<vmem>>, %arg16: memref<32x4xf32, #tpu.memory_space<vmem>>, %arg17: memref<1x4xf32, #tpu.memory_space<vmem>>, %arg18: memref<32x128xf32, #tpu.memory_space<vmem>>) attributes {dimension_semantics = [#tpu.dimension_semantics<parallel>], iteration_bounds = array<i64: 2>, scalar_prefetch = 0 : i64, scratch_operands = 0 : i64, tpu.core_type = #tpu.core_type<tc>, window_params = [{transform_indices = @transform_0, window_bounds = array<i64: 32, 8>}, {pipeline_mode = #tpu.pipeline_mode<synchronous>, transform_indices = @transform_1, window_bounds = array<i64: 8, 32>}, {pipeline_mode = #tpu.pipeline_mode<synchronous>, transform_indices = @transform_2, window_bounds = array<i64: 1, 32>}, {pipeline_mode = #tpu.pipeline_mode<synchronous>, transform_indices = @transform_3, window_bounds = array<i64: 32, 32>}, {pipeline_mode = #tpu.pipeline_mode<synchronous>, transform_indices = @transform_4, window_bounds = array<i64: 1, 32>}, {pipeline_mode = #tpu.pipeline_mode<synchronous>, transform_indices = @transform_5, window_bounds = array<i64: 32, 32>}, {pipeline_mode = #tpu.pipeline_mode<synchronous>, transform_indices = @transform_6, window_bounds = array<i64: 1, 32>}, {pipeline_mode = #tpu.pipeline_mode<synchronous>, transform_indices = @transform_7, window_bounds = array<i64: 32, 1>}, {pipeline_mode = #tpu.pipeline_mode<synchronous>, transform_indices = @transform_8, window_bounds = array<i64: 1, 1>}, {pipeline_mode = #tpu.pipeline_mode<synchronous>, transform_indices = @transform_9, window_bounds = array<i64: 8, 32>}, {pipeline_mode = #tpu.pipeline_mode<synchronous>, transform_indices = @transform_10, window_bounds = array<i64: 1, 32>}, {pipeline_mode = #tpu.pipeline_mode<synchronous>, transform_indices = @transform_11, window_bounds = array<i64: 32, 32>}, {pipeline_mode = #tpu.pipeline_mode<synchronous>, transform_indices = @transform_12, window_bounds = array<i64: 1, 32>}, {pipeline_mode = #tpu.pipeline_mode<synchronous>, transform_indices = @transform_13, window_bounds = array<i64: 32, 32>}, {pipeline_mode = #tpu.pipeline_mode<synchronous>, transform_indices = @transform_14, window_bounds = array<i64: 1, 32>}, {pipeline_mode = #tpu.pipeline_mode<synchronous>, transform_indices = @transform_15, window_bounds = array<i64: 32, 4>}, {pipeline_mode = #tpu.pipeline_mode<synchronous>, transform_indices = @transform_16, window_bounds = array<i64: 1, 4>}, {transform_indices = @transform_17, window_bounds = array<i64: 32, 128>}]} {
    %c0 = arith.constant 0 : index
    %c0_0 = arith.constant 0 : index
    %0 = vector.load %arg1[%c0, %c0_0] : memref<32x8xf32, #tpu.memory_space<vmem>>, vector<32x8xf32>
    %c0_1 = arith.constant 0 : index
    %c0_2 = arith.constant 0 : index
    %1 = vector.load %arg2[%c0_1, %c0_2] : memref<8x32xf32, #tpu.memory_space<vmem>>, vector<8x32xf32>
    %2 = arith.truncf %0 : vector<32x8xf32> to vector<32x8xbf16>
    %3 = arith.truncf %1 : vector<8x32xf32> to vector<8x32xbf16>
    %cst = arith.constant dense<0.000000e+00> : vector<32x32xf32>
    %4 = tpu.matmul %2, %3, %cst {dimension_numbers = #tpu.dot_dimension_numbers<[1], [0], [0], [1], [0, 0, 1, 1], [], []>} : vector<32x8xbf16>, vector<8x32xbf16>, vector<32x32xf32> -> vector<32x32xf32>
    %c0_3 = arith.constant 0 : index
    %c0_4 = arith.constant 0 : index
    %5 = vector.load %arg3[%c0_3, %c0_4] : memref<1x32xf32, #tpu.memory_space<vmem>>, vector<1x32xf32>
    %6 = vector.broadcast %5 : vector<1x32xf32> to vector<32x32xf32>
    %7 = arith.addf %4, %6 : vector<32x32xf32>
    %cst_5 = arith.constant 0.000000e+00 : f32
    %8 = vector.broadcast %cst_5 : f32 to vector<32x32xf32>
    %9 = arith.maximumf %7, %8 : vector<32x32xf32>
    %c0_6 = arith.constant 0 : index
    %c0_7 = arith.constant 0 : index
    %10 = vector.load %arg4[%c0_6, %c0_7] : memref<32x32xf32, #tpu.memory_space<vmem>>, vector<32x32xf32>
    %11 = arith.truncf %9 : vector<32x32xf32> to vector<32x32xbf16>
    %12 = arith.truncf %10 : vector<32x32xf32> to vector<32x32xbf16>
    %cst_8 = arith.constant dense<0.000000e+00> : vector<32x32xf32>
    %13 = tpu.matmul %11, %12, %cst_8 {dimension_numbers = #tpu.dot_dimension_numbers<[1], [0], [0], [1], [0, 0, 1, 1], [], []>} : vector<32x32xbf16>, vector<32x32xbf16>, vector<32x32xf32> -> vector<32x32xf32>
    %c0_9 = arith.constant 0 : index
    %c0_10 = arith.constant 0 : index
    %14 = vector.load %arg5[%c0_9, %c0_10] : memref<1x32xf32, #tpu.memory_space<vmem>>, vector<1x32xf32>
    %15 = vector.broadcast %14 : vector<1x32xf32> to vector<32x32xf32>
    %16 = arith.addf %13, %15 : vector<32x32xf32>
    %cst_11 = arith.constant 0.000000e+00 : f32
    %17 = vector.broadcast %cst_11 : f32 to vector<32x32xf32>
    %18 = arith.maximumf %16, %17 : vector<32x32xf32>
    %c0_12 = arith.constant 0 : index
    %c0_13 = arith.constant 0 : index
    %19 = vector.load %arg6[%c0_12, %c0_13] : memref<32x32xf32, #tpu.memory_space<vmem>>, vector<32x32xf32>
    %20 = arith.truncf %18 : vector<32x32xf32> to vector<32x32xbf16>
    %21 = arith.truncf %19 : vector<32x32xf32> to vector<32x32xbf16>
    %cst_14 = arith.constant dense<0.000000e+00> : vector<32x32xf32>
    %22 = tpu.matmul %20, %21, %cst_14 {dimension_numbers = #tpu.dot_dimension_numbers<[1], [0], [0], [1], [0, 0, 1, 1], [], []>} : vector<32x32xbf16>, vector<32x32xbf16>, vector<32x32xf32> -> vector<32x32xf32>
    %c0_15 = arith.constant 0 : index
    %c0_16 = arith.constant 0 : index
    %23 = vector.load %arg7[%c0_15, %c0_16] : memref<1x32xf32, #tpu.memory_space<vmem>>, vector<1x32xf32>
    %24 = vector.broadcast %23 : vector<1x32xf32> to vector<32x32xf32>
    %25 = arith.addf %22, %24 : vector<32x32xf32>
    %cst_17 = arith.constant 0.000000e+00 : f32
    %26 = vector.broadcast %cst_17 : f32 to vector<32x32xf32>
    %27 = arith.maximumf %25, %26 : vector<32x32xf32>
    %c0_18 = arith.constant 0 : index
    %c0_19 = arith.constant 0 : index
    %28 = vector.load %arg8[%c0_18, %c0_19] : memref<32x1xf32, #tpu.memory_space<vmem>>, vector<32x1xf32>
    %29 = arith.truncf %27 : vector<32x32xf32> to vector<32x32xbf16>
    %30 = arith.truncf %28 : vector<32x1xf32> to vector<32x1xbf16>
    %cst_20 = arith.constant dense<0.000000e+00> : vector<32x1xf32>
    %31 = tpu.matmul %29, %30, %cst_20 {dimension_numbers = #tpu.dot_dimension_numbers<[1], [0], [0], [1], [0, 0, 1, 1], [], []>} : vector<32x32xbf16>, vector<32x1xbf16>, vector<32x1xf32> -> vector<32x1xf32>
    %c0_21 = arith.constant 0 : index
    %c0_22 = arith.constant 0 : index
    %32 = vector.load %arg9[%c0_21, %c0_22] : memref<1x1xf32, #tpu.memory_space<vmem>>, vector<1x1xf32>
    %33 = vector.broadcast %32 : vector<1x1xf32> to vector<32x1xf32>
    %34 = arith.addf %31, %33 : vector<32x1xf32>
    %35 = arith.negf %34 : vector<32x1xf32>
    %36 = math.exp %35 : vector<32x1xf32>
    %cst_23 = arith.constant 1.000000e+00 : f32
    %37 = vector.broadcast %cst_23 : f32 to vector<32x1xf32>
    %38 = arith.addf %37, %36 : vector<32x1xf32>
    %39 = arith.divf %37, %38 : vector<32x1xf32>
    %c0_24 = arith.constant 0 : index
    %c0_25 = arith.constant 0 : index
    %40 = vector.load %arg10[%c0_24, %c0_25] : memref<8x32xf32, #tpu.memory_space<vmem>>, vector<8x32xf32>
    %41 = arith.truncf %0 : vector<32x8xf32> to vector<32x8xbf16>
    %42 = arith.truncf %40 : vector<8x32xf32> to vector<8x32xbf16>
    %cst_26 = arith.constant dense<0.000000e+00> : vector<32x32xf32>
    %43 = tpu.matmul %41, %42, %cst_26 {dimension_numbers = #tpu.dot_dimension_numbers<[1], [0], [0], [1], [0, 0, 1, 1], [], []>} : vector<32x8xbf16>, vector<8x32xbf16>, vector<32x32xf32> -> vector<32x32xf32>
    %c0_27 = arith.constant 0 : index
    %c0_28 = arith.constant 0 : index
    %44 = vector.load %arg11[%c0_27, %c0_28] : memref<1x32xf32, #tpu.memory_space<vmem>>, vector<1x32xf32>
    %45 = vector.broadcast %44 : vector<1x32xf32> to vector<32x32xf32>
    %46 = arith.addf %43, %45 : vector<32x32xf32>
    %cst_29 = arith.constant 0.000000e+00 : f32
    %47 = vector.broadcast %cst_29 : f32 to vector<32x32xf32>
    %48 = arith.maximumf %46, %47 : vector<32x32xf32>
    %c0_30 = arith.constant 0 : index
    %c0_31 = arith.constant 0 : index
    %49 = vector.load %arg12[%c0_30, %c0_31] : memref<32x32xf32, #tpu.memory_space<vmem>>, vector<32x32xf32>
    %50 = arith.truncf %48 : vector<32x32xf32> to vector<32x32xbf16>
    %51 = arith.truncf %49 : vector<32x32xf32> to vector<32x32xbf16>
    %cst_32 = arith.constant dense<0.000000e+00> : vector<32x32xf32>
    %52 = tpu.matmul %50, %51, %cst_32 {dimension_numbers = #tpu.dot_dimension_numbers<[1], [0], [0], [1], [0, 0, 1, 1], [], []>} : vector<32x32xbf16>, vector<32x32xbf16>, vector<32x32xf32> -> vector<32x32xf32>
    %c0_33 = arith.constant 0 : index
    %c0_34 = arith.constant 0 : index
    %53 = vector.load %arg13[%c0_33, %c0_34] : memref<1x32xf32, #tpu.memory_space<vmem>>, vector<1x32xf32>
    %54 = vector.broadcast %53 : vector<1x32xf32> to vector<32x32xf32>
    %55 = arith.addf %52, %54 : vector<32x32xf32>
    %cst_35 = arith.constant 0.000000e+00 : f32
    %56 = vector.broadcast %cst_35 : f32 to vector<32x32xf32>
    %57 = arith.maximumf %55, %56 : vector<32x32xf32>
    %c0_36 = arith.constant 0 : index
    %c0_37 = arith.constant 0 : index
    %58 = vector.load %arg14[%c0_36, %c0_37] : memref<32x32xf32, #tpu.memory_space<vmem>>, vector<32x32xf32>
    %59 = arith.truncf %57 : vector<32x32xf32> to vector<32x32xbf16>
    %60 = arith.truncf %58 : vector<32x32xf32> to vector<32x32xbf16>
    %cst_38 = arith.constant dense<0.000000e+00> : vector<32x32xf32>
    %61 = tpu.matmul %59, %60, %cst_38 {dimension_numbers = #tpu.dot_dimension_numbers<[1], [0], [0], [1], [0, 0, 1, 1], [], []>} : vector<32x32xbf16>, vector<32x32xbf16>, vector<32x32xf32> -> vector<32x32xf32>
    %c0_39 = arith.constant 0 : index
    %c0_40 = arith.constant 0 : index
    %62 = vector.load %arg15[%c0_39, %c0_40] : memref<1x32xf32, #tpu.memory_space<vmem>>, vector<1x32xf32>
    %63 = vector.broadcast %62 : vector<1x32xf32> to vector<32x32xf32>
    %64 = arith.addf %61, %63 : vector<32x32xf32>
    %cst_41 = arith.constant 0.000000e+00 : f32
    %65 = vector.broadcast %cst_41 : f32 to vector<32x32xf32>
    %66 = arith.maximumf %64, %65 : vector<32x32xf32>
    %c0_42 = arith.constant 0 : index
    %c0_43 = arith.constant 0 : index
    %67 = vector.load %arg16[%c0_42, %c0_43] : memref<32x4xf32, #tpu.memory_space<vmem>>, vector<32x4xf32>
    %68 = arith.truncf %66 : vector<32x32xf32> to vector<32x32xbf16>
    %69 = arith.truncf %67 : vector<32x4xf32> to vector<32x4xbf16>
    %cst_44 = arith.constant dense<0.000000e+00> : vector<32x4xf32>
    %70 = tpu.matmul %68, %69, %cst_44 {dimension_numbers = #tpu.dot_dimension_numbers<[1], [0], [0], [1], [0, 0, 1, 1], [], []>} : vector<32x32xbf16>, vector<32x4xbf16>, vector<32x4xf32> -> vector<32x4xf32>
    %c0_45 = arith.constant 0 : index
    %c0_46 = arith.constant 0 : index
    %71 = vector.load %arg17[%c0_45, %c0_46] : memref<1x4xf32, #tpu.memory_space<vmem>>, vector<1x4xf32>
    %72 = vector.broadcast %71 : vector<1x4xf32> to vector<32x4xf32>
    %73 = arith.addf %70, %72 : vector<32x4xf32>
    %cst_47 = arith.constant 0.000000e+00 : f32
    %74 = vector.broadcast %cst_47 : f32 to vector<32x123xf32>
    %75 = tpu.concatenate %39, %73, %74 in 1 : vector<32x1xf32>, vector<32x4xf32>, vector<32x123xf32> -> vector<32x128xf32>
    %c0_48 = arith.constant 0 : index
    %c0_49 = arith.constant 0 : index
    %76 = vector.load %arg18[%c0_48, %c0_49] : memref<32x128xf32, #tpu.memory_space<vmem>>, vector<32x128xf32>
    tpu.vector_store %arg18[%c0_48, %c0_49], %75 {strides = array<i32>} : memref<32x128xf32, #tpu.memory_space<vmem>>, vector<32x128xf32>,
    return
  }
  func.func @transform_0(%arg0: i32) -> (i32, i32) {
    %c0_i32 = arith.constant 0 : i32
    %c0_i32_0 = arith.constant 0 : i32
    return %arg0, %c0_i32 : i32, i32
  }
  func.func @transform_1(%arg0: i32) -> (i32, i32) {
    %c0_i32 = arith.constant 0 : i32
    %c0_i32_0 = arith.constant 0 : i32
    %c0_i32_1 = arith.constant 0 : i32
    return %c0_i32, %c0_i32_0 : i32, i32
  }
  func.func @transform_2(%arg0: i32) -> (i32, i32) {
    %c0_i32 = arith.constant 0 : i32
    %c0_i32_0 = arith.constant 0 : i32
    %c0_i32_1 = arith.constant 0 : i32
    return %c0_i32, %c0_i32_0 : i32, i32
  }
  func.func @transform_3(%arg0: i32) -> (i32, i32) {
    %c0_i32 = arith.constant 0 : i32
    %c0_i32_0 = arith.constant 0 : i32
    %c0_i32_1 = arith.constant 0 : i32
    return %c0_i32, %c0_i32_0 : i32, i32
  }
  func.func @transform_4(%arg0: i32) -> (i32, i32) {
    %c0_i32 = arith.constant 0 : i32
    %c0_i32_0 = arith.constant 0 : i32
    %c0_i32_1 = arith.constant 0 : i32
    return %c0_i32, %c0_i32_0 : i32, i32
  }
  func.func @transform_5(%arg0: i32) -> (i32, i32) {
    %c0_i32 = arith.constant 0 : i32
    %c0_i32_0 = arith.constant 0 : i32
    %c0_i32_1 = arith.constant 0 : i32
    return %c0_i32, %c0_i32_0 : i32, i32
  }
  func.func @transform_6(%arg0: i32) -> (i32, i32) {
    %c0_i32 = arith.constant 0 : i32
    %c0_i32_0 = arith.constant 0 : i32
    %c0_i32_1 = arith.constant 0 : i32
    return %c0_i32, %c0_i32_0 : i32, i32
  }
  func.func @transform_7(%arg0: i32) -> (i32, i32) {
    %c0_i32 = arith.constant 0 : i32
    %c0_i32_0 = arith.constant 0 : i32
    %c0_i32_1 = arith.constant 0 : i32
    return %c0_i32, %c0_i32_0 : i32, i32
  }
  func.func @transform_8(%arg0: i32) -> (i32, i32) {
    %c0_i32 = arith.constant 0 : i32
    %c0_i32_0 = arith.constant 0 : i32
    %c0_i32_1 = arith.constant 0 : i32
    return %c0_i32, %c0_i32_0 : i32, i32
  }
  func.func @transform_9(%arg0: i32) -> (i32, i32) {
    %c0_i32 = arith.constant 0 : i32
    %c0_i32_0 = arith.constant 0 : i32
    %c0_i32_1 = arith.constant 0 : i32
    return %c0_i32, %c0_i32_0 : i32, i32
  }
  func.func @transform_10(%arg0: i32) -> (i32, i32) {
    %c0_i32 = arith.constant 0 : i32
    %c0_i32_0 = arith.constant 0 : i32
    %c0_i32_1 = arith.constant 0 : i32
    return %c0_i32, %c0_i32_0 : i32, i32
  }
  func.func @transform_11(%arg0: i32) -> (i32, i32) {
    %c0_i32 = arith.constant 0 : i32
    %c0_i32_0 = arith.constant 0 : i32
    %c0_i32_1 = arith.constant 0 : i32
    return %c0_i32, %c0_i32_0 : i32, i32
  }
  func.func @transform_12(%arg0: i32) -> (i32, i32) {
    %c0_i32 = arith.constant 0 : i32
    %c0_i32_0 = arith.constant 0 : i32
    %c0_i32_1 = arith.constant 0 : i32
    return %c0_i32, %c0_i32_0 : i32, i32
  }
  func.func @transform_13(%arg0: i32) -> (i32, i32) {
    %c0_i32 = arith.constant 0 : i32
    %c0_i32_0 = arith.constant 0 : i32
    %c0_i32_1 = arith.constant 0 : i32
    return %c0_i32, %c0_i32_0 : i32, i32
  }
  func.func @transform_14(%arg0: i32) -> (i32, i32) {
    %c0_i32 = arith.constant 0 : i32
    %c0_i32_0 = arith.constant 0 : i32
    %c0_i32_1 = arith.constant 0 : i32
    return %c0_i32, %c0_i32_0 : i32, i32
  }
  func.func @transform_15(%arg0: i32) -> (i32, i32) {
    %c0_i32 = arith.constant 0 : i32
    %c0_i32_0 = arith.constant 0 : i32
    %c0_i32_1 = arith.constant 0 : i32
    return %c0_i32, %c0_i32_0 : i32, i32
  }
  func.func @transform_16(%arg0: i32) -> (i32, i32) {
    %c0_i32 = arith.constant 0 : i32
    %c0_i32_0 = arith.constant 0 : i32
    %c0_i32_1 = arith.constant 0 : i32
    return %c0_i32, %c0_i32_0 : i32, i32
  }
  func.func @transform_17(%arg0: i32) -> (i32, i32) {
    %c0_i32 = arith.constant 0 : i32
    %c0_i32_0 = arith.constant 0 : i32
    return %arg0, %c0_i32 : i32, i32
  }
}

</mosaic_0001>

<bundles_post_ra>
// kernel: _lambda_.13
= control target key start
LH: loop header
LB: loop body
LE: loop exit
PB: predicated region body
PF: predicated region fallthrough
CT: control target
= control target key end

     0   :  { %s530_s12 = smov 0   ;;  %s627_s0 = inlined_call_operand.vmem [shape: f32[64,3], index: 0, kind: input, shape index: {}, may-alias: {0,1}]   ;;  %s628_s1 = inlined_call_operand.vmem [shape: f32[64,3], index: 1, kind: input, shape index: {}, may-alias: {0,1}]   ;;  %s629_s2 = inlined_call_operand.vmem [shape: f32[1,64], index: 2, kind: input, shape index: {}]   ;;  %s630_s3 = inlined_call_operand.vmem [shape: f32[64,64], index: 3, kind: output, shape index: {}]  }
   0x1 LB: > { %s404_s13 = sadd.s32 4294967295, %s508_s12   ;;  %p408_p0 = scmp.ge.s32.totalorder %s508_s12, 1  ;;  %s508_s12 = sphi %s530_s12, %s13_s12  }
   0x2   : > { %p138_p1 = scmp.lt.s32.totalorder %s508_s12, 3 }
   0x4   : > { %p139_p2 = pnand %p408_p0, %p138_p1 }
   0x5   : > { %v178_v0 = vld [vmem:[%s628_s1] sm:$0xff] (!%p139_p2)  ;;  %v179_v1 = vld [vmem:[%s628_s1 + $0x8] sm:$0xff] (!%p139_p2)  ;;  %vm190_vm0 = vcmask (!%p139_p2), 23552   ;;  %v180_v2 = vld [vmem:[%s628_s1 + $0x10] sm:$0xff] (!%p139_p2)  ;;  %s409_s20 = sshll.u32 (!%p139_p2), %s404_s13, 2  ;;  %vm343_vm2 = vcmask (!%p139_p2), 523264  }
   0x6   : > { %142 = sbr.rel (%p139_p2) target bundleno = 259 (0x103), region = 32  ;;  %v462_v3 = vpack.c.bf16 (!%p139_p2), %v179_v1, %v178_v0  ;;  %vm549_vm1 = vmpackc.low (!%p139_p2), %vm190_vm0, %vm190_vm0  ;;  %v181_v5 = vld [vmem:[%s628_s1 + $0x18] sm:$0xff] (!%p139_p2)  ;;  %p163_p3 = scmp.lt.s32.totalorder (!%p139_p2), %s409_s20, 7  ;;  %v182_v7 = vld [vmem:[%s628_s1 + $0x20] sm:$0xff] (!%p139_p2) }
   0x7   : > { %v468_v6 = vpack.c.bf16 (!%p139_p2), %v181_v5, %v180_v2  ;;  %v183_v8 = vld [vmem:[%s628_s1 + $0x28] sm:$0xff] (!%p139_p2)  ;;  %v184_v22 = vld [vmem:[%s628_s1 + $0x30] sm:$0xff] (!%p139_p2)  ;;  %v185_v23 = vld [vmem:[%s628_s1 + $0x38] sm:$0xff] (!%p139_p2) }
   0x8   : > { %464 = vmatprep.subr.msk.bf16.mxu0 (!%p139_p2), %vm549_vm1, %v462_v3  ;;  %486 = vmatprep.subr.msk.bf16.mxu1 (!%p139_p2), %vm549_vm1, %v462_v3  ;;  %v474_v16 = vpack.c.bf16 (!%p139_p2), %v183_v8, %v182_v7  ;;  %v480_v24 = vpack.c.bf16 (!%p139_p2), %v185_v23, %v184_v22  ;;  %v425_v28 = vld [vmem:[%s629_s2] ss:$0 sm:$0xff] (!%p139_p2) }
   0x9   : > { %467 = vmatpush3.bf16.xpose.msk.msra.mxu0 (!%p139_p2), %vm549_vm1, %v462_v3  ;;  %490 = vmatpush3.bf16.xpose.msk.msra.mxu1 (!%p139_p2), %vm549_vm1, %v462_v3 }
   0xa   : > { %470 = vmatprep.subr.msk.bf16.mxu0 (!%p139_p2), %vm549_vm1, %v468_v6  ;;  %487 = vmatprep.subr.msk.bf16.mxu1 (!%p139_p2), %vm549_vm1, %v468_v6 }
   0xd   : > { %s634_s20 = smov (!%p163_p3, %s409_s20), 7 }
   0xe   : > { %s410_s23 = sshll.u32 %s634_s20, 3 }
   0xf   : > { %s166_s30 = scalar_lea.vmem %s627_s0, %s410_s23  ;;  %s172_s13 = scalar_lea.vmem %s630_s3, %s410_s23 }
  0x10   : > { %v174_v9 = vld [vmem:[%s166_s30] sm:$0xff]  ;;  %v176_v10 = vld [vmem:[%s166_s30 + $0x10] sm:$0xff]  ;;  %v175_v11 = vld [vmem:[%s166_s30 + $0x8] sm:$0xff] }
  0x11   : > { %v186_v12 = vmul.f32 %v174_v9, %v174_v9  ;;  %456 = vmatprep.mubr.msk.f32.mxu0 %vm190_vm0, %v174_v9  ;;  %v188_v13 = vmul.f32 %v176_v10, %v176_v10  ;;  %459 = vmatprep.mubr.msk.f32.mxu1 %vm190_vm0, %v176_v10  ;;  %v177_v14 = vld [vmem:[%s166_s30 + $0x18] sm:$0xff]  ;;  %v187_v15 = vmul.f32 %v175_v11, %v175_v11 }
  0x12   : > { %v189_v17 = vmul.f32 %v177_v14, %v177_v14  ;;  %473 = vmatpush3.bf16.xpose.msk.msra.mxu0 %vm549_vm1, %v468_v6  ;;  %491 = vmatpush3.bf16.xpose.msk.msra.mxu1 %vm549_vm1, %v468_v6 }
  0x13   : > { %v191_v18 = vsel %vm190_vm0, %v186_v12, 0.0  ;;  %v197_v19 = vsel %vm190_vm0, %v188_v13, 0.0  ;;  %v194_v20 = vsel %vm190_vm0, %v187_v15, 0.0  ;;  %476 = vmatprep.subr.msk.bf16.mxu0 %vm549_vm1, %v474_v16  ;;  %488 = vmatprep.subr.msk.bf16.mxu1 %vm549_vm1, %v474_v16 }
  0x14   : > { %192 = vadd.xlane.f32.xlu0 %v191_v18  ;;  %198 = vadd.xlane.f32.xlu1 %v197_v19  ;;  %v200_v21 = vsel %vm190_vm0, %v189_v17, 0.0 }
  0x18   : > { %195 = vadd.xlane.f32.xlu0 %v194_v20  ;;  %201 = vadd.xlane.f32.xlu1 %v200_v21 }
  0x1a   : > { %479 = vmatpush3.bf16.xpose.msk.msra.mxu0 %vm549_vm1, %v474_v16  ;;  %492 = vmatpush3.bf16.xpose.msk.msra.mxu1 %vm549_vm1, %v474_v16 }
  0x1b   : > { %482 = vmatprep.subr.msk.bf16.mxu0 %vm549_vm1, %v480_v24  ;;  %489 = vmatprep.subr.msk.bf16.mxu1 %vm549_vm1, %v480_v24 }
  0x22   : > { %485 = vmatpush3.bf16.xpose.msk.msra.mxu0 %vm549_vm1, %v480_v24  ;;  %493 = vmatpush3.bf16.xpose.msk.msra.mxu1 %vm549_vm1, %v480_v24 }
  0x29   : > { %457 = vmatmul.mubr.msk.f32.vlgmr.msra.gmra.mrb[0].mxu0 %vm190_vm0, %v175_v11  ;;  %460 = vmatmul.mubr.msk.f32.vlgmr.msra.gmra.mrb[0].mxu1 %vm190_vm0, %v177_v14 }
  0xa1   : > { %v193_v25 = vpop.xlane.xlu0 %192  ;;  %v199_v26 = vpop.xlane.xlu1 %198 }
  0xa2   : > { %v331_v36 = vadd.f32 %v425_v28, %v193_v25  ;;  %v333_v37 = vadd.f32 %v425_v28, %v199_v26 }
  0xa5   : > { %v196_v27 = vpop.xlane.xlu0 %195  ;;  %v202_v29 = vpop.xlane.xlu1 %201 }
  0xa6   : > { %v332_v33 = vadd.f32 %v425_v28, %v196_v27  ;;  %v334_v41 = vadd.f32 %v425_v28, %v202_v29 }
  0xfc   : > { %v458_v30 = vpop.f32.mrb[0].mxu0  ;;  %v461_v31 = vpop.f32.mrb[0].mxu1 }
  0xfd   : > { %v336_v32 = vmul.f32 2.0, %v458_v30  ;;  %v305_v34 = vpop.f32.mrb[1].mxu0  ;;  %v315_v35 = vpop.f32.mrb[1].mxu1  ;;  %v338_v40 = vmul.f32 2.0, %v461_v31 }
  0xfe   : > { %v335_v38 = vmul.f32 2.0, %v305_v34  ;;  %v337_v39 = vmul.f32 2.0, %v315_v35 }
  0xff   : > { %v340_v43 = vsub.f32 %v332_v33, %v336_v32  ;;  %v342_v45 = vsub.f32 %v334_v41, %v338_v40 }
 0x100   : > { %v339_v42 = vsub.f32 %v331_v36, %v335_v38  ;;  %v341_v44 = vsub.f32 %v333_v37, %v337_v39 }
 0x101   : > { %345 = vst.msk [vmem:[%s172_s13 + $0x8] sm:$0xff] %vm343_vm2, %v340_v43  ;;  %347 = vst.msk [vmem:[%s172_s13 + $0x18] sm:$0xff] %vm343_vm2, %v342_v45 }
 0x102   : > { %344 = vst.msk [vmem:[%s172_s13] sm:$0xff] %vm343_vm2, %v339_v42  ;;  %346 = vst.msk [vmem:[%s172_s13 + $0x10] sm:$0xff] %vm343_vm2, %v341_v44 }
 0x103 PF: > { %s13_s12 = sadd.s32 1, %s508_s12  }
 0x104   : > { %p10_p4 = scmp.ge.s32.totalorder %s13_s12, 4  }
 0x106   :  { %12 = sbr.rel (!%p10_p4) target bundleno = 1 (0x1), region = 62 }

// kernel: _lambda_.14
= control target key start
LH: loop header
LB: loop body
LE: loop exit
PB: predicated region body
PF: predicated region fallthrough
CT: control target
= control target key end

     0   :  { %s892_s21 = smov 0   ;;  %s948_s0 = inlined_call_operand.vmem [shape: f32[64,3], index: 0, kind: input, shape index: {}]   ;;  %s949_s1 = inlined_call_operand.vmem [shape: f32[64,6], index: 1, kind: input, shape index: {}]   ;;  %s950_s2 = inlined_call_operand.vmem [shape: f32[6,32], index: 2, kind: input, shape index: {}]   ;;  %s951_s3 = inlined_call_operand.vmem [shape: f32[1,32], index: 3, kind: input, shape index: {}]   ;;  %s952_s4 = inlined_call_operand.vmem [shape: f32[32,8], index: 4, kind: input, shape index: {}]   ;;  %s953_s5 = inlined_call_operand.vmem [shape: f32[1,8], index: 5, kind: input, shape index: {}]   ;;  %s954_s6 = inlined_call_operand.vmem [shape: f32[64,8], index: 6, kind: output, shape index: {}]  }
   0x1 LB: > { %s751_s22 = sadd.s32 4294967295, %s852_s21   ;;  %p755_p0 = scmp.ge.s32.totalorder %s852_s21, 1  ;;  %s852_s21 = sphi %s892_s21, %s16_s21  }
   0x2   : > { %p224_p1 = scmp.lt.s32.totalorder %s852_s21, 3 }
   0x4   : > { %p225_p2 = pnand %p755_p0, %p224_p1 }
   0x5   : > { %s756_s23 = sshll.u32 (!%p225_p2), %s751_s22, 2  ;;  %v286_v0 = vld [vmem:[%s950_s2] sm:$0x3f] (!%p225_p2)  ;;  %vm303_vm0 = vcmask (!%p225_p2), 1040384   ;;  %vm304_vm1 = vcmask (!%p225_p2), 1041408   ;;  %v854_v2 = vmov (!%p225_p2), 65535  }
   0x6   : > { %228 = sbr.rel (%p225_p2) target bundleno = 702 (0x2be), region = 44  ;;  %p260_p3 = scmp.lt.s32.totalorder (!%p225_p2), %s756_s23, 7  ;;  %v295_v1 = vpack.c.bf16 (!%p225_p2), %v286_v0, %v286_v0  ;;  %v305_v3 = vsel (!%p225_p2), %vm303_vm0, 4294967295, %v854_v2  ;;  %vm296_vm2 = vcmask (!%p225_p2), 23552   ;;  %v288_v28 = vld [vmem:[%s952_s4] sm:$0xff] (!%p225_p2)  ;;  %v289_v29 = vld [vmem:[%s952_s4 + $0x8] sm:$0xff] (!%p225_p2) }
   0x7   : > { %v306_v4 = vsel (!%p225_p2), %vm304_vm1, %v305_v3, 0  ;;  %s855_s9 = smov (!%p225_p2), 3   ;;  %v450_v30 = vpack.c.bf16 (!%p225_p2), %v289_v29, %v288_v28  ;;  %v290_v31 = vld [vmem:[%s952_s4 + $0x10] sm:$0xff] (!%p225_p2)  ;;  %v291_v32 = vld [vmem:[%s952_s4 + $0x18] sm:$0xff] (!%p225_p2)  ;;  %s856_s18 = smov (!%p225_p2), 125   ;;  %vm458_vm3 = vcmask (!%p225_p2), 261120  }
   0x8   : > { %v308_v5 = vand.u32 (!%p225_p2), %v306_v4, %v295_v1  ;;  %v365_v6 = vshrl.u32 (!%p225_p2), %v295_v1, 16  ;;  %v368_v7 = vshll.u32 (!%p225_p2), %v295_v1, 16  ;;  %v451_v33 = vpack.c.bf16 (!%p225_p2), %v291_v32, %v290_v31  ;;  %v766_v48 = vld [vmem:[%s951_s3] ss:$0 sm:$0xff] (!%p225_p2) }
   0x9   : > { %vm678_vm4 = vcmask (!%p225_p2), 64512  }
   0xa   : > { %v367_v13 = vrot.slane (!%p225_p2), %v365_v6, 1  ;;  %v370_v14 = vrot.slane (!%p225_p2), %v368_v7, 2  ;;  %793 = vmatprep.subr.bf16.mxu0 (!%p225_p2), %v308_v5 }
   0xb   : > { %794 = vmatpush3.bf16.msra.mxu0 (!%p225_p2), %v308_v5 }
   0xc   : > { %v371_v24 = vor.u32 (!%p225_p2), %v370_v14, %v367_v13  ;;  %805 = vmatprep.subr.bf16.mxu0 (!%p225_p2), %v450_v30 }
   0xd   : > { %s956_s23 = smov (!%p260_p3, %s756_s23), 7 }
   0xe   : > { %s903_s26 = sshll.u32 %s956_s23, 3  ;;  %v379_v25 = vand.u32 %v371_v24, %v306_v4 }
   0xf   : > { %s263_s29 = scalar_lea.vmem %s948_s0, %s903_s26  ;;  %s269_s8 = scalar_lea.vmem %s949_s1, %s903_s26 }
  0x10   : > { %v280_v8 = vld [vmem:[%s263_s29 + $0x10] sm:$0xff]  ;;  %v278_v9 = vld [vmem:[%s263_s29] sm:$0xff]  ;;  %v281_v10 = vld [vmem:[%s263_s29 + $0x18] sm:$0xff]  ;;  %799 = vmatprep.subr.bf16.mxu1 %v379_v25  ;;  %s275_s27 = scalar_lea.vmem %s954_s6, %s903_s26 }
  0x11   : > { %522 = vrot.lane.b32.xlu1 %v280_v8, %s855_s9  ;;  %518 = vrot.lane.b32.xlu0 %v278_v9, %s855_s9  ;;  %v279_v11 = vld [vmem:[%s263_s29 + $0x8] sm:$0xff]  ;;  %v284_v12 = vld [vmem:[%s269_s8 + $0x10] sm:$0xff]  ;;  %v294_v15 = vpack.c.bf16 %v281_v10, %v280_v8 }
  0x12   : > { %v361_v16 = vsub.f32 %v284_v12, %v280_v8  ;;  %v282_v17 = vld [vmem:[%s269_s8] sm:$0xff]  ;;  %v285_v18 = vld [vmem:[%s269_s8 + $0x18] sm:$0xff]  ;;  %v283_v19 = vld [vmem:[%s269_s8 + $0x8] sm:$0xff]  ;;  %v293_v20 = vpack.c.bf16 %v279_v11, %v278_v9  ;;  %800 = vmatpush3.bf16.msra.mxu1 %v379_v25 }
  0x13   : > { %v359_v21 = vsub.f32 %v282_v17, %v278_v9  ;;  %v362_v22 = vsub.f32 %v285_v18, %v281_v10  ;;  %v360_v23 = vsub.f32 %v283_v19, %v279_v11  ;;  %813 = vmatprep.subr.bf16.mxu1 %v379_v25 }
  0x14   : > { %795 = vmatprep.mubr.msk.bf16.mxu0 %vm296_vm2, %v293_v20 }
  0x15   : > { %524 = vrot.lane.b32.xlu1 %v281_v10, %s855_s9  ;;  %520 = vrot.lane.b32.xlu0 %v279_v11, %s855_s9  ;;  %v363_v26 = vpack.c.bf16 %v360_v23, %v359_v21  ;;  %v364_v27 = vpack.c.bf16 %v362_v22, %v361_v16  ;;  %v767_v23 = vld [vmem:[%s953_s5] ss:$0 sm:$0xff] }
  0x16   : > { %796 = vmatmul.mubr.msk.bf16.vlgmr.msra.gmra.mrb[0].mxu0 %vm296_vm2, %v294_v15 }
  0x17   : > { %801 = vmatprep.mubr.msk.bf16.mxu1 %vm296_vm2, %v363_v26  ;;  %806 = vmatpush3.bf16.msra.mxu0 %v450_v30 }
  0x18   : > { %802 = vmatmul.mubr.msk.bf16.vlgmr.msra.gmra.mrb[0].mxu1 %vm296_vm2, %v364_v27  ;;  %807 = vmatprep.subr.bf16.mxu0 %v451_v33 }
  0x19   : > { %814 = vmatpush3.bf16.msra.mxu1 %v379_v25 }
  0x1b   : > { %808 = vmatpush3.bf16.msra.mxu0 %v451_v33 }
  0x1c   : > { %819 = vmatprep.subr.bf16.mxu0 %v450_v30 }
  0x83   : > { %v523_v34 = vpop.permute.xlu1 %522  ;;  %v519_v35 = vpop.permute.xlu0 %518 }
  0x84   : > { %v532_v38 = vsub.f32 %v284_v12, %v523_v34  ;;  %v530_v39 = vsub.f32 %v282_v17, %v519_v35 }
  0x87   : > { %v525_v36 = vpop.permute.xlu1 %524  ;;  %v521_v37 = vpop.permute.xlu0 %520 }
  0x88   : > { %v533_v40 = vsub.f32 %v285_v18, %v525_v36  ;;  %v531_v41 = vsub.f32 %v283_v19, %v521_v37 }
  0x8a   : > { %v535_v42 = vpack.c.bf16 %v533_v40, %v532_v38  ;;  %v534_v43 = vpack.c.bf16 %v531_v41, %v530_v39 }
  0x8c   : > { %540 = vrot.lane.b32.xlu1 %v535_v42, %s856_s18  ;;  %538 = vrot.lane.b32.xlu0 %v534_v43, %s856_s18 }
  0xe9   : > { %v797_v44 = vpop.f32.mrb[0].mxu0 }
  0xea   : > { %v344_v45 = vpop.f32.mrb[1].mxu0 }
  0xeb   : > { %v798_v46 = vpop.f32.mrb[2].mxu0  ;;  %v803_v49 = vpop.f32.mrb[0].mxu1 }
  0xec   : > { %v347_v47 = vpop.f32.mrb[3].mxu0  ;;  %v432_v50 = vadd.f32 %v803_v49, %v797_v44  ;;  %v415_v51 = vpop.f32.mrb[1].mxu1 }
  0xed   : > { %v430_v52 = vadd.f32 %v415_v51, %v344_v45  ;;  %v804_v53 = vpop.f32.mrb[2].mxu1 }
  0xee   : > { %v442_v54 = vadd.f32 %v766_v48, %v432_v50  ;;  %v433_v55 = vadd.f32 %v804_v53, %v798_v46  ;;  %v418_v56 = vpop.f32.mrb[3].mxu1 }
  0xef   : > { %v440_v57 = vadd.f32 %v766_v48, %v430_v52  ;;  %v431_v58 = vadd.f32 %v418_v56, %v347_v47 }
  0xf0   : > { %v446_v59 = vmax.f32 %v442_v54, 0.0  ;;  %v443_v60 = vadd.f32 %v766_v48, %v433_v55 }
  0xf1   : > { %v444_v61 = vmax.f32 %v440_v57, 0.0  ;;  %v441_v62 = vadd.f32 %v766_v48, %v431_v58 }
  0xf2   : > { %v447_v63 = vmax.f32 %v443_v60, 0.0 }
  0xf3   : > { %v445_v0 = vmax.f32 %v441_v62, 0.0 }
  0xf4   : > { %v449_v1 = vpack.c.bf16 %v447_v63, %v446_v59 }
  0xf5   : > { %v448_v2 = vpack.c.bf16 %v445_v0, %v444_v61 }
  0xf7   : > { %809 = vmatprep.mubr.msk.bf16.mxu0 %vm458_vm3, %v448_v2 }
  0xf8   : > { %810 = vmatmul.mubr.msk.bf16.vlgmr.msra.gmra.mrb[4].mxu0 %vm458_vm3, %v449_v1 }
  0xf9   : > { %820 = vmatpush3.bf16.msra.mxu0 %v450_v30 }
  0xfa   : > { %821 = vmatprep.subr.bf16.mxu0 %v451_v33 }
  0xfd   : > { %822 = vmatpush3.bf16.msra.mxu0 %v451_v33 }
  0xfe   : > { %v541_v3 = vpop.permute.xlu1 %540  ;;  %v539_v4 = vpop.permute.xlu0 %538 }
  0xff   : > { %815 = vmatprep.mubr.msk.bf16.mxu1 %vm296_vm2, %v539_v4 }
 0x100   : > { %816 = vmatmul.mubr.msk.bf16.vlgmr.msra.gmra.mrb[4].mxu1 %vm296_vm2, %v541_v3 }
 0x1d3   : > { %v817_v5 = vpop.f32.mrb[4].mxu1 }
 0x1d4   : > { %v599_v6 = vadd.f32 %v817_v5, %v797_v44  ;;  %v582_v7 = vpop.f32.mrb[5].mxu1 }
 0x1d5   : > { %v597_v8 = vadd.f32 %v582_v7, %v344_v45  ;;  %v818_v9 = vpop.f32.mrb[6].mxu1 }
 0x1d6   : > { %v603_v10 = vadd.f32 %v766_v48, %v599_v6  ;;  %v600_v11 = vadd.f32 %v818_v9, %v798_v46  ;;  %v585_v12 = vpop.f32.mrb[7].mxu1 }
 0x1d7   : > { %v601_v13 = vadd.f32 %v766_v48, %v597_v8  ;;  %v598_v14 = vadd.f32 %v585_v12, %v347_v47 }
 0x1d8   : > { %v604_v15 = vadd.f32 %v766_v48, %v600_v11  ;;  %v607_v17 = vmax.f32 %v603_v10, 0.0 }
 0x1d9   : > { %v602_v16 = vadd.f32 %v766_v48, %v598_v14  ;;  %v605_v19 = vmax.f32 %v601_v13, 0.0 }
 0x1da   : > { %v608_v18 = vmax.f32 %v604_v15, 0.0 }
 0x1db   : > { %v606_v20 = vmax.f32 %v602_v16, 0.0 }
 0x1dc   : > { %v610_v21 = vpack.c.bf16 %v608_v18, %v607_v17 }
 0x1dd   : > { %v609_v22 = vpack.c.bf16 %v606_v20, %v605_v19 }
 0x1df   : > { %823 = vmatprep.mubr.msk.bf16.mxu0 %vm458_vm3, %v609_v22 }
 0x1e0   : > { %824 = vmatmul.mubr.msk.bf16.vlgmr.msra.gmra.mrb[4].mxu0 %vm458_vm3, %v610_v21 }
 0x2b3   : > { %v825_v24 = vpop.f32.mrb[4].mxu0 }
 0x2b4   : > { %v827_v25 = vadd.f32 %v825_v24, %v767_v23  ;;  %v651_v26 = vpop.f32.mrb[5].mxu0 }
 0x2b5   : > { %v828_v27 = vadd.f32 %v767_v23, %v651_v26  ;;  %v826_v28 = vpop.f32.mrb[6].mxu0 }
 0x2b6   : > { %v829_v29 = vadd.f32 %v826_v28, %v767_v23  ;;  %v654_v30 = vpop.f32.mrb[7].mxu0  ;;  %v672_v33 = vadd.f32 %v827_v25, %v767_v23 }
 0x2b7   : > { %v670_v31 = vadd.f32 %v828_v27, %v767_v23  ;;  %v830_v32 = vadd.f32 %v767_v23, %v654_v30 }
 0x2b8   : > { %v673_v35 = vadd.f32 %v829_v29, %v767_v23  ;;  %v676_v38 = vmax.f32 %v672_v33, 0.0 }
 0x2b9   : > { %v674_v34 = vmax.f32 %v670_v31, 0.0  ;;  %v671_v36 = vadd.f32 %v830_v32, %v767_v23 }
 0x2ba   : > { %v677_v39 = vmax.f32 %v673_v35, 0.0  ;;  %681 = vst.msk [vmem:[%s275_s27 + $0x10] sm:$0xff] %vm678_vm4, %v676_v38 }
 0x2bb   : > { %679 = vst.msk [vmem:[%s275_s27] sm:$0xff] %vm678_vm4, %v674_v34  ;;  %v675_v37 = vmax.f32 %v671_v36, 0.0 }
 0x2bc   : > { %682 = vst.msk [vmem:[%s275_s27 + $0x18] sm:$0xff] %vm678_vm4, %v677_v39 }
 0x2bd   : > { %680 = vst.msk [vmem:[%s275_s27 + $0x8] sm:$0xff] %vm678_vm4, %v675_v37 }
 0x2be PF: > { %s16_s21 = sadd.s32 1, %s852_s21  }
 0x2bf   : > { %p13_p4 = scmp.ge.s32.totalorder %s16_s21, 4  }
 0x2c1   :  { %15 = sbr.rel (!%p13_p4) target bundleno = 1 (0x1), region = 77 }

// kernel: _lambda_.16
= control target key start
LH: loop header
LB: loop body
LE: loop exit
PB: predicated region body
PF: predicated region fallthrough
CT: control target
= control target key end

     0   :  { %s1962_s0 = inlined_call_operand.vmem [shape: f32[64,8], index: 0, kind: input, shape index: {}]   ;;  %s1963_s1 = inlined_call_operand.vmem [shape: f32[64,16], index: 1, kind: input, shape index: {}]   ;;  %s1964_s2 = inlined_call_operand.vmem [shape: f32[64,16], index: 2, kind: input, shape index: {}]   ;;  %s1965_s3 = inlined_call_operand.vmem [shape: f32[24,32], index: 3, kind: input, shape index: {}]   ;;  %s1966_s4 = inlined_call_operand.vmem [shape: f32[1,32], index: 4, kind: input, shape index: {}, may-alias: {4,8}]   ;;  %s1967_s5 = inlined_call_operand.vmem [shape: f32[32,8], index: 5, kind: input, shape index: {}]   ;;  %s1968_s6 = inlined_call_operand.vmem [shape: f32[1,8], index: 6, kind: input, shape index: {}, may-alias: {6,10}]   ;;  %s1969_s7 = inlined_call_operand.vmem [shape: f32[16,32], index: 7, kind: input, shape index: {}]   ;;  %s1970_s8 = inlined_call_operand.vmem [shape: f32[1,32], index: 8, kind: input, shape index: {}, may-alias: {4,8}]   ;;  %s1971_s9 = inlined_call_operand.vmem [shape: f32[32,8], index: 9, kind: input, shape index: {}]   ;;  %s1972_s10 = inlined_call_operand.vmem [shape: f32[1,8], index: 10, kind: input, shape index: {}, may-alias: {6,10}]   ;;  %s1973_s11 = inlined_call_operand.vmem [shape: f32[64,8], index: 11, kind: output, shape index: {0}]   ;;  %s1974_s12 = inlined_call_operand.hbm [shape: f32[64,16], index: 12, kind: output, shape index: {1}]  }
   0x1   :  { %1977 = sst [smem:[#allocation5_spill]] %s1962_s0 }
   0x2   :  { %1978 = sst [smem:[#allocation6_spill]] %s1965_s3 }
   0x3   :  { %18 = vsyncpa [#allocation3], 0 }
   0x4   :  { %20 = vsyncpa [#allocation3 + $0x1], 0  ;;  %s1697_s21 = smov 0   ;;  %s1699_s22 = smov 0  }
   0x5   :  { %s1701_s23 = smov 0   ;;  %s1703_s24 = smov 0  }
   0x6 LB: > { %s1718_s25 = sadd.s32 4294967295, %s1626_s24   ;;  %s1353_s26 = sadd.s32 4294967294, %s1626_s24   ;;  %s1626_s24 = sphi %s1703_s24, %s1988_s24   ;;  %s1622_s23 = sphi %s1701_s23, %s1987_s23   ;;  %s1618_s22 = sphi %s1699_s22, %s1986_s22   ;;  %s1614_s21 = sphi %s1697_s21, %s1985_s21  }
   0x7   : > { %s1722_s27 = sadd.s32 1, %s1626_s24   ;;  %s305_s28 = sadd.s32 1, %s1622_s23 }
   0x8   : > { %s302_s29 = ssub.s32 %s1626_s24, %s1722_s27  ;;  %p315_p0 = scmp.ne.s32.totalorder %s1622_s23, %s1618_s22 }
   0x9   : > { %p303_p1 = scmp.eq.s32.totalorder %s302_s29, 0  ;;  %p316_p2 = scmp.eq.s32.totalorder %s1718_s25, 1 }
   0xa   : > { %p321_p3 = scmp.ne.s32.totalorder %s1618_s22, %s1614_s21  ;;  %p322_p4 = scmp.eq.s32.totalorder %s1353_s26, 1 }
   0xb   : > { %s1733_s30 = scalar_select %p303_p1, %s1622_s23, %s305_s28  }
   0xc   : > { %p1735_p5 = por %p316_p2, %p315_p0  ;;  %p1739_p6 = por %p322_p4, %p321_p3 }
   0xd   : > { %p1356_p7 = scmp.ge.s32.totalorder %s1626_s24, 1  ;;  %p391_p8 = scmp.lt.s32.totalorder %s1626_s24, 3 }
   0xf   : > { %p392_p9 = pnand %p1356_p7, %p391_p8 }
  0x10   : > { %s1981_s3 = sld [smem:[#allocation6_spill]] (!%p392_p9)  ;;  %vm509_vm0 = vcmask (!%p392_p9), 1043456   ;;  %s1358_s17 = sshll.u32 (!%p392_p9), %s1718_s25, 2  ;;  %vm502_vm1 = vcmask (!%p392_p9), 64512   ;;  %v486_v27 = vld [vmem:[%s1967_s5] sm:$0xff] (!%p392_p9)  ;;  %v487_v28 = vld [vmem:[%s1967_s5 + $0x8] sm:$0xff] (!%p392_p9) }
  0x11   : > { %395 = sbr.rel (%p392_p9) target bundleno = 1189 (0x4a5), region = 64  ;;  %p449_p10 = scmp.lt.s32.totalorder (!%p392_p9), %s1358_s17, 7  ;;  %v712_v29 = vpack.c.bf16 (!%p392_p9), %v487_v28, %v486_v27  ;;  %v488_v30 = vld [vmem:[%s1967_s5 + $0x10] sm:$0xff] (!%p392_p9)  ;;  %v489_v31 = vld [vmem:[%s1967_s5 + $0x18] sm:$0xff] (!%p392_p9)  ;;  %v1372_v37 = vld [vmem:[%s1966_s4] ss:$0 sm:$0xff] (!%p392_p9) }
  0x12   : > { %s1982_s0 = sld [smem:[#allocation5_spill]] (!%p392_p9)  ;;  %s1628_s29 = smov (!%p392_p9), 120   ;;  %v713_v32 = vpack.c.bf16 (!%p392_p9), %v489_v31, %v488_v30  ;;  %vm720_vm2 = vcmask (!%p392_p9), 261120   ;;  %v1373_v60 = vld [vmem:[%s1968_s6] ss:$0 sm:$0xff] (!%p392_p9)  ;;  %vm1001_vm3 = vcmask (!%p392_p9), 130112  }
  0x13   : > { %s1976_s15 = sand.u32 (!%p392_p9), 1, %s1618_s22  }
  0x16   : > { %v483_v0 = vld [vmem:[%s1981_s3 + $0x8] sm:$0xff] (!%p392_p9)  ;;  %v484_v1 = vld [vmem:[%s1981_s3 + $0x10] sm:$0xff] (!%p392_p9)  ;;  %v482_v2 = vld [vmem:[%s1981_s3] sm:$0xff] (!%p392_p9) }
  0x17   : > { %v568_v3 = vpack.c.bf16 (!%p392_p9), %v483_v0, %v483_v0  ;;  %v1755_v4 = vpack.c.bf16 (!%p392_p9), %v484_v1, %v484_v1  ;;  %v501_v5 = vpack.c.bf16 (!%p392_p9), %v482_v2, %v482_v2 }
  0x18   : > { %s1990_s17 = smov (!%p449_p10, %s1358_s17), 7 }
  0x19   : > { %1516 = vmatprep.subr.msk.bf16.mxu1 %vm509_vm0, %v568_v3  ;;  %v1759_v6 = vsel %vm509_vm0, %v568_v3, 0  ;;  %1515 = vmatprep.subr.msk.bf16.mxu0 %vm509_vm0, %v501_v5  ;;  %v511_v7 = vsel %vm509_vm0, %v501_v5, 0  ;;  %s1764_s28 = sshll.u32 %s1990_s17, 3  ;;  %v1786_v16 = vsel %vm509_vm0, %v1755_v4, 0 }
  0x1a   : > { %1436 = vmatpush3.bf16.msra.mxu1 %v1759_v6  ;;  %1430 = vmatpush3.bf16.msra.mxu0 %v511_v7  ;;  %s458_s16 = scalar_lea.vmem %s1963_s1, %s1764_s28  ;;  %s464_s20 = scalar_lea.vmem %s1964_s2, %s1764_s28 }
  0x1b   : > { %1517 = vmatprep.subr.msk.bf16.mxu1 %vm509_vm0, %v1755_v4  ;;  %v478_v8 = vld [vmem:[%s458_s16] sm:$0xff]  ;;  %v479_v9 = vld [vmem:[%s458_s16 + $0x8] sm:$0xff]  ;;  %v480_v10 = vld [vmem:[%s458_s16 + $0x10] sm:$0xff]  ;;  %s452_s3 = scalar_lea.vmem %s1982_s0, %s1764_s28  ;;  %1447 = vmatprep.subr.bf16.mxu0 %v712_v29 }
  0x1c   : > { %v566_v11 = vpack.c.bf16 %v479_v9, %v478_v8  ;;  %v481_v12 = vld [vmem:[%s458_s16 + $0x18] sm:$0xff]  ;;  %v1780_v13 = vld [vmem:[%s452_s3] sm:$0xff]  ;;  %v1782_v14 = vld [vmem:[%s452_s3 + $0x8] sm:$0xff]  ;;  %s1357_s16 = sshll.u32 %s1976_s15, 5  ;;  %s1395_s15 = sshll.u32 %s1718_s25, 9 }
  0x1d   : > { %v567_v15 = vpack.c.bf16 %v481_v12, %v480_v10  ;;  %v1790_v17 = vpack.c.bf16 %v1782_v14, %v1780_v13  ;;  %v1792_v18 = vld [vmem:[%s452_s3 + $0x10] sm:$0xff]  ;;  %v1794_v19 = vld [vmem:[%s452_s3 + $0x18] sm:$0xff]  ;;  %v562_v20 = vld [vmem:[%s464_s20] sm:$0xff]  ;;  %s1983_s3 = sand.u32 1, %s1618_s22   ;;  %s1630_s25 = smov [#allocation2]  }
  0x1e   : > { %1437 = vmatprep.mubr.msk.bf16.mxu1 %vm502_vm1, %v566_v11  ;;  %v1799_v21 = vpack.c.bf16 %v1794_v19, %v1792_v18  ;;  %v563_v22 = vld [vmem:[%s464_s20 + $0x8] sm:$0xff]  ;;  %790 = vrot.lane.b32.xlu0 %v566_v11, %s1628_s29  ;;  %v564_v24 = vld [vmem:[%s464_s20 + $0x10] sm:$0xff]  ;;  %v565_v25 = vld [vmem:[%s464_s20 + $0x18] sm:$0xff]  ;;  %s1841_s20 = scalar_lea.vmem [#allocation2], %s1357_s16  ;;  %s1975_s16 = smov 8  }
  0x1f   : > { %1438 = vmatmul.mubr.msk.bf16.vlgmr.msra.gmra.mrb[0].mxu1 %vm502_vm1, %v567_v15  ;;  %1431 = vmatprep.mubr.msk.bf16.mxu0 %vm502_vm1, %v1790_v17  ;;  %v631_v23 = vpack.c.bf16 %v563_v22, %v562_v20  ;;  %v632_v26 = vpack.c.bf16 %v565_v25, %v564_v24  ;;  %s1905_s18 = scalar_lea.sflag [#allocation3], %s1983_s3 }
  0x20   : > { %1442 = vmatpush3.bf16.msra.mxu1 %v1786_v16  ;;  %1432 = vmatmul.mubr.msk.bf16.vlgmr.msra.gmra.mrb[0].mxu0 %vm502_vm1, %v1799_v21 }
  0x21   : > { %1443 = vmatprep.mubr.msk.bf16.mxu1 %vm502_vm1, %v631_v23  ;;  %857 = vrot.lane.b32.xlu1 %v631_v23, %s1628_s29 }
  0x22   : > { %792 = vrot.lane.b32.xlu0 %v567_v15, %s1628_s29  ;;  %1467 = vmatprep.subr.bf16.mxu1 %v712_v29 }
  0x23   : > { %1448 = vmatpush3.bf16.msra.mxu0 %v712_v29 }
  0x24   : > { %1449 = vmatprep.subr.bf16.mxu0 %v713_v32 }
  0x25   : > { %859 = vrot.lane.b32.xlu1 %v632_v26, %s1628_s29  ;;  %s1899_s29 = scalar_lea.hbm %s1974_s12, %s1395_s15 }
  0x27   : > { %1450 = vmatpush3.bf16.msra.mxu0 %v713_v32 }
  0x28   : > { %1518 = vmatprep.subr.msk.bf16.mxu0 %vm509_vm0, %v568_v3 }
  0x2b   : > { %1444 = vmatmul.mubr.msk.bf16.vlgmr.msra.gmra.mrb[0].mxu1 %vm502_vm1, %v632_v26 }
  0x2c   : > { %1468 = vmatpush3.bf16.msra.mxu1 %v712_v29  ;;  %v492_v29 = vld [vmem:[%s1969_s7 + $0x8] sm:$0xff] }
  0x2d   : > { %1469 = vmatprep.subr.bf16.mxu1 %v713_v32  ;;  %v1013_v30 = vpack.c.bf16 %v492_v29, %v492_v29 }
  0x2f   : > { %v1021_v31 = vsel %vm509_vm0, %v1013_v30, 0 }
  0x30   : > { %1470 = vmatpush3.bf16.msra.mxu1 %v713_v32  ;;  %v491_v32 = vld [vmem:[%s1969_s7] sm:$0xff] }
  0x31   : > { %1520 = vmatprep.subr.msk.bf16.mxu1 %vm509_vm0, %v1013_v30 }
  0x90   : > { %v791_v56 = vpop.permute.xlu0 %790 }
  0x93   : > { %v858_v58 = vpop.permute.xlu1 %857 }
  0x94   : > { %v793_v57 = vpop.permute.xlu0 %792 }
  0x97   : > { %v860_v59 = vpop.permute.xlu1 %859 }
  0xf3   : > { %v1433_v33 = vpop.f32.mrb[0].mxu0 }
  0xf4   : > { %v547_v34 = vpop.f32.mrb[1].mxu0 }
  0xf5   : > { %v1434_v35 = vpop.f32.mrb[2].mxu0 }
  0xf6   : > { %v550_v36 = vpop.f32.mrb[3].mxu0 }
  0xfe   : > { %v1445_v38 = vpop.f32.mrb[0].mxu1 }
  0xff   : > { %v1495_v39 = vadd.f32 %v1445_v38, %v1433_v33  ;;  %v677_v40 = vpop.f32.mrb[1].mxu1 }
 0x100   : > { %v1496_v41 = vadd.f32 %v677_v40, %v547_v34  ;;  %v1446_v42 = vpop.f32.mrb[2].mxu1 }
 0x101   : > { %v704_v43 = vadd.f32 %v1495_v39, %v1372_v37  ;;  %v1497_v44 = vadd.f32 %v1446_v42, %v1434_v35  ;;  %v680_v45 = vpop.f32.mrb[3].mxu1 }
 0x102   : > { %v702_v46 = vadd.f32 %v1496_v41, %v1372_v37  ;;  %v1498_v47 = vadd.f32 %v680_v45, %v550_v36 }
 0x103   : > { %v705_v48 = vadd.f32 %v1497_v44, %v1372_v37  ;;  %v708_v50 = vmax.f32 %v704_v43, 0.0 }
 0x104   : > { %v703_v49 = vadd.f32 %v1498_v47, %v1372_v37  ;;  %v706_v52 = vmax.f32 %v702_v46, 0.0 }
 0x105   : > { %v709_v51 = vmax.f32 %v705_v48, 0.0 }
 0x106   : > { %v707_v53 = vmax.f32 %v703_v49, 0.0  ;;  %v494_v49 = vld [vmem:[%s1971_s9] sm:$0xff] }
 0x107   : > { %v711_v54 = vpack.c.bf16 %v709_v51, %v708_v50  ;;  %v495_v50 = vld [vmem:[%s1971_s9 + $0x8] sm:$0xff] }
 0x108   : > { %v710_v55 = vpack.c.bf16 %v707_v53, %v706_v52  ;;  %v1140_v51 = vpack.c.bf16 %v495_v50, %v494_v49 }
 0x10a   : > { %1451 = vmatprep.mubr.msk.bf16.mxu0 %vm720_vm2, %v710_v55 }
 0x10b   : > { %1452 = vmatmul.mubr.msk.bf16.vlgmr.msra.gmra.mrb[4].mxu0 %vm720_vm2, %v711_v54 }
 0x10c   : > { %1456 = vmatpush3.bf16.msra.mxu0 %v1759_v6  ;;  %1457 = vmatprep.mubr.msk.bf16.mxu0 %vm502_vm1, %v791_v56 }
 0x10d   : > { %1519 = vmatprep.subr.msk.bf16.mxu0 %vm509_vm0, %v1755_v4 }
 0x113   : > { %1458 = vmatmul.mubr.msk.bf16.vlgmr.msra.gmra.mrb[8].mxu0 %vm502_vm1, %v793_v57  ;;  %v1386_v57 = vld [vmem:[%s1970_s8] ss:$0 sm:$0xff] }
 0x114   : > { %1462 = vmatpush3.bf16.msra.mxu0 %v1786_v16  ;;  %1463 = vmatprep.mubr.msk.bf16.mxu0 %vm502_vm1, %v858_v58 }
 0x115   : > { %1487 = vmatprep.subr.bf16.mxu0 %v1140_v51 }
 0x11f   : > { %1464 = vmatmul.mubr.msk.bf16.vlgmr.msra.gmra.mrb[8].mxu0 %vm502_vm1, %v860_v59 }
 0x120   : > { %1488 = vmatpush3.bf16.msra.mxu0 %v1140_v51 }
 0x1de   : > { %v1453_v61 = vpop.f32.mrb[4].mxu0 }
 0x1df   : > { %v770_v62 = vadd.f32 %v1453_v61, %v1373_v60  ;;  %v761_v63 = vpop.f32.mrb[5].mxu0 }
 0x1e0   : > { %v762_v0 = vadd.f32 %v1373_v60, %v761_v63  ;;  %v1454_v1 = vpop.f32.mrb[6].mxu0 }
 0x1e1   : > { %778 = vst.msk [vmem:[%s1841_s20 + $0x10] sm:$0xff] %vm502_vm1, %v770_v62  ;;  %v773_v2 = vadd.f32 %v1454_v1, %v1373_v60  ;;  %v764_v3 = vpop.f32.mrb[7].mxu0 }
 0x1e2   : > { %776 = vst.msk [vmem:[%s1841_s20] sm:$0xff] %vm502_vm1, %v762_v0  ;;  %v765_v4 = vadd.f32 %v1373_v60, %v764_v3 }
 0x1e3   : > { %779 = vst.msk [vmem:[%s1841_s20 + $0x18] sm:$0xff] %vm502_vm1, %v773_v2 }
 0x1e4   : > { %777 = vst.msk [vmem:[%s1841_s20 + $0x8] sm:$0xff] %vm502_vm1, %v765_v4 }
 0x1f2   : > { %v1465_v5 = vpop.f32.mrb[8].mxu0 }
 0x1f3   : > { %v1499_v6 = vadd.f32 %v1465_v5, %v1433_v33  ;;  %v901_v7 = vpop.f32.mrb[9].mxu0  ;;  %v1010_v33 = vpack.c.bf16 %v491_v32, %v491_v32 }
 0x1f4   : > { %v1500_v8 = vadd.f32 %v901_v7, %v547_v34  ;;  %v1466_v9 = vpop.f32.mrb[10].mxu0 }
 0x1f5   : > { %v922_v10 = vadd.f32 %v1499_v6, %v1372_v37  ;;  %v1501_v11 = vadd.f32 %v1466_v9, %v1434_v35  ;;  %v904_v12 = vpop.f32.mrb[11].mxu0  ;;  %v1073_v48 = vsel %vm509_vm0, %v1010_v33, 0 }
 0x1f6   : > { %v920_v15 = vadd.f32 %v1500_v8, %v1372_v37  ;;  %v1502_v16 = vadd.f32 %v904_v12, %v550_v36 }
 0x1f7   : > { %v923_v20 = vadd.f32 %v1501_v11, %v1372_v37  ;;  %v926_v23 = vmax.f32 %v922_v10, 0.0 }
 0x1f8   : > { %v921_v22 = vadd.f32 %v1502_v16, %v1372_v37  ;;  %v924_v25 = vmax.f32 %v920_v15, 0.0 }
 0x1f9   : > { %v927_v24 = vmax.f32 %v923_v20, 0.0 }
 0x1fa   : > { %v925_v26 = vmax.f32 %v921_v22, 0.0 }
 0x1fb   : > { %v929_v27 = vpack.c.bf16 %v927_v24, %v926_v23 }
 0x1fc   : > { %v928_v28 = vpack.c.bf16 %v925_v26, %v924_v25 }
 0x1fe   : > { %1471 = vmatprep.mubr.msk.bf16.mxu1 %vm720_vm2, %v928_v28 }
 0x1ff   : > { %1472 = vmatmul.mubr.msk.bf16.vlgmr.msra.gmra.mrb[4].mxu1 %vm720_vm2, %v929_v27 }
 0x200   : > { %1476 = vmatpush3.bf16.msra.mxu1 %v1021_v31 }
 0x201   : > { %1521 = vmatprep.subr.msk.bf16.mxu1 %vm509_vm0, %v1010_v33 }
 0x2d2   : > { %v1473_v34 = vpop.f32.mrb[4].mxu1 }
 0x2d3   : > { %v979_v35 = vadd.f32 %v1473_v34, %v1373_v60  ;;  %v970_v36 = vpop.f32.mrb[5].mxu1 }
 0x2d4   : > { %v971_v37 = vadd.f32 %v1373_v60, %v970_v36  ;;  %v1474_v38 = vpop.f32.mrb[6].mxu1 }
 0x2d5   : > { %v982_v39 = vadd.f32 %v1474_v38, %v1373_v60  ;;  %v973_v40 = vpop.f32.mrb[7].mxu1  ;;  %v1008_v42 = vadd.f32 %v979_v35, %v770_v62 }
 0x2d6   : > { %v974_v41 = vadd.f32 %v1373_v60, %v973_v40  ;;  %989 = vrot.lane.b32.xlu0 %v971_v37, %s1975_s16  ;;  %v1006_v44 = vadd.f32 %v971_v37, %v762_v0 }
 0x2d7   : > { %v1009_v43 = vadd.f32 %v982_v39, %v773_v2 }
 0x2d8   : > { %v1007_v45 = vadd.f32 %v974_v41, %v765_v4  ;;  %991 = vrot.lane.b32.xlu1 %v974_v41, %s1975_s16 }
 0x2d9   : > { %v1012_v46 = vpack.c.bf16 %v1009_v43, %v1008_v42 }
 0x2da   : > { %v1011_v47 = vpack.c.bf16 %v1007_v45, %v1006_v44  ;;  %993 = vrot.lane.b32.xlu0 %v979_v35, %s1975_s16 }
 0x2dc   : > { %995 = vrot.lane.b32.xlu1 %v982_v39, %s1975_s16  ;;  %1477 = vmatprep.mubr.msk.bf16.mxu1 %vm502_vm1, %v1011_v47  ;;  %s1242_s16 = sshll.u32 %s1841_s20, 4  ;;  %s1901_s16 = int_to_ptr.vmem [resolvable:$true] %s1242_s16 }
 0x2dd   : > { %1478 = vmatmul.mubr.msk.bf16.vlgmr.msra.gmra.mrb[8].mxu1 %vm502_vm1, %v1012_v46  ;;  %s1564_s19 = scalar_lea.vmem %s1901_s16, 512 }
 0x2de   : > { %1482 = vmatpush3.bf16.msra.mxu1 %v1073_v48  ;;  %1483 = vmatprep.mubr.msk.bf16.mxu1 %vm502_vm1, %v1790_v17  ;;  %v496_v17 = vld [vmem:[%s1971_s9 + $0x10] sm:$0xff]  ;;  %p1565_p11 = scmp.ne.s32.totalorder %s1901_s16, %s1564_s19 }
 0x2e0   : > { %p1566_p12 = pnand %p1565_p11, %p1735_p5 }
 0x2e2   : > { %p1567_p13 = pneg %p1566_p12 }
 0x2e9   : > { %1484 = vmatmul.mubr.msk.bf16.vlgmr.msra.gmra.mrb[8].mxu1 %vm502_vm1, %v1799_v21  ;;  %v497_v21 = vld [vmem:[%s1971_s9 + $0x18] sm:$0xff] }
 0x2ea   : > { %v1141_v52 = vpack.c.bf16 %v497_v21, %v496_v17 }
 0x2ec   : > { %1489 = vmatprep.subr.bf16.mxu0 %v1141_v52 }
 0x2ed   : > { %1490 = vmatpush3.bf16.msra.mxu0 %v1141_v52 }
 0x348   : > { %v990_v53 = vpop.permute.xlu0 %989 }
 0x349   : > { %1002 = vst.msk [vmem:[%s1841_s20] sm:$0xff] %vm1001_vm3, %v990_v53 }
 0x34a   : > { %v992_v54 = vpop.permute.xlu1 %991 }
 0x34b   : > { %1003 = vst.msk [vmem:[%s1841_s20 + $0x8] sm:$0xff] %vm1001_vm3, %v992_v54 }
 0x34c   : > { %v994_v55 = vpop.permute.xlu0 %993 }
 0x34d   : > { %1004 = vst.msk [vmem:[%s1841_s20 + $0x10] sm:$0xff] %vm1001_vm3, %v994_v55 }
 0x34e   : > { %v996_v56 = vpop.permute.xlu1 %995 }
 0x34f   : > { %1005 = vst.msk [vmem:[%s1841_s20 + $0x18] sm:$0xff] %vm1001_vm3, %v996_v56  ;;  %s1568_s20 = sshll.u32 %s1630_s25, 4  ;;  %s1569_s20 = int_to_ptr.vmem [resolvable:$false] %s1568_s20 }
 0x350   : > { %s1570_s0 = scalar_lea.vmem %s1569_s20, 1024  ;;  %p1571_p0 = scmp.lt.s32.totalorder %s1901_s16, %s1569_s20 }
 0x351   : > { %p1572_p1 = scmp.lt.s32.totalorder %s1570_s0, %s1564_s19 }
 0x353   : > { %p1573_p2 = por %p1572_p1, %p1571_p0 }
 0x355   : > { %p1574_p3 = pnand %p1573_p2, %p1567_p13 }
 0x3bc   : > { %v1485_v58 = vpop.f32.mrb[8].mxu1 }
 0x3bd   : > { %v1132_v59 = vadd.f32 %v1485_v58, %v1386_v57  ;;  %v1109_v60 = vpop.f32.mrb[9].mxu1 }
 0x3be   : > { %v1130_v61 = vadd.f32 %v1386_v57, %v1109_v60  ;;  %v1486_v62 = vpop.f32.mrb[10].mxu1 }
 0x3bf   : > { %v1133_v63 = vadd.f32 %v1486_v62, %v1386_v57  ;;  %v1112_v0 = vpop.f32.mrb[11].mxu1  ;;  %v1136_v2 = vmax.f32 %v1132_v59, 0.0 }
 0x3c0   : > { %v1131_v1 = vadd.f32 %v1386_v57, %v1112_v0  ;;  %v1134_v4 = vmax.f32 %v1130_v61, 0.0 }
 0x3c1   : > { %v1137_v3 = vmax.f32 %v1133_v63, 0.0 }
 0x3c2   : > { %v1135_v5 = vmax.f32 %v1131_v1, 0.0 }
 0x3c3   : > { %v1139_v6 = vpack.c.bf16 %v1137_v3, %v1136_v2 }
 0x3c4   : > { %v1138_v7 = vpack.c.bf16 %v1135_v5, %v1134_v4 }
 0x3c6   : > { %1491 = vmatprep.mubr.msk.bf16.mxu0 %vm720_vm2, %v1138_v7 }
 0x3c7   : > { %1492 = vmatmul.mubr.msk.bf16.vlgmr.msra.gmra.mrb[12].mxu0 %vm720_vm2, %v1139_v6 }
 0x3c8   : > { %1577 = shalt.err (!%p1574_p3)
}
 0x3c9   : > { %s1578_s15 = scalar_lea.hbm %s1899_s29, 512  ;;  %s1582_s3 = scalar_lea.hbm %s1974_s12, 1024 }
 0x3ca   : > { %p1579_p4 = scmp.ne.s32.totalorder %s1899_s29, %s1578_s15  ;;  %p1583_p9 = scmp.lt.u32.totalorder %s1899_s29, %s1974_s12 }
 0x3cb   : > { %p1584_p10 = scmp.lt.u32.totalorder %s1582_s3, %s1578_s15  ;;  %p1586_p12 = scmp.lt.u32.totalorder %s1578_s15, %s1899_s29 }
 0x3cc   : > { %p1580_p7 = pnand %p1579_p4, %p1735_p5 }
 0x3cd   : > { %p1585_p11 = por %p1584_p10, %p1583_p9 }
 0x3ce   : > { %p1581_p8 = pneg %p1580_p7 }
 0x3cf   : > { %p1587_p13 = por %p1586_p12, %p1585_p11 }
 0x3d1   : > { %p1588_p0 = pnand %p1587_p13, %p1581_p8 }
 0x3d3   : > { %1591 = shalt.err (!%p1588_p0)
}
 0x3d4   : > { %s1631_s0 = smov 128   ;;  %s1984_s19 = smov 8   ;;  %v1387_v8 = vld [vmem:[%s1972_s10] ss:$0 sm:$0xff]  ;;  %v1203_v12 = vmul.f32 0.5, %v1780_v13  ;;  %v1204_v23 = vmul.f32 0.5, %v1782_v14 }
 0x3d5   : > { %1522 = dma.vmem_to_hbm [thread:$0]  (%p1735_p5), %s1901_s16, 512, %s1899_s29, %s1905_s18, %s1631_s0, %s1631_s0, %s1984_s19   ;;  %v1205_v26 = vmul.f32 0.5, %v1792_v18  ;;  %v1206_v29 = vmul.f32 0.5, %v1794_v19 }
 0x3d6   : > { %s470_s29 = scalar_lea.vmem %s1973_s11, %s1764_s28 }
 0x49a   : > { %v1493_v9 = vpop.f32.mrb[12].mxu0 }
 0x49b   : > { %v1197_v10 = vadd.f32 %v1493_v9, %v1387_v8  ;;  %v1188_v11 = vpop.f32.mrb[13].mxu0 }
 0x49c   : > { %v1189_v15 = vadd.f32 %v1387_v8, %v1188_v11  ;;  %v1494_v16 = vpop.f32.mrb[14].mxu0 }
 0x49d   : > { %v1200_v20 = vadd.f32 %v1494_v16, %v1387_v8  ;;  %v1191_v22 = vpop.f32.mrb[15].mxu0  ;;  %v1209_v27 = vmul.f32 0.5, %v1197_v10 }
 0x49e   : > { %v1207_v24 = vmul.f32 0.5, %v1189_v15  ;;  %v1192_v25 = vadd.f32 %v1387_v8, %v1191_v22 }
 0x49f   : > { %v1210_v30 = vmul.f32 0.5, %v1200_v20  ;;  %v1213_v32 = vadd.f32 %v1209_v27, %v1205_v26 }
 0x4a0   : > { %v1211_v28 = vadd.f32 %v1207_v24, %v1203_v12  ;;  %v1208_v13 = vmul.f32 0.5, %v1192_v25 }
 0x4a1   : > { %v1214_v33 = vadd.f32 %v1210_v30, %v1206_v29  ;;  %1217 = vst.msk [vmem:[%s470_s29 + $0x10] sm:$0xff] %vm502_vm1, %v1213_v32 }
 0x4a2   : > { %1215 = vst.msk [vmem:[%s470_s29] sm:$0xff] %vm502_vm1, %v1211_v28  ;;  %v1212_v31 = vadd.f32 %v1208_v13, %v1204_v23 }
 0x4a3   : > { %1218 = vst.msk [vmem:[%s470_s29 + $0x18] sm:$0xff] %vm502_vm1, %v1214_v33 }
 0x4a4   : > { %1216 = vst.msk [vmem:[%s470_s29 + $0x8] sm:$0xff] %vm502_vm1, %v1212_v31 }
 0x4a5 PF: > { %p1528_p5 = scmp.ge.s32.totalorder %s1626_s24, 2  ;;  %s1265_s28 = sand.u32 1, %s1614_s21  }
 0x4a6   : > { %s1266_s18 = scalar_lea.sflag [#allocation3], %s1265_s28 }
 0x4a7   : > { %p1525_p1 = pnand %p1528_p5, %p1739_p6 }
 0x4a9   : > { %1609 = dma.done.wait (!%p1525_p1), %s1266_s18, 512  }
 0x4aa   : > { %1611 = vsyncadd (!%p1525_p1), %s1266_s18, 4294966784  ;;  %p23_p2 = scmp.ge.s32.totalorder %s1722_s27, 4   ;;  %s1985_s21 = smov %s1618_s22 }
 0x4ab   : > { %s1986_s22 = smov %s1622_s23  ;;  %s1987_s23 = smov %s1733_s30 }
 0x4ac   : > { %s1988_s24 = smov %s1722_s27  ;;  %25 = sbr.rel (!%p23_p2) target bundleno = 6 (0x6), region = 117 }
 0x4b3   :  { %1271 = vsyncpa [#allocation3], 1 }
 0x4b4   :  { %1273 = vsyncpa [#allocation3 + $0x1], 1 }

// kernel: _lambda_.15
= control target key start
LH: loop header
LB: loop body
LE: loop exit
PB: predicated region body
PF: predicated region fallthrough
CT: control target
= control target key end

     0   :  { %s2014_s18 = smov 0   ;;  %s2353_s0 = inlined_call_operand.vmem [shape: f32[64,8], index: 0, kind: input, shape index: {}]   ;;  %s2354_s1 = inlined_call_operand.vmem [shape: f32[64,16], index: 1, kind: input, shape index: {}]   ;;  %s2355_s2 = inlined_call_operand.vmem [shape: f32[16,32], index: 2, kind: input, shape index: {}]   ;;  %s2356_s3 = inlined_call_operand.vmem [shape: f32[1,32], index: 3, kind: input, shape index: {}, may-alias: {3,7,11}]   ;;  %s2357_s4 = inlined_call_operand.vmem [shape: f32[32,8], index: 4, kind: input, shape index: {}]   ;;  %s2358_s5 = inlined_call_operand.vmem [shape: f32[1,8], index: 5, kind: input, shape index: {}, may-alias: {5,9,13}]   ;;  %s2359_s6 = inlined_call_operand.vmem [shape: f32[24,32], index: 6, kind: input, shape index: {}]   ;;  %s2360_s7 = inlined_call_operand.vmem [shape: f32[1,32], index: 7, kind: input, shape index: {}, may-alias: {3,7,11}]   ;;  %s2361_s8 = inlined_call_operand.vmem [shape: f32[32,8], index: 8, kind: input, shape index: {}]   ;;  %s2362_s9 = inlined_call_operand.vmem [shape: f32[1,8], index: 9, kind: input, shape index: {}, may-alias: {5,9,13}]   ;;  %s2363_s10 = inlined_call_operand.vmem [shape: f32[16,32], index: 10, kind: input, shape index: {}]   ;;  %s2364_s11 = inlined_call_operand.vmem [shape: f32[1,32], index: 11, kind: input, shape index: {}, may-alias: {3,7,11}]   ;;  %s2365_s12 = inlined_call_operand.vmem [shape: f32[32,8], index: 12, kind: input, shape index: {}]   ;;  %s2366_s13 = inlined_call_operand.vmem [shape: f32[1,8], index: 13, kind: input, shape index: {}, may-alias: {5,9,13}]   ;;  %s2367_s14 = inlined_call_operand.vmem [shape: f32[64,8], index: 14, kind: output, shape index: {0}]   ;;  %s2368_s15 = inlined_call_operand.vmem [shape: f32[64,16], index: 15, kind: output, shape index: {1}]  }
   0x1 LB: > { %s1683_s19 = sadd.s32 4294967295, %s1930_s18   ;;  %p1687_p0 = scmp.ge.s32.totalorder %s1930_s18, 1  ;;  %s1930_s18 = sphi %s2014_s18, %s26_s18  }
   0x2   : > { %p452_p1 = scmp.lt.s32.totalorder %s1930_s18, 3 }
   0x4   : > { %p453_p2 = pnand %p1687_p0, %p452_p1 }
   0x5   : > { %v543_v0 = vld [vmem:[%s2359_s6] sm:$0xff] (!%p453_p2)  ;;  %vm570_vm0 = vcmask (!%p453_p2), 1043456   ;;  %s1688_s22 = sshll.u32 (!%p453_p2), %s1683_s19, 2  ;;  %v624_v2 = vld [vmem:[%s2355_s2 + $0x8] sm:$0xff] (!%p453_p2)  ;;  %vm563_vm1 = vcmask (!%p453_p2), 64512   ;;  %v628_v24 = vld [vmem:[%s2357_s4 + $0x10] sm:$0xff] (!%p453_p2) }
   0x6   : > { %456 = sbr.rel (%p453_p2) target bundleno = 2054 (0x806), region = 76  ;;  %v623_v1 = vld [vmem:[%s2355_s2] sm:$0xff] (!%p453_p2)  ;;  %v562_v3 = vpack.c.bf16 (!%p453_p2), %v543_v0, %v543_v0  ;;  %p511_p3 = scmp.lt.s32.totalorder (!%p453_p2), %s1688_s22, 7  ;;  %v631_v5 = vpack.c.bf16 (!%p453_p2), %v624_v2, %v624_v2  ;;  %v627_v22 = vld [vmem:[%s2357_s4 + $0x8] sm:$0xff] (!%p453_p2)  ;;  %v629_v25 = vld [vmem:[%s2357_s4 + $0x18] sm:$0xff] (!%p453_p2)  ;;  %vm769_vm2 = vcmask (!%p453_p2), 261120  }
   0x7   : > { %v2031_v4 = vpack.c.bf16 (!%p453_p2), %v623_v1, %v623_v1  ;;  %v626_v21 = vld [vmem:[%s2357_s4] sm:$0xff] (!%p453_p2)  ;;  %v2101_v26 = vpack.c.bf16 (!%p453_p2), %v629_v25, %v628_v24  ;;  %v544_v27 = vld [vmem:[%s2359_s6 + $0x8] sm:$0xff] (!%p453_p2)  ;;  %v545_v28 = vld [vmem:[%s2359_s6 + $0x10] sm:$0xff] (!%p453_p2)  ;;  %s1932_s21 = smov (!%p453_p2), 120   ;;  %s1933_s16 = smov (!%p453_p2), 8   ;;  %vm1363_vm3 = vcmask (!%p453_p2), 130112  }
   0x8   : > { %1904 = vmatprep.subr.msk.bf16.mxu0 (!%p453_p2), %vm570_vm0, %v562_v3  ;;  %v572_v6 = vsel (!%p453_p2), %vm570_vm0, %v562_v3, 0  ;;  %1905 = vmatprep.subr.msk.bf16.mxu1 (!%p453_p2), %vm570_vm0, %v631_v5  ;;  %v633_v7 = vsel (!%p453_p2), %vm570_vm0, %v631_v5, 0  ;;  %v2091_v23 = vpack.c.bf16 (!%p453_p2), %v627_v22, %v626_v21  ;;  %v2111_v29 = vpack.c.bf16 (!%p453_p2), %v544_v27, %v544_v27  ;;  %v2150_v41 = vld [vmem:[%s2356_s3] ss:$0 sm:$0xff] (!%p453_p2)  ;;  %v549_v22 = vld [vmem:[%s2361_s8 + $0x10] sm:$0xff] (!%p453_p2) }
   0x9   : > { %1785 = vmatpush3.bf16.msra.mxu0 (!%p453_p2), %v572_v6  ;;  %1791 = vmatpush3.bf16.msra.mxu1 (!%p453_p2), %v633_v7  ;;  %v2067_v16 = vsel (!%p453_p2), %vm570_vm0, %v2031_v4, 0  ;;  %v2113_v30 = vpack.c.bf16 (!%p453_p2), %v545_v28, %v545_v28  ;;  %v2166_v60 = vld [vmem:[%s2358_s5] ss:$0 sm:$0xff] (!%p453_p2) }
   0xa   : > { %1906 = vmatprep.subr.msk.bf16.mxu0 (!%p453_p2), %vm570_vm0, %v2031_v4  ;;  %1802 = vmatprep.subr.bf16.mxu1 (!%p453_p2), %v2091_v23  ;;  %v2119_v31 = vsel (!%p453_p2), %vm570_vm0, %v2111_v29, 0  ;;  %v2203_v25 = vld [vmem:[%s2360_s7] ss:$0 sm:$0xff] (!%p453_p2) }
   0xb   : > { %v2126_v32 = vsel (!%p453_p2), %vm570_vm0, %v2113_v30, 0 }
   0xd   : > { %s2370_s22 = smov (!%p511_p3, %s1688_s22), 7 }
   0xe   : > { %s2037_s27 = sshll.u32 %s2370_s22, 3 }
   0xf   : > { %s514_s30 = scalar_lea.vmem %s2353_s0, %s2037_s27  ;;  %s520_s19 = scalar_lea.vmem %s2354_s1, %s2037_s27 }
  0x10   : > { %v2045_v8 = vld [vmem:[%s514_s30] sm:$0xff]  ;;  %v2047_v9 = vld [vmem:[%s514_s30 + $0x8] sm:$0xff]  ;;  %v2049_v10 = vld [vmem:[%s514_s30 + $0x10] sm:$0xff]  ;;  %s2235_s25 = scalar_lea.vmem %s2368_s15, %s2037_s27 }
  0x11   : > { %v2057_v11 = vpack.c.bf16 %v2047_v9, %v2045_v8  ;;  %v2059_v12 = vld [vmem:[%s514_s30 + $0x18] sm:$0xff]  ;;  %v539_v13 = vld [vmem:[%s520_s19] sm:$0xff]  ;;  %v540_v14 = vld [vmem:[%s520_s19 + $0x8] sm:$0xff] }
  0x12   : > { %v2063_v15 = vpack.c.bf16 %v2059_v12, %v2049_v10  ;;  %v2069_v17 = vpack.c.bf16 %v540_v14, %v539_v13  ;;  %v541_v18 = vld [vmem:[%s520_s19 + $0x10] sm:$0xff]  ;;  %v542_v19 = vld [vmem:[%s520_s19 + $0x18] sm:$0xff]  ;;  %s526_s19 = scalar_lea.vmem %s2367_s14, %s2037_s27 }
  0x13   : > { %1786 = vmatprep.mubr.msk.bf16.mxu0 %vm563_vm1, %v2057_v11  ;;  %1792 = vmatprep.mubr.msk.bf16.mxu1 %vm563_vm1, %v2057_v11  ;;  %v685_v20 = vpack.c.bf16 %v542_v19, %v541_v18  ;;  %v547_v19 = vld [vmem:[%s2361_s8] sm:$0xff] }
  0x14   : > { %1787 = vmatmul.mubr.msk.bf16.vlgmr.msra.gmra.mrb[0].mxu0 %vm563_vm1, %v2063_v15  ;;  %1793 = vmatmul.mubr.msk.bf16.vlgmr.msra.gmra.mrb[0].mxu1 %vm563_vm1, %v2063_v15 }
  0x15   : > { %1797 = vmatpush3.bf16.msra.mxu0 %v2067_v16  ;;  %1798 = vmatprep.mubr.msk.bf16.mxu0 %vm563_vm1, %v2069_v17 }
  0x16   : > { %1803 = vmatpush3.bf16.msra.mxu1 %v2091_v23  ;;  %1907 = vmatprep.subr.msk.bf16.mxu0 %vm570_vm0, %v2111_v29 }
  0x17   : > { %1804 = vmatprep.subr.bf16.mxu1 %v2101_v26  ;;  %1040 = vrot.lane.b32.xlu0 %v2069_v17, %s1932_s21 }
  0x1a   : > { %1805 = vmatpush3.bf16.msra.mxu1 %v2101_v26 }
  0x1b   : > { %1042 = vrot.lane.b32.xlu0 %v685_v20, %s1932_s21 }
  0x1c   : > { %1799 = vmatmul.mubr.msk.bf16.vlgmr.msra.gmra.mrb[4].mxu0 %vm563_vm1, %v685_v20 }
  0x1d   : > { %1812 = vmatprep.mubr.msk.bf16.mxu0 %vm563_vm1, %v2069_v17  ;;  %1811 = vmatpush3.bf16.msra.mxu0 %v2119_v31 }
  0x1e   : > { %1908 = vmatprep.subr.msk.bf16.mxu0 %vm570_vm0, %v2113_v30 }
  0x24   : > { %1813 = vmatmul.mubr.msk.bf16.vlgmr.msra.gmra.mrb[8].mxu0 %vm563_vm1, %v685_v20  ;;  %v548_v20 = vld [vmem:[%s2361_s8 + $0x8] sm:$0xff] }
  0x25   : > { %1817 = vmatpush3.bf16.msra.mxu0 %v2126_v32  ;;  %v2183_v21 = vpack.c.bf16 %v548_v20, %v547_v19 }
  0x26   : > { %1836 = vmatprep.subr.bf16.mxu0 %v2091_v23 }
  0x27   : > { %1822 = vmatprep.subr.bf16.mxu1 %v2183_v21 }
  0xe7   : > { %v2131_v33 = vpop.f32.mrb[0].mxu0  ;;  %v2133_v34 = vpop.f32.mrb[0].mxu1 }
  0xe8   : > { %v2135_v35 = vpop.f32.mrb[1].mxu0  ;;  %v2137_v36 = vpop.f32.mrb[1].mxu1 }
  0xe9   : > { %v2139_v37 = vpop.f32.mrb[2].mxu0  ;;  %v2141_v38 = vpop.f32.mrb[2].mxu1 }
  0xea   : > { %v2143_v39 = vpop.f32.mrb[3].mxu0  ;;  %v2145_v40 = vpop.f32.mrb[3].mxu1 }
  0xef   : > { %v1800_v42 = vpop.f32.mrb[4].mxu0 }
  0xf0   : > { %v739_v43 = vadd.f32 %v1800_v42, %v2133_v34  ;;  %v730_v44 = vpop.f32.mrb[5].mxu0 }
  0xf1   : > { %v731_v45 = vadd.f32 %v730_v44, %v2137_v36  ;;  %v1801_v46 = vpop.f32.mrb[6].mxu0 }
  0xf2   : > { %v753_v47 = vadd.f32 %v2150_v41, %v739_v43  ;;  %v742_v48 = vadd.f32 %v1801_v46, %v2141_v38  ;;  %v733_v49 = vpop.f32.mrb[7].mxu0 }
  0xf3   : > { %v751_v50 = vadd.f32 %v2150_v41, %v731_v45  ;;  %v734_v51 = vadd.f32 %v733_v49, %v2145_v40 }
  0xf4   : > { %v754_v52 = vadd.f32 %v2150_v41, %v742_v48  ;;  %v757_v54 = vmax.f32 %v753_v47, 0.0 }
  0xf5   : > { %v752_v53 = vadd.f32 %v2150_v41, %v734_v51  ;;  %v755_v56 = vmax.f32 %v751_v50, 0.0 }
  0xf6   : > { %v758_v55 = vmax.f32 %v754_v52, 0.0 }
  0xf7   : > { %v756_v57 = vmax.f32 %v752_v53, 0.0 }
  0xf8   : > { %v760_v58 = vpack.c.bf16 %v758_v55, %v757_v54 }
  0xf9   : > { %v759_v59 = vpack.c.bf16 %v756_v57, %v755_v56  ;;  %v1041_v56 = vpop.permute.xlu0 %1040 }
  0xfb   : > { %1806 = vmatprep.mubr.msk.bf16.mxu1 %vm769_vm2, %v759_v59 }
  0xfc   : > { %1807 = vmatmul.mubr.msk.bf16.vlgmr.msra.gmra.mrb[4].mxu1 %vm769_vm2, %v760_v58 }
  0xfd   : > { %1823 = vmatpush3.bf16.msra.mxu1 %v2183_v21  ;;  %v1043_v57 = vpop.permute.xlu0 %1042 }
 0x1cf   : > { %v1808_v61 = vpop.f32.mrb[4].mxu1 }
 0x1d0   : > { %v819_v62 = vadd.f32 %v1808_v61, %v2166_v60  ;;  %v810_v63 = vpop.f32.mrb[5].mxu1 }
 0x1d1   : > { %v811_v0 = vadd.f32 %v2166_v60, %v810_v63  ;;  %v1809_v1 = vpop.f32.mrb[6].mxu1 }
 0x1d2   : > { %v822_v2 = vadd.f32 %v1809_v1, %v2166_v60  ;;  %v813_v3 = vpop.f32.mrb[7].mxu1  ;;  %v827_v6 = vmax.f32 %v819_v62, 0.0 }
 0x1d3   : > { %v814_v5 = vadd.f32 %v2166_v60, %v813_v3  ;;  %v825_v13 = vmax.f32 %v811_v0, 0.0 }
 0x1d4   : > { %v828_v7 = vmax.f32 %v822_v2, 0.0 }
 0x1d5   : > { %v826_v14 = vmax.f32 %v814_v5, 0.0 }
 0x1d6   : > { %v887_v17 = vpack.c.bf16 %v828_v7, %v827_v6 }
 0x1d7   : > { %v886_v18 = vpack.c.bf16 %v826_v14, %v825_v13 }
 0x1d9   : > { %1818 = vmatprep.mubr.msk.bf16.mxu0 %vm563_vm1, %v886_v18 }
 0x1da   : > { %1819 = vmatmul.mubr.msk.bf16.vlgmr.msra.gmra.mrb[8].mxu0 %vm563_vm1, %v887_v17 }
 0x1db   : > { %1837 = vmatpush3.bf16.msra.mxu0 %v2091_v23  ;;  %v550_v23 = vld [vmem:[%s2361_s8 + $0x18] sm:$0xff] }
 0x1dc   : > { %1838 = vmatprep.subr.bf16.mxu0 %v2101_v26  ;;  %v2194_v24 = vpack.c.bf16 %v550_v23, %v549_v22 }
 0x1de   : > { %1824 = vmatprep.subr.bf16.mxu1 %v2194_v24 }
 0x1df   : > { %1839 = vmatpush3.bf16.msra.mxu0 %v2101_v26  ;;  %1825 = vmatpush3.bf16.msra.mxu1 %v2194_v24 }
 0x1e0   : > { %1856 = vmatprep.subr.bf16.mxu0 %v2183_v21  ;;  %1909 = vmatprep.subr.msk.bf16.mxu1 %vm570_vm0, %v2031_v4 }
 0x2ad   : > { %v1820_v26 = vpop.f32.mrb[8].mxu0 }
 0x2ae   : > { %v1884_v27 = vadd.f32 %v1820_v26, %v2131_v33  ;;  %v932_v28 = vpop.f32.mrb[9].mxu0 }
 0x2af   : > { %v1885_v42 = vadd.f32 %v932_v28, %v2135_v35  ;;  %v1821_v43 = vpop.f32.mrb[10].mxu0 }
 0x2b0   : > { %v959_v44 = vadd.f32 %v1884_v27, %v2203_v25  ;;  %v1886_v45 = vadd.f32 %v1821_v43, %v2139_v37  ;;  %v935_v46 = vpop.f32.mrb[11].mxu0 }
 0x2b1   : > { %v957_v47 = vadd.f32 %v1885_v42, %v2203_v25  ;;  %v1887_v4 = vadd.f32 %v935_v46, %v2143_v39 }
 0x2b2   : > { %v960_v48 = vadd.f32 %v1886_v45, %v2203_v25  ;;  %v963_v50 = vmax.f32 %v959_v44, 0.0 }
 0x2b3   : > { %v958_v49 = vadd.f32 %v1887_v4, %v2203_v25  ;;  %v961_v52 = vmax.f32 %v957_v47, 0.0 }
 0x2b4   : > { %v964_v51 = vmax.f32 %v960_v48, 0.0 }
 0x2b5   : > { %v962_v53 = vmax.f32 %v958_v49, 0.0 }
 0x2b6   : > { %v966_v54 = vpack.c.bf16 %v964_v51, %v963_v50 }
 0x2b7   : > { %v965_v55 = vpack.c.bf16 %v962_v53, %v961_v52 }
 0x2b9   : > { %1826 = vmatprep.mubr.msk.bf16.mxu1 %vm769_vm2, %v965_v55 }
 0x2ba   : > { %1827 = vmatmul.mubr.msk.bf16.vlgmr.msra.gmra.mrb[8].mxu1 %vm769_vm2, %v966_v54 }
 0x2bb   : > { %1831 = vmatpush3.bf16.msra.mxu1 %v2067_v16  ;;  %1832 = vmatprep.mubr.msk.bf16.mxu1 %vm563_vm1, %v1041_v56  ;;  %v2229_v16 = vld [vmem:[%s2362_s9] ss:$0 sm:$0xff] }
 0x2bc   : > { %1910 = vmatprep.subr.msk.bf16.mxu1 %vm570_vm0, %v2111_v29 }
 0x2c2   : > { %1833 = vmatmul.mubr.msk.bf16.vlgmr.msra.gmra.mrb[12].mxu1 %vm563_vm1, %v1043_v57 }
 0x2c3   : > { %1846 = vmatprep.mubr.msk.bf16.mxu1 %vm563_vm1, %v1041_v56  ;;  %1845 = vmatpush3.bf16.msra.mxu1 %v2119_v31 }
 0x2c4   : > { %1911 = vmatprep.subr.msk.bf16.mxu1 %vm570_vm0, %v2113_v30 }
 0x2ca   : > { %1847 = vmatmul.mubr.msk.bf16.vlgmr.msra.gmra.mrb[16].mxu1 %vm563_vm1, %v1043_v57 }
 0x2cb   : > { %1851 = vmatpush3.bf16.msra.mxu1 %v2126_v32 }
 0x38d   : > { %v1828_v29 = vpop.f32.mrb[8].mxu1 }
 0x38e   : > { %v1015_v30 = vpop.f32.mrb[9].mxu1  ;;  %v2247_v61 = vadd.f32 %v1828_v29, %v2229_v16 }
 0x38f   : > { %v2238_v31 = vadd.f32 %v2229_v16, %v1015_v30  ;;  %v1829_v32 = vpop.f32.mrb[10].mxu1 }
 0x390   : > { %v1018_v58 = vpop.f32.mrb[11].mxu1  ;;  %v2250_v62 = vadd.f32 %v1829_v32, %v2229_v16  ;;  %1032 = vst.msk [vmem:[%s2235_s25 + $0x10] sm:$0xff] %vm563_vm1, %v2247_v61 }
 0x391   : > { %1030 = vst.msk [vmem:[%s2235_s25] sm:$0xff] %vm563_vm1, %v2238_v31  ;;  %v2244_v59 = vadd.f32 %v2229_v16, %v1018_v58 }
 0x392   : > { %1033 = vst.msk [vmem:[%s2235_s25 + $0x18] sm:$0xff] %vm563_vm1, %v2250_v62 }
 0x393   : > { %1031 = vst.msk [vmem:[%s2235_s25 + $0x8] sm:$0xff] %vm563_vm1, %v2244_v59 }
 0x395   : > { %v1834_v63 = vpop.f32.mrb[12].mxu1 }
 0x396   : > { %v1093_v0 = vadd.f32 %v1834_v63, %v2133_v34  ;;  %v1084_v1 = vpop.f32.mrb[13].mxu1 }
 0x397   : > { %v1085_v2 = vadd.f32 %v1084_v1, %v2137_v36  ;;  %v1835_v3 = vpop.f32.mrb[14].mxu1 }
 0x398   : > { %v1101_v5 = vadd.f32 %v2150_v41, %v1093_v0  ;;  %v1096_v6 = vadd.f32 %v1835_v3, %v2141_v38  ;;  %v1087_v7 = vpop.f32.mrb[15].mxu1 }
 0x399   : > { %v1099_v13 = vadd.f32 %v2150_v41, %v1085_v2  ;;  %v1088_v14 = vadd.f32 %v1087_v7, %v2145_v40 }
 0x39a   : > { %v1102_v17 = vadd.f32 %v2150_v41, %v1096_v6  ;;  %v1105_v19 = vmax.f32 %v1101_v5, 0.0 }
 0x39b   : > { %v1100_v18 = vadd.f32 %v2150_v41, %v1088_v14  ;;  %v1103_v34 = vmax.f32 %v1099_v13, 0.0 }
 0x39c   : > { %v1106_v20 = vmax.f32 %v1102_v17, 0.0 }
 0x39d   : > { %v1104_v22 = vmax.f32 %v1100_v18, 0.0 }
 0x39e   : > { %v1108_v23 = vpack.c.bf16 %v1106_v20, %v1105_v19 }
 0x39f   : > { %v1107_v36 = vpack.c.bf16 %v1104_v22, %v1103_v34 }
 0x3a1   : > { %1840 = vmatprep.mubr.msk.bf16.mxu0 %vm769_vm2, %v1107_v36 }
 0x3a2   : > { %1841 = vmatmul.mubr.msk.bf16.vlgmr.msra.gmra.mrb[12].mxu0 %vm769_vm2, %v1108_v23 }
 0x3a3   : > { %1857 = vmatpush3.bf16.msra.mxu0 %v2183_v21 }
 0x3a4   : > { %1858 = vmatprep.subr.bf16.mxu0 %v2194_v24 }
 0x3a7   : > { %1859 = vmatpush3.bf16.msra.mxu0 %v2194_v24 }
 0x475   : > { %v1842_v38 = vpop.f32.mrb[12].mxu0 }
 0x476   : > { %v1158_v40 = vadd.f32 %v1842_v38, %v2166_v60  ;;  %v1149_v41 = vpop.f32.mrb[13].mxu0 }
 0x477   : > { %v1150_v26 = vadd.f32 %v2166_v60, %v1149_v41  ;;  %v1843_v27 = vpop.f32.mrb[14].mxu0  ;;  %v1728_v41 = vld [vmem:[%s2364_s11] ss:$0 sm:$0xff] }
 0x478   : > { %v1161_v28 = vadd.f32 %v1843_v27, %v2166_v60  ;;  %v1152_v42 = vpop.f32.mrb[15].mxu0  ;;  %v1166_v44 = vmax.f32 %v1158_v40, 0.0 }
 0x479   : > { %v1153_v43 = vadd.f32 %v2166_v60, %v1152_v42  ;;  %v1164_v46 = vmax.f32 %v1150_v26, 0.0 }
 0x47a   : > { %v1167_v45 = vmax.f32 %v1161_v28, 0.0 }
 0x47b   : > { %v1165_v21 = vmax.f32 %v1153_v43, 0.0 }
 0x47c   : > { %v1222_v47 = vpack.c.bf16 %v1167_v45, %v1166_v44 }
 0x47d   : > { %v1221_v4 = vpack.c.bf16 %v1165_v21, %v1164_v46 }
 0x47f   : > { %1852 = vmatprep.mubr.msk.bf16.mxu1 %vm563_vm1, %v1221_v4 }
 0x480   : > { %1853 = vmatmul.mubr.msk.bf16.vlgmr.msra.gmra.mrb[16].mxu1 %vm563_vm1, %v1222_v47 }
 0x553   : > { %v1854_v24 = vpop.f32.mrb[16].mxu1 }
 0x554   : > { %v1888_v48 = vadd.f32 %v1854_v24, %v2131_v33  ;;  %v1263_v49 = vpop.f32.mrb[17].mxu1 }
 0x555   : > { %v1889_v50 = vadd.f32 %v1263_v49, %v2135_v35  ;;  %v1855_v51 = vpop.f32.mrb[18].mxu1 }
 0x556   : > { %v1284_v52 = vadd.f32 %v1888_v48, %v2203_v25  ;;  %v1890_v60 = vadd.f32 %v1855_v51, %v2139_v37  ;;  %v1266_v53 = vpop.f32.mrb[19].mxu1  ;;  %v553_v37 = vld [vmem:[%s2363_s10 + $0x8] sm:$0xff] }
 0x557   : > { %v1282_v54 = vadd.f32 %v1889_v50, %v2203_v25  ;;  %v1891_v55 = vadd.f32 %v1266_v53, %v2143_v39  ;;  %v1375_v63 = vpack.c.bf16 %v553_v37, %v553_v37  ;;  %v1729_v50 = vld [vmem:[%s2366_s13] ss:$0 sm:$0xff]  ;;  %v1568_v37 = vmul.f32 0.5, %v2059_v12 }
 0x558   : > { %v1285_v56 = vadd.f32 %v1890_v60, %v2203_v25  ;;  %v1288_v29 = vmax.f32 %v1284_v52, 0.0 }
 0x559   : > { %v1283_v57 = vadd.f32 %v1891_v55, %v2203_v25  ;;  %v1286_v33 = vmax.f32 %v1282_v54, 0.0  ;;  %1912 = vmatprep.subr.msk.bf16.mxu0 %vm570_vm0, %v1375_v63  ;;  %v1383_v39 = vsel %vm570_vm0, %v1375_v63, 0  ;;  %v552_v25 = vld [vmem:[%s2363_s10] sm:$0xff]  ;;  %v1565_v54 = vmul.f32 0.5, %v2045_v8 }
 0x55a   : > { %v1289_v30 = vmax.f32 %v1285_v56, 0.0  ;;  %v1372_v0 = vpack.c.bf16 %v552_v25, %v552_v25 }
 0x55b   : > { %v1287_v32 = vmax.f32 %v1283_v57, 0.0 }
 0x55c   : > { %v1291_v58 = vpack.c.bf16 %v1289_v30, %v1288_v29  ;;  %v1435_v23 = vsel %vm570_vm0, %v1372_v0, 0 }
 0x55d   : > { %v1290_v35 = vpack.c.bf16 %v1287_v32, %v1286_v33  ;;  %v1566_v33 = vmul.f32 0.5, %v2047_v9  ;;  %v1567_v32 = vmul.f32 0.5, %v2049_v10 }
 0x55f   : > { %1860 = vmatprep.mubr.msk.bf16.mxu0 %vm769_vm2, %v1290_v35 }
 0x560   : > { %1861 = vmatmul.mubr.msk.bf16.vlgmr.msra.gmra.mrb[16].mxu0 %vm769_vm2, %v1291_v58 }
 0x561   : > { %1865 = vmatpush3.bf16.msra.mxu0 %v1383_v39 }
 0x562   : > { %1913 = vmatprep.subr.msk.bf16.mxu0 %vm570_vm0, %v1372_v0 }
 0x633   : > { %v1862_v1 = vpop.f32.mrb[16].mxu0 }
 0x634   : > { %v1341_v2 = vadd.f32 %v1862_v1, %v2229_v16  ;;  %v1332_v3 = vpop.f32.mrb[17].mxu0 }
 0x635   : > { %v1333_v5 = vadd.f32 %v2229_v16, %v1332_v3  ;;  %v1863_v6 = vpop.f32.mrb[18].mxu0 }
 0x636   : > { %v1344_v7 = vadd.f32 %v1863_v6, %v2229_v16  ;;  %1355 = vrot.lane.b32.xlu0 %v1341_v2, %s1933_s16  ;;  %v1335_v13 = vpop.f32.mrb[19].mxu0  ;;  %v1370_v17 = vadd.f32 %v1341_v2, %v2247_v61 }
 0x637   : > { %v1336_v14 = vadd.f32 %v2229_v16, %v1335_v13  ;;  %1351 = vrot.lane.b32.xlu1 %v1333_v5, %s1933_s16  ;;  %v1368_v19 = vadd.f32 %v1333_v5, %v2238_v31  ;;  %v555_v16 = vld [vmem:[%s2365_s12] sm:$0xff]  ;;  %v556_v31 = vld [vmem:[%s2365_s12 + $0x8] sm:$0xff] }
 0x638   : > { %v1371_v18 = vadd.f32 %v1344_v7, %v2250_v62 }
 0x639   : > { %v1369_v20 = vadd.f32 %v1336_v14, %v2244_v59  ;;  %v1502_v59 = vpack.c.bf16 %v556_v31, %v555_v16 }
 0x63a   : > { %v1374_v34 = vpack.c.bf16 %v1371_v18, %v1370_v17 }
 0x63b   : > { %v1373_v22 = vpack.c.bf16 %v1369_v20, %v1368_v19  ;;  %1353 = vrot.lane.b32.xlu1 %v1336_v14, %s1933_s16  ;;  %1876 = vmatprep.subr.bf16.mxu1 %v1502_v59 }
 0x63c   : > { %1877 = vmatpush3.bf16.msra.mxu1 %v1502_v59 }
 0x63d   : > { %1866 = vmatprep.mubr.msk.bf16.mxu0 %vm563_vm1, %v1373_v22 }
 0x63e   : > { %1867 = vmatmul.mubr.msk.bf16.vlgmr.msra.gmra.mrb[20].mxu0 %vm563_vm1, %v1374_v34 }
 0x63f   : > { %1871 = vmatpush3.bf16.msra.mxu0 %v1435_v23  ;;  %1357 = vrot.lane.b32.xlu1 %v1344_v7, %s1933_s16 }
 0x640   : > { %1872 = vmatprep.mubr.msk.bf16.mxu0 %vm563_vm1, %v2057_v11  ;;  %v557_v11 = vld [vmem:[%s2365_s12 + $0x10] sm:$0xff] }
 0x64a   : > { %1873 = vmatmul.mubr.msk.bf16.vlgmr.msra.gmra.mrb[20].mxu0 %vm563_vm1, %v2063_v15  ;;  %v558_v15 = vld [vmem:[%s2365_s12 + $0x18] sm:$0xff] }
 0x64b   : > { %v1503_v61 = vpack.c.bf16 %v558_v15, %v557_v11 }
 0x64d   : > { %1878 = vmatprep.subr.bf16.mxu1 %v1503_v61 }
 0x64e   : > { %1879 = vmatpush3.bf16.msra.mxu1 %v1503_v61 }
 0x6a8   : > { %v1356_v38 = vpop.permute.xlu0 %1355 }
 0x6a9   : > { %v1352_v62 = vpop.permute.xlu1 %1351  ;;  %1366 = vst.msk [vmem:[%s2235_s25 + $0x10] sm:$0xff] %vm1363_vm3, %v1356_v38 }
 0x6aa   : > { %1364 = vst.msk [vmem:[%s2235_s25] sm:$0xff] %vm1363_vm3, %v1352_v62 }
 0x6ad   : > { %v1354_v36 = vpop.permute.xlu1 %1353 }
 0x6ae   : > { %1365 = vst.msk [vmem:[%s2235_s25 + $0x8] sm:$0xff] %vm1363_vm3, %v1354_v36 }
 0x6b1   : > { %v1358_v40 = vpop.permute.xlu1 %1357 }
 0x6b2   : > { %1367 = vst.msk [vmem:[%s2235_s25 + $0x18] sm:$0xff] %vm1363_vm3, %v1358_v40 }
 0x71d   : > { %v1874_v26 = vpop.f32.mrb[20].mxu0 }
 0x71e   : > { %v1494_v27 = vadd.f32 %v1874_v26, %v1728_v41  ;;  %v1471_v28 = vpop.f32.mrb[21].mxu0 }
 0x71f   : > { %v1492_v42 = vadd.f32 %v1728_v41, %v1471_v28  ;;  %v1875_v43 = vpop.f32.mrb[22].mxu0 }
 0x720   : > { %v1495_v44 = vadd.f32 %v1875_v43, %v1728_v41  ;;  %v1474_v45 = vpop.f32.mrb[23].mxu0  ;;  %v1498_v21 = vmax.f32 %v1494_v27, 0.0 }
 0x721   : > { %v1493_v46 = vadd.f32 %v1728_v41, %v1474_v45  ;;  %v1496_v4 = vmax.f32 %v1492_v42, 0.0 }
 0x722   : > { %v1499_v47 = vmax.f32 %v1495_v44, 0.0 }
 0x723   : > { %v1497_v24 = vmax.f32 %v1493_v46, 0.0 }
 0x724   : > { %v1501_v48 = vpack.c.bf16 %v1499_v47, %v1498_v21 }
 0x725   : > { %v1500_v49 = vpack.c.bf16 %v1497_v24, %v1496_v4 }
 0x727   : > { %1880 = vmatprep.mubr.msk.bf16.mxu1 %vm769_vm2, %v1500_v49 }
 0x728   : > { %1881 = vmatmul.mubr.msk.bf16.vlgmr.msra.gmra.mrb[20].mxu1 %vm769_vm2, %v1501_v48 }
 0x7fb   : > { %v1882_v51 = vpop.f32.mrb[20].mxu1 }
 0x7fc   : > { %v1559_v52 = vadd.f32 %v1882_v51, %v1729_v50  ;;  %v1550_v60 = vpop.f32.mrb[21].mxu1 }
 0x7fd   : > { %v1551_v53 = vadd.f32 %v1729_v50, %v1550_v60  ;;  %v1883_v55 = vpop.f32.mrb[22].mxu1 }
 0x7fe   : > { %v1562_v56 = vadd.f32 %v1883_v55, %v1729_v50  ;;  %v1553_v57 = vpop.f32.mrb[23].mxu1  ;;  %v1571_v58 = vmul.f32 0.5, %v1559_v52 }
 0x7ff   : > { %v1569_v29 = vmul.f32 0.5, %v1551_v53  ;;  %v1554_v30 = vadd.f32 %v1729_v50, %v1553_v57 }
 0x800   : > { %v1572_v63 = vmul.f32 0.5, %v1562_v56  ;;  %v1575_v25 = vadd.f32 %v1571_v58, %v1567_v32 }
 0x801   : > { %v1573_v35 = vadd.f32 %v1569_v29, %v1565_v54  ;;  %v1570_v39 = vmul.f32 0.5, %v1554_v30 }
 0x802   : > { %v1576_v0 = vadd.f32 %v1572_v63, %v1568_v37  ;;  %1579 = vst.msk [vmem:[%s526_s19 + $0x10] sm:$0xff] %vm563_vm1, %v1575_v25 }
 0x803   : > { %1577 = vst.msk [vmem:[%s526_s19] sm:$0xff] %vm563_vm1, %v1573_v35  ;;  %v1574_v8 = vadd.f32 %v1570_v39, %v1566_v33 }
 0x804   : > { %1580 = vst.msk [vmem:[%s526_s19 + $0x18] sm:$0xff] %vm563_vm1, %v1576_v0 }
 0x805   : > { %1578 = vst.msk [vmem:[%s526_s19 + $0x8] sm:$0xff] %vm563_vm1, %v1574_v8 }
 0x806 PF: > { %s26_s18 = sadd.s32 1, %s1930_s18  }
 0x807   : > { %p23_p4 = scmp.ge.s32.totalorder %s26_s18, 4  }
 0x809   :  { %25 = sbr.rel (!%p23_p4) target bundleno = 1 (0x1), region = 121 }

// kernel: _lambda_.17
= control target key start
LH: loop header
LB: loop body
LE: loop exit
PB: predicated region body
PF: predicated region fallthrough
CT: control target
= control target key end

     0   :  { %s530_s12 = smov 0   ;;  %s627_s0 = inlined_call_operand.vmem [shape: f32[64,8], index: 0, kind: input, shape index: {}, may-alias: {0,1}]   ;;  %s628_s1 = inlined_call_operand.vmem [shape: f32[64,8], index: 1, kind: input, shape index: {}, may-alias: {0,1}]   ;;  %s629_s2 = inlined_call_operand.vmem [shape: f32[1,64], index: 2, kind: input, shape index: {}]   ;;  %s630_s3 = inlined_call_operand.vmem [shape: f32[64,64], index: 3, kind: output, shape index: {}]  }
   0x1 LB: > { %s404_s13 = sadd.s32 4294967295, %s508_s12   ;;  %p408_p0 = scmp.ge.s32.totalorder %s508_s12, 1  ;;  %s508_s12 = sphi %s530_s12, %s13_s12  }
   0x2   : > { %p138_p1 = scmp.lt.s32.totalorder %s508_s12, 3 }
   0x4   : > { %p139_p2 = pnand %p408_p0, %p138_p1 }
   0x5   : > { %v178_v0 = vld [vmem:[%s628_s1] sm:$0xff] (!%p139_p2)  ;;  %v179_v1 = vld [vmem:[%s628_s1 + $0x8] sm:$0xff] (!%p139_p2)  ;;  %vm190_vm0 = vcmask (!%p139_p2), 64512   ;;  %v180_v2 = vld [vmem:[%s628_s1 + $0x10] sm:$0xff] (!%p139_p2)  ;;  %s409_s20 = sshll.u32 (!%p139_p2), %s404_s13, 2  ;;  %vm343_vm2 = vcmask (!%p139_p2), 523264  }
   0x6   : > { %142 = sbr.rel (%p139_p2) target bundleno = 259 (0x103), region = 32  ;;  %v462_v3 = vpack.c.bf16 (!%p139_p2), %v179_v1, %v178_v0  ;;  %vm549_vm1 = vmpackc.low (!%p139_p2), %vm190_vm0, %vm190_vm0  ;;  %v181_v5 = vld [vmem:[%s628_s1 + $0x18] sm:$0xff] (!%p139_p2)  ;;  %p163_p3 = scmp.lt.s32.totalorder (!%p139_p2), %s409_s20, 7  ;;  %v182_v7 = vld [vmem:[%s628_s1 + $0x20] sm:$0xff] (!%p139_p2) }
   0x7   : > { %v468_v6 = vpack.c.bf16 (!%p139_p2), %v181_v5, %v180_v2  ;;  %v183_v8 = vld [vmem:[%s628_s1 + $0x28] sm:$0xff] (!%p139_p2)  ;;  %v184_v22 = vld [vmem:[%s628_s1 + $0x30] sm:$0xff] (!%p139_p2)  ;;  %v185_v23 = vld [vmem:[%s628_s1 + $0x38] sm:$0xff] (!%p139_p2) }
   0x8   : > { %464 = vmatprep.subr.msk.bf16.mxu0 (!%p139_p2), %vm549_vm1, %v462_v3  ;;  %486 = vmatprep.subr.msk.bf16.mxu1 (!%p139_p2), %vm549_vm1, %v462_v3  ;;  %v474_v16 = vpack.c.bf16 (!%p139_p2), %v183_v8, %v182_v7  ;;  %v480_v24 = vpack.c.bf16 (!%p139_p2), %v185_v23, %v184_v22  ;;  %v425_v28 = vld [vmem:[%s629_s2] ss:$0 sm:$0xff] (!%p139_p2) }
   0x9   : > { %467 = vmatpush3.bf16.xpose.msk.msra.mxu0 (!%p139_p2), %vm549_vm1, %v462_v3  ;;  %490 = vmatpush3.bf16.xpose.msk.msra.mxu1 (!%p139_p2), %vm549_vm1, %v462_v3 }
   0xa   : > { %470 = vmatprep.subr.msk.bf16.mxu0 (!%p139_p2), %vm549_vm1, %v468_v6  ;;  %487 = vmatprep.subr.msk.bf16.mxu1 (!%p139_p2), %vm549_vm1, %v468_v6 }
   0xd   : > { %s634_s20 = smov (!%p163_p3, %s409_s20), 7 }
   0xe   : > { %s410_s23 = sshll.u32 %s634_s20, 3 }
   0xf   : > { %s166_s30 = scalar_lea.vmem %s627_s0, %s410_s23  ;;  %s172_s13 = scalar_lea.vmem %s630_s3, %s410_s23 }
  0x10   : > { %v174_v9 = vld [vmem:[%s166_s30] sm:$0xff]  ;;  %v176_v10 = vld [vmem:[%s166_s30 + $0x10] sm:$0xff]  ;;  %v175_v11 = vld [vmem:[%s166_s30 + $0x8] sm:$0xff] }
  0x11   : > { %v186_v12 = vmul.f32 %v174_v9, %v174_v9  ;;  %456 = vmatprep.mubr.msk.f32.mxu0 %vm190_vm0, %v174_v9  ;;  %v188_v13 = vmul.f32 %v176_v10, %v176_v10  ;;  %459 = vmatprep.mubr.msk.f32.mxu1 %vm190_vm0, %v176_v10  ;;  %v177_v14 = vld [vmem:[%s166_s30 + $0x18] sm:$0xff]  ;;  %v187_v15 = vmul.f32 %v175_v11, %v175_v11 }
  0x12   : > { %v189_v17 = vmul.f32 %v177_v14, %v177_v14  ;;  %473 = vmatpush3.bf16.xpose.msk.msra.mxu0 %vm549_vm1, %v468_v6  ;;  %491 = vmatpush3.bf16.xpose.msk.msra.mxu1 %vm549_vm1, %v468_v6 }
  0x13   : > { %v191_v18 = vsel %vm190_vm0, %v186_v12, 0.0  ;;  %v197_v19 = vsel %vm190_vm0, %v188_v13, 0.0  ;;  %v194_v20 = vsel %vm190_vm0, %v187_v15, 0.0  ;;  %476 = vmatprep.subr.msk.bf16.mxu0 %vm549_vm1, %v474_v16  ;;  %488 = vmatprep.subr.msk.bf16.mxu1 %vm549_vm1, %v474_v16 }
  0x14   : > { %192 = vadd.xlane.f32.xlu0 %v191_v18  ;;  %198 = vadd.xlane.f32.xlu1 %v197_v19  ;;  %v200_v21 = vsel %vm190_vm0, %v189_v17, 0.0 }
  0x18   : > { %195 = vadd.xlane.f32.xlu0 %v194_v20  ;;  %201 = vadd.xlane.f32.xlu1 %v200_v21 }
  0x1a   : > { %479 = vmatpush3.bf16.xpose.msk.msra.mxu0 %vm549_vm1, %v474_v16  ;;  %492 = vmatpush3.bf16.xpose.msk.msra.mxu1 %vm549_vm1, %v474_v16 }
  0x1b   : > { %482 = vmatprep.subr.msk.bf16.mxu0 %vm549_vm1, %v480_v24  ;;  %489 = vmatprep.subr.msk.bf16.mxu1 %vm549_vm1, %v480_v24 }
  0x22   : > { %485 = vmatpush3.bf16.xpose.msk.msra.mxu0 %vm549_vm1, %v480_v24  ;;  %493 = vmatpush3.bf16.xpose.msk.msra.mxu1 %vm549_vm1, %v480_v24 }
  0x29   : > { %457 = vmatmul.mubr.msk.f32.vlgmr.msra.gmra.mrb[0].mxu0 %vm190_vm0, %v175_v11  ;;  %460 = vmatmul.mubr.msk.f32.vlgmr.msra.gmra.mrb[0].mxu1 %vm190_vm0, %v177_v14 }
  0xa1   : > { %v193_v25 = vpop.xlane.xlu0 %192  ;;  %v199_v26 = vpop.xlane.xlu1 %198 }
  0xa2   : > { %v331_v36 = vadd.f32 %v425_v28, %v193_v25  ;;  %v333_v37 = vadd.f32 %v425_v28, %v199_v26 }
  0xa5   : > { %v196_v27 = vpop.xlane.xlu0 %195  ;;  %v202_v29 = vpop.xlane.xlu1 %201 }
  0xa6   : > { %v332_v33 = vadd.f32 %v425_v28, %v196_v27  ;;  %v334_v41 = vadd.f32 %v425_v28, %v202_v29 }
  0xfc   : > { %v458_v30 = vpop.f32.mrb[0].mxu0  ;;  %v461_v31 = vpop.f32.mrb[0].mxu1 }
  0xfd   : > { %v336_v32 = vmul.f32 2.0, %v458_v30  ;;  %v305_v34 = vpop.f32.mrb[1].mxu0  ;;  %v315_v35 = vpop.f32.mrb[1].mxu1  ;;  %v338_v40 = vmul.f32 2.0, %v461_v31 }
  0xfe   : > { %v335_v38 = vmul.f32 2.0, %v305_v34  ;;  %v337_v39 = vmul.f32 2.0, %v315_v35 }
  0xff   : > { %v340_v43 = vsub.f32 %v332_v33, %v336_v32  ;;  %v342_v45 = vsub.f32 %v334_v41, %v338_v40 }
 0x100   : > { %v339_v42 = vsub.f32 %v331_v36, %v335_v38  ;;  %v341_v44 = vsub.f32 %v333_v37, %v337_v39 }
 0x101   : > { %345 = vst.msk [vmem:[%s172_s13 + $0x8] sm:$0xff] %vm343_vm2, %v340_v43  ;;  %347 = vst.msk [vmem:[%s172_s13 + $0x18] sm:$0xff] %vm343_vm2, %v342_v45 }
 0x102   : > { %344 = vst.msk [vmem:[%s172_s13] sm:$0xff] %vm343_vm2, %v339_v42  ;;  %346 = vst.msk [vmem:[%s172_s13 + $0x10] sm:$0xff] %vm343_vm2, %v341_v44 }
 0x103 PF: > { %s13_s12 = sadd.s32 1, %s508_s12  }
 0x104   : > { %p10_p4 = scmp.ge.s32.totalorder %s13_s12, 4  }
 0x106   :  { %12 = sbr.rel (!%p10_p4) target bundleno = 1 (0x1), region = 62 }

// kernel: _lambda_.18
= control target key start
LH: loop header
LB: loop body
LE: loop exit
PB: predicated region body
PF: predicated region fallthrough
CT: control target
= control target key end

     0   :  { %s884_s21 = smov 0   ;;  %s952_s0 = inlined_call_operand.vmem [shape: f32[64,8], index: 0, kind: input, shape index: {}]   ;;  %s953_s1 = inlined_call_operand.vmem [shape: f32[64,16], index: 1, kind: input, shape index: {}]   ;;  %s954_s2 = inlined_call_operand.vmem [shape: f32[16,32], index: 2, kind: input, shape index: {}]   ;;  %s955_s3 = inlined_call_operand.vmem [shape: f32[1,32], index: 3, kind: input, shape index: {}]   ;;  %s956_s4 = inlined_call_operand.vmem [shape: f32[32,8], index: 4, kind: input, shape index: {}]   ;;  %s957_s5 = inlined_call_operand.vmem [shape: f32[1,8], index: 5, kind: input, shape index: {}]   ;;  %s958_s6 = inlined_call_operand.vmem [shape: f32[64,8], index: 6, kind: output, shape index: {}]  }
   0x1 LB: > { %s742_s22 = sadd.s32 4294967295, %s845_s21   ;;  %p746_p0 = scmp.ge.s32.totalorder %s845_s21, 1  ;;  %s845_s21 = sphi %s884_s21, %s16_s21  }
   0x2   : > { %p224_p1 = scmp.lt.s32.totalorder %s845_s21, 3 }
   0x4   : > { %p225_p2 = pnand %p746_p0, %p224_p1 }
   0x5   : > { %s747_s23 = sshll.u32 (!%p225_p2), %s742_s22, 2  ;;  %v286_v0 = vld [vmem:[%s954_s2] sm:$0xff] (!%p225_p2)  ;;  %vm304_vm0 = vcmask (!%p225_p2), 1043456   ;;  %v287_v1 = vld [vmem:[%s954_s2 + $0x8] sm:$0xff] (!%p225_p2)  ;;  %s847_s11 = smov (!%p225_p2), 8   ;;  %vm297_vm1 = vcmask (!%p225_p2), 64512  }
   0x6   : > { %228 = sbr.rel (%p225_p2) target bundleno = 702 (0x2be), region = 44  ;;  %p260_p3 = scmp.lt.s32.totalorder (!%p225_p2), %s747_s23, 7  ;;  %v296_v2 = vpack.c.bf16 (!%p225_p2), %v286_v0, %v286_v0  ;;  %v363_v3 = vpack.c.bf16 (!%p225_p2), %v287_v1, %v287_v1  ;;  %v289_v22 = vld [vmem:[%s956_s4] sm:$0xff] (!%p225_p2)  ;;  %v290_v23 = vld [vmem:[%s956_s4 + $0x8] sm:$0xff] (!%p225_p2)  ;;  %v291_v25 = vld [vmem:[%s956_s4 + $0x10] sm:$0xff] (!%p225_p2)  ;;  %vm450_vm2 = vcmask (!%p225_p2), 261120  }
   0x7   : > { %v442_v24 = vpack.c.bf16 (!%p225_p2), %v290_v23, %v289_v22  ;;  %v292_v26 = vld [vmem:[%s956_s4 + $0x18] sm:$0xff] (!%p225_p2)  ;;  %s848_s20 = smov (!%p225_p2), 120   ;;  %v757_v40 = vld [vmem:[%s955_s3] ss:$0 sm:$0xff] (!%p225_p2) }
   0x8   : > { %826 = vmatprep.subr.msk.bf16.mxu0 (!%p225_p2), %vm304_vm0, %v296_v2  ;;  %827 = vmatprep.subr.msk.bf16.mxu1 (!%p225_p2), %vm304_vm0, %v363_v3  ;;  %v306_v4 = vsel (!%p225_p2), %vm304_vm0, %v296_v2, 0  ;;  %v371_v5 = vsel (!%p225_p2), %vm304_vm0, %v363_v3, 0  ;;  %v443_v27 = vpack.c.bf16 (!%p225_p2), %v292_v26, %v291_v25 }
   0x9   : > { %785 = vmatpush3.bf16.msra.mxu0 (!%p225_p2), %v306_v4  ;;  %791 = vmatpush3.bf16.msra.mxu1 (!%p225_p2), %v371_v5 }
   0xa   : > { %828 = vmatprep.subr.msk.bf16.mxu1 (!%p225_p2), %vm304_vm0, %v363_v3  ;;  %796 = vmatprep.subr.bf16.mxu0 (!%p225_p2), %v442_v24 }
   0xd   : > { %s960_s23 = smov (!%p260_p3, %s747_s23), 7 }
   0xe   : > { %s898_s28 = sshll.u32 %s960_s23, 3 }
   0xf   : > { %s263_s7 = scalar_lea.vmem %s952_s0, %s898_s28  ;;  %s269_s10 = scalar_lea.vmem %s953_s1, %s898_s28 }
  0x10   : > { %v280_v6 = vld [vmem:[%s263_s7 + $0x10] sm:$0xff]  ;;  %v278_v7 = vld [vmem:[%s263_s7] sm:$0xff]  ;;  %v281_v8 = vld [vmem:[%s263_s7 + $0x18] sm:$0xff]  ;;  %s275_s29 = scalar_lea.vmem %s958_s6, %s898_s28 }
  0x11   : > { %514 = vrot.lane.b32.xlu1 %v280_v6, %s847_s11  ;;  %510 = vrot.lane.b32.xlu0 %v278_v7, %s847_s11  ;;  %v279_v9 = vld [vmem:[%s263_s7 + $0x8] sm:$0xff]  ;;  %v284_v10 = vld [vmem:[%s269_s10 + $0x10] sm:$0xff]  ;;  %v295_v11 = vpack.c.bf16 %v281_v8, %v280_v6 }
  0x12   : > { %v359_v12 = vsub.f32 %v284_v10, %v280_v6  ;;  %v282_v13 = vld [vmem:[%s269_s10] sm:$0xff]  ;;  %v285_v14 = vld [vmem:[%s269_s10 + $0x18] sm:$0xff]  ;;  %v283_v15 = vld [vmem:[%s269_s10 + $0x8] sm:$0xff]  ;;  %v294_v16 = vpack.c.bf16 %v279_v9, %v278_v7 }
  0x13   : > { %v357_v17 = vsub.f32 %v282_v13, %v278_v7  ;;  %v360_v18 = vsub.f32 %v285_v14, %v281_v8  ;;  %v358_v19 = vsub.f32 %v283_v15, %v279_v9 }
  0x14   : > { %786 = vmatprep.mubr.msk.bf16.mxu0 %vm297_vm1, %v294_v16 }
  0x15   : > { %516 = vrot.lane.b32.xlu1 %v281_v8, %s847_s11  ;;  %512 = vrot.lane.b32.xlu0 %v279_v9, %s847_s11  ;;  %v362_v20 = vpack.c.bf16 %v360_v18, %v359_v12  ;;  %v361_v21 = vpack.c.bf16 %v358_v19, %v357_v17  ;;  %v758_v17 = vld [vmem:[%s957_s5] ss:$0 sm:$0xff] }
  0x16   : > { %787 = vmatmul.mubr.msk.bf16.vlgmr.msra.gmra.mrb[0].mxu0 %vm297_vm1, %v295_v11 }
  0x17   : > { %792 = vmatprep.mubr.msk.bf16.mxu1 %vm297_vm1, %v361_v21  ;;  %797 = vmatpush3.bf16.msra.mxu0 %v442_v24 }
  0x18   : > { %793 = vmatmul.mubr.msk.bf16.vlgmr.msra.gmra.mrb[0].mxu1 %vm297_vm1, %v362_v20  ;;  %798 = vmatprep.subr.bf16.mxu0 %v443_v27 }
  0x19   : > { %805 = vmatpush3.bf16.msra.mxu1 %v371_v5 }
  0x1b   : > { %799 = vmatpush3.bf16.msra.mxu0 %v443_v27 }
  0x1c   : > { %810 = vmatprep.subr.bf16.mxu0 %v442_v24 }
  0x83   : > { %v515_v28 = vpop.permute.xlu1 %514  ;;  %v511_v29 = vpop.permute.xlu0 %510 }
  0x84   : > { %v524_v32 = vsub.f32 %v284_v10, %v515_v28  ;;  %v522_v33 = vsub.f32 %v282_v13, %v511_v29 }
  0x87   : > { %v517_v30 = vpop.permute.xlu1 %516  ;;  %v513_v31 = vpop.permute.xlu0 %512 }
  0x88   : > { %v525_v34 = vsub.f32 %v285_v14, %v517_v30  ;;  %v523_v35 = vsub.f32 %v283_v15, %v513_v31 }
  0x8a   : > { %v527_v36 = vpack.c.bf16 %v525_v34, %v524_v32  ;;  %v526_v37 = vpack.c.bf16 %v523_v35, %v522_v33 }
  0x8c   : > { %532 = vrot.lane.b32.xlu1 %v527_v36, %s848_s20  ;;  %530 = vrot.lane.b32.xlu0 %v526_v37, %s848_s20 }
  0xe9   : > { %v788_v38 = vpop.f32.mrb[0].mxu0 }
  0xea   : > { %v342_v39 = vpop.f32.mrb[1].mxu0 }
  0xeb   : > { %v794_v41 = vpop.f32.mrb[0].mxu1  ;;  %v789_v42 = vpop.f32.mrb[2].mxu0 }
  0xec   : > { %v424_v43 = vadd.f32 %v794_v41, %v788_v38  ;;  %v407_v44 = vpop.f32.mrb[1].mxu1  ;;  %v345_v45 = vpop.f32.mrb[3].mxu0 }
  0xed   : > { %v422_v46 = vadd.f32 %v407_v44, %v342_v39  ;;  %v795_v47 = vpop.f32.mrb[2].mxu1 }
  0xee   : > { %v434_v48 = vadd.f32 %v757_v40, %v424_v43  ;;  %v425_v49 = vadd.f32 %v795_v47, %v789_v42  ;;  %v410_v50 = vpop.f32.mrb[3].mxu1 }
  0xef   : > { %v432_v51 = vadd.f32 %v757_v40, %v422_v46  ;;  %v423_v52 = vadd.f32 %v410_v50, %v345_v45 }
  0xf0   : > { %v438_v53 = vmax.f32 %v434_v48, 0.0  ;;  %v435_v54 = vadd.f32 %v757_v40, %v425_v49 }
  0xf1   : > { %v436_v55 = vmax.f32 %v432_v51, 0.0  ;;  %v433_v56 = vadd.f32 %v757_v40, %v423_v52 }
  0xf2   : > { %v439_v57 = vmax.f32 %v435_v54, 0.0 }
  0xf3   : > { %v437_v58 = vmax.f32 %v433_v56, 0.0 }
  0xf4   : > { %v441_v59 = vpack.c.bf16 %v439_v57, %v438_v53 }
  0xf5   : > { %v440_v60 = vpack.c.bf16 %v437_v58, %v436_v55 }
  0xf7   : > { %800 = vmatprep.mubr.msk.bf16.mxu0 %vm450_vm2, %v440_v60 }
  0xf8   : > { %801 = vmatmul.mubr.msk.bf16.vlgmr.msra.gmra.mrb[4].mxu0 %vm450_vm2, %v441_v59 }
  0xf9   : > { %811 = vmatpush3.bf16.msra.mxu0 %v442_v24 }
  0xfa   : > { %812 = vmatprep.subr.bf16.mxu0 %v443_v27 }
  0xfd   : > { %813 = vmatpush3.bf16.msra.mxu0 %v443_v27 }
  0xfe   : > { %v533_v61 = vpop.permute.xlu1 %532  ;;  %v531_v62 = vpop.permute.xlu0 %530 }
  0xff   : > { %806 = vmatprep.mubr.msk.bf16.mxu1 %vm297_vm1, %v531_v62 }
 0x100   : > { %807 = vmatmul.mubr.msk.bf16.vlgmr.msra.gmra.mrb[4].mxu1 %vm297_vm1, %v533_v61 }
 0x1d3   : > { %v808_v63 = vpop.f32.mrb[4].mxu1 }
 0x1d4   : > { %v591_v0 = vadd.f32 %v808_v63, %v788_v38  ;;  %v574_v1 = vpop.f32.mrb[5].mxu1 }
 0x1d5   : > { %v589_v2 = vadd.f32 %v574_v1, %v342_v39  ;;  %v809_v3 = vpop.f32.mrb[6].mxu1 }
 0x1d6   : > { %v595_v4 = vadd.f32 %v757_v40, %v591_v0  ;;  %v592_v5 = vadd.f32 %v809_v3, %v789_v42  ;;  %v577_v6 = vpop.f32.mrb[7].mxu1 }
 0x1d7   : > { %v593_v7 = vadd.f32 %v757_v40, %v589_v2  ;;  %v590_v8 = vadd.f32 %v577_v6, %v345_v45 }
 0x1d8   : > { %v596_v9 = vadd.f32 %v757_v40, %v592_v5  ;;  %v599_v11 = vmax.f32 %v595_v4, 0.0 }
 0x1d9   : > { %v594_v10 = vadd.f32 %v757_v40, %v590_v8  ;;  %v597_v13 = vmax.f32 %v593_v7, 0.0 }
 0x1da   : > { %v600_v12 = vmax.f32 %v596_v9, 0.0 }
 0x1db   : > { %v598_v14 = vmax.f32 %v594_v10, 0.0 }
 0x1dc   : > { %v602_v15 = vpack.c.bf16 %v600_v12, %v599_v11 }
 0x1dd   : > { %v601_v16 = vpack.c.bf16 %v598_v14, %v597_v13 }
 0x1df   : > { %814 = vmatprep.mubr.msk.bf16.mxu0 %vm450_vm2, %v601_v16 }
 0x1e0   : > { %815 = vmatmul.mubr.msk.bf16.vlgmr.msra.gmra.mrb[4].mxu0 %vm450_vm2, %v602_v15 }
 0x2b3   : > { %v816_v18 = vpop.f32.mrb[4].mxu0 }
 0x2b4   : > { %v818_v19 = vadd.f32 %v816_v18, %v758_v17  ;;  %v643_v20 = vpop.f32.mrb[5].mxu0 }
 0x2b5   : > { %v819_v21 = vadd.f32 %v758_v17, %v643_v20  ;;  %v817_v22 = vpop.f32.mrb[6].mxu0 }
 0x2b6   : > { %v820_v23 = vadd.f32 %v817_v22, %v758_v17  ;;  %v646_v24 = vpop.f32.mrb[7].mxu0  ;;  %v664_v27 = vadd.f32 %v818_v19, %v758_v17 }
 0x2b7   : > { %v662_v25 = vadd.f32 %v819_v21, %v758_v17  ;;  %v821_v26 = vadd.f32 %v758_v17, %v646_v24 }
 0x2b8   : > { %v665_v29 = vadd.f32 %v820_v23, %v758_v17  ;;  %v668_v32 = vmax.f32 %v664_v27, 0.0 }
 0x2b9   : > { %v666_v28 = vmax.f32 %v662_v25, 0.0  ;;  %v663_v30 = vadd.f32 %v821_v26, %v758_v17 }
 0x2ba   : > { %v669_v33 = vmax.f32 %v665_v29, 0.0  ;;  %672 = vst.msk [vmem:[%s275_s29 + $0x10] sm:$0xff] %vm297_vm1, %v668_v32 }
 0x2bb   : > { %670 = vst.msk [vmem:[%s275_s29] sm:$0xff] %vm297_vm1, %v666_v28  ;;  %v667_v31 = vmax.f32 %v663_v30, 0.0 }
 0x2bc   : > { %673 = vst.msk [vmem:[%s275_s29 + $0x18] sm:$0xff] %vm297_vm1, %v669_v33 }
 0x2bd   : > { %671 = vst.msk [vmem:[%s275_s29 + $0x8] sm:$0xff] %vm297_vm1, %v667_v31 }
 0x2be PF: > { %s16_s21 = sadd.s32 1, %s845_s21  }
 0x2bf   : > { %p13_p4 = scmp.ge.s32.totalorder %s16_s21, 4  }
 0x2c1   :  { %15 = sbr.rel (!%p13_p4) target bundleno = 1 (0x1), region = 77 }

// kernel: _lambda_.22
= control target key start
LH: loop header
LB: loop body
LE: loop exit
PB: predicated region body
PF: predicated region fallthrough
CT: control target
= control target key end

     0   :  { %s686_s21 = smov 0   ;;  %s747_s0 = inlined_call_operand.vmem [shape: f32[64,8], index: 0, kind: input, shape index: {}]   ;;  %s748_s1 = inlined_call_operand.vmem [shape: f32[64,8], index: 1, kind: input, shape index: {}]   ;;  %s749_s2 = inlined_call_operand.vmem [shape: f32[16,32], index: 2, kind: input, shape index: {}]   ;;  %s750_s3 = inlined_call_operand.vmem [shape: f32[1,32], index: 3, kind: input, shape index: {}]   ;;  %s751_s4 = inlined_call_operand.vmem [shape: f32[32,8], index: 4, kind: input, shape index: {}]   ;;  %s752_s5 = inlined_call_operand.vmem [shape: f32[1,8], index: 5, kind: input, shape index: {}]   ;;  %s753_s6 = inlined_call_operand.vmem [shape: f32[64,8], index: 6, kind: output, shape index: {}]  }
   0x1 LB: > { %s578_s22 = sadd.s32 4294967295, %s649_s21   ;;  %p582_p0 = scmp.ge.s32.totalorder %s649_s21, 1  ;;  %s649_s21 = sphi %s686_s21, %s16_s21  }
   0x2   : > { %p224_p1 = scmp.lt.s32.totalorder %s649_s21, 3 }
   0x4   : > { %p225_p2 = pnand %p582_p0, %p224_p1 }
   0x5   : > { %v287_v0 = vld [vmem:[%s749_s2 + $0x8] sm:$0xff] (!%p225_p2)  ;;  %vm311_vm0 = vcmask (!%p225_p2), 1043456   ;;  %s583_s25 = sshll.u32 (!%p225_p2), %s578_s22, 2  ;;  %v286_v1 = vld [vmem:[%s749_s2] sm:$0xff] (!%p225_p2)  ;;  %vm304_vm1 = vcmask (!%p225_p2), 64512   ;;  %v291_v25 = vld [vmem:[%s751_s4 + $0x10] sm:$0xff] (!%p225_p2) }
   0x6   : > { %228 = sbr.rel (%p225_p2) target bundleno = 477 (0x1dd), region = 44  ;;  %v303_v2 = vpack.c.bf16 (!%p225_p2), %v287_v0, %v287_v0  ;;  %p260_p3 = scmp.lt.s32.totalorder (!%p225_p2), %s583_s25, 7  ;;  %v296_v3 = vpack.c.bf16 (!%p225_p2), %v286_v1, %v286_v1  ;;  %v289_v22 = vld [vmem:[%s751_s4] sm:$0xff] (!%p225_p2)  ;;  %v290_v23 = vld [vmem:[%s751_s4 + $0x8] sm:$0xff] (!%p225_p2)  ;;  %v292_v26 = vld [vmem:[%s751_s4 + $0x18] sm:$0xff] (!%p225_p2)  ;;  %vm446_vm2 = vcmask (!%p225_p2), 261120  }
   0x7   : > { %v438_v24 = vpack.c.bf16 (!%p225_p2), %v290_v23, %v289_v22  ;;  %v439_v27 = vpack.c.bf16 (!%p225_p2), %v292_v26, %v291_v25  ;;  %v593_v28 = vld [vmem:[%s750_s3] ss:$0 sm:$0xff] (!%p225_p2) }
   0x8   : > { %633 = vmatprep.subr.msk.bf16.mxu0 (!%p225_p2), %vm311_vm0, %v303_v2  ;;  %v313_v4 = vsel (!%p225_p2), %vm311_vm0, %v303_v2, 0  ;;  %v371_v20 = vsel (!%p225_p2), %vm311_vm0, %v296_v3, 0  ;;  %v594_v43 = vld [vmem:[%s752_s5] ss:$0 sm:$0xff] (!%p225_p2) }
   0x9   : > { %610 = vmatpush3.bf16.msra.mxu0 (!%p225_p2), %v313_v4  ;;  %621 = vmatprep.subr.bf16.mxu1 (!%p225_p2), %v438_v24 }
   0xa   : > { %634 = vmatprep.subr.msk.bf16.mxu0 (!%p225_p2), %vm311_vm0, %v296_v3  ;;  %622 = vmatpush3.bf16.msra.mxu1 (!%p225_p2), %v438_v24 }
   0xb   : > { %623 = vmatprep.subr.bf16.mxu1 (!%p225_p2), %v439_v27 }
   0xd   : > { %s755_s25 = smov (!%p260_p3, %s583_s25), 7 }
   0xe   : > { %s702_s28 = sshll.u32 %s755_s25, 3  ;;  %624 = vmatpush3.bf16.msra.mxu1 %v439_v27 }
   0xf   : > { %s263_s7 = scalar_lea.vmem %s747_s0, %s702_s28  ;;  %s269_s10 = scalar_lea.vmem %s748_s1, %s702_s28 }
  0x10   : > { %v278_v5 = vld [vmem:[%s263_s7] sm:$0xff]  ;;  %v279_v6 = vld [vmem:[%s263_s7 + $0x8] sm:$0xff]  ;;  %v280_v10 = vld [vmem:[%s263_s7 + $0x10] sm:$0xff]  ;;  %s275_s26 = scalar_lea.vmem %s753_s6, %s702_s28 }
  0x11   : > { %v282_v7 = vld [vmem:[%s269_s10] sm:$0xff]  ;;  %v283_v8 = vld [vmem:[%s269_s10 + $0x8] sm:$0xff]  ;;  %v281_v11 = vld [vmem:[%s263_s7 + $0x18] sm:$0xff]  ;;  %v294_v17 = vpack.c.bf16 %v279_v6, %v278_v5 }
  0x12   : > { %v297_v9 = vsub.f32 %v282_v7, %v278_v5  ;;  %v298_v12 = vsub.f32 %v283_v8, %v279_v6  ;;  %v284_v13 = vld [vmem:[%s269_s10 + $0x10] sm:$0xff]  ;;  %v285_v14 = vld [vmem:[%s269_s10 + $0x18] sm:$0xff]  ;;  %v295_v21 = vpack.c.bf16 %v281_v11, %v280_v10 }
  0x13   : > { %v299_v15 = vsub.f32 %v284_v13, %v280_v10  ;;  %v300_v16 = vsub.f32 %v285_v14, %v281_v11 }
  0x14   : > { %v301_v18 = vpack.c.bf16 %v298_v12, %v297_v9 }
  0x15   : > { %v302_v19 = vpack.c.bf16 %v300_v16, %v299_v15 }
  0x16   : > { %611 = vmatprep.mubr.msk.bf16.mxu0 %vm304_vm1, %v301_v18 }
  0x17   : > { %612 = vmatmul.mubr.msk.bf16.vlgmr.msra.gmra.mrb[0].mxu0 %vm304_vm1, %v302_v19 }
  0x18   : > { %616 = vmatpush3.bf16.msra.mxu0 %v371_v20  ;;  %617 = vmatprep.mubr.msk.bf16.mxu0 %vm304_vm1, %v294_v17 }
  0x23   : > { %618 = vmatmul.mubr.msk.bf16.vlgmr.msra.gmra.mrb[0].mxu0 %vm304_vm1, %v295_v21 }
  0xf6   : > { %v619_v29 = vpop.f32.mrb[0].mxu0 }
  0xf7   : > { %v430_v30 = vadd.f32 %v619_v29, %v593_v28  ;;  %v407_v31 = vpop.f32.mrb[1].mxu0 }
  0xf8   : > { %v428_v32 = vadd.f32 %v593_v28, %v407_v31  ;;  %v620_v33 = vpop.f32.mrb[2].mxu0 }
  0xf9   : > { %v431_v34 = vadd.f32 %v620_v33, %v593_v28  ;;  %v410_v35 = vpop.f32.mrb[3].mxu0  ;;  %v434_v37 = vmax.f32 %v430_v30, 0.0 }
  0xfa   : > { %v429_v36 = vadd.f32 %v593_v28, %v410_v35  ;;  %v432_v39 = vmax.f32 %v428_v32, 0.0 }
  0xfb   : > { %v435_v38 = vmax.f32 %v431_v34, 0.0 }
  0xfc   : > { %v433_v40 = vmax.f32 %v429_v36, 0.0 }
  0xfd   : > { %v437_v41 = vpack.c.bf16 %v435_v38, %v434_v37 }
  0xfe   : > { %v436_v42 = vpack.c.bf16 %v433_v40, %v432_v39 }
 0x100   : > { %625 = vmatprep.mubr.msk.bf16.mxu1 %vm446_vm2, %v436_v42 }
 0x101   : > { %626 = vmatmul.mubr.msk.bf16.vlgmr.msra.gmra.mrb[0].mxu1 %vm446_vm2, %v437_v41 }
 0x1d4   : > { %v627_v44 = vpop.f32.mrb[0].mxu1 }
 0x1d5   : > { %v487_v45 = vpop.f32.mrb[1].mxu1  ;;  %v496_v48 = vadd.f32 %v627_v44, %v594_v43 }
 0x1d6   : > { %v488_v46 = vadd.f32 %v594_v43, %v487_v45  ;;  %v628_v47 = vpop.f32.mrb[2].mxu1 }
 0x1d7   : > { %v490_v49 = vpop.f32.mrb[3].mxu1  ;;  %v499_v51 = vadd.f32 %v628_v47, %v594_v43  ;;  %v504_v54 = vmax.f32 %v496_v48, 0.0 }
 0x1d8   : > { %v502_v50 = vmax.f32 %v488_v46, 0.0  ;;  %v491_v52 = vadd.f32 %v594_v43, %v490_v49 }
 0x1d9   : > { %v505_v55 = vmax.f32 %v499_v51, 0.0  ;;  %508 = vst.msk [vmem:[%s275_s26 + $0x10] sm:$0xff] %vm304_vm1, %v504_v54 }
 0x1da   : > { %506 = vst.msk [vmem:[%s275_s26] sm:$0xff] %vm304_vm1, %v502_v50  ;;  %v503_v53 = vmax.f32 %v491_v52, 0.0 }
 0x1db   : > { %509 = vst.msk [vmem:[%s275_s26 + $0x18] sm:$0xff] %vm304_vm1, %v505_v55 }
 0x1dc   : > { %507 = vst.msk [vmem:[%s275_s26 + $0x8] sm:$0xff] %vm304_vm1, %v503_v53 }
 0x1dd PF: > { %s16_s21 = sadd.s32 1, %s649_s21  }
 0x1de   : > { %p13_p4 = scmp.ge.s32.totalorder %s16_s21, 4  }
 0x1e0   :  { %15 = sbr.rel (!%p13_p4) target bundleno = 1 (0x1), region = 77 }

// kernel: _lambda_.24
= control target key start
LH: loop header
LB: loop body
LE: loop exit
PB: predicated region body
PF: predicated region fallthrough
CT: control target
= control target key end

     0   :  { %s1654_s0 = inlined_call_operand.vmem [shape: f32[64,8], index: 0, kind: input, shape index: {}]   ;;  %s1655_s1 = inlined_call_operand.vmem [shape: f32[64,8], index: 1, kind: input, shape index: {}]   ;;  %s1656_s2 = inlined_call_operand.vmem [shape: f32[64,8], index: 2, kind: input, shape index: {}]   ;;  %s1657_s3 = inlined_call_operand.vmem [shape: f32[24,32], index: 3, kind: input, shape index: {}]   ;;  %s1658_s4 = inlined_call_operand.vmem [shape: f32[1,32], index: 4, kind: input, shape index: {}, may-alias: {4,8}]   ;;  %s1659_s5 = inlined_call_operand.vmem [shape: f32[32,8], index: 5, kind: input, shape index: {}]   ;;  %s1660_s6 = inlined_call_operand.vmem [shape: f32[1,8], index: 6, kind: input, shape index: {}, may-alias: {6,10}]   ;;  %s1661_s7 = inlined_call_operand.vmem [shape: f32[16,32], index: 7, kind: input, shape index: {}]   ;;  %s1662_s8 = inlined_call_operand.vmem [shape: f32[1,32], index: 8, kind: input, shape index: {}, may-alias: {4,8}]   ;;  %s1663_s9 = inlined_call_operand.vmem [shape: f32[32,8], index: 9, kind: input, shape index: {}]   ;;  %s1664_s10 = inlined_call_operand.vmem [shape: f32[1,8], index: 10, kind: input, shape index: {}, may-alias: {6,10}]   ;;  %s1665_s11 = inlined_call_operand.vmem [shape: f32[64,8], index: 11, kind: output, shape index: {0}]   ;;  %s1666_s12 = inlined_call_operand.hbm [shape: f32[64,8], index: 12, kind: output, shape index: {1}]  }
   0x1   :  { %1668 = sst [smem:[#allocation6_spill]] %s1654_s0 }
   0x2   :  { %1669 = sst [smem:[#allocation7_spill]] %s1655_s1 }
   0x3   :  { %18 = vsyncpa [#allocation3], 0 }
   0x4   :  { %20 = vsyncpa [#allocation3 + $0x1], 0  ;;  %s1419_s21 = smov 0   ;;  %s1421_s22 = smov 0  }
   0x5   :  { %s1423_s23 = smov 0   ;;  %s1425_s24 = smov 0  }
   0x6 LB: > { %s1440_s25 = sadd.s32 4294967295, %s1349_s24   ;;  %s1123_s26 = sadd.s32 4294967294, %s1349_s24   ;;  %s1349_s24 = sphi %s1425_s24, %s1680_s24   ;;  %s1345_s23 = sphi %s1423_s23, %s1679_s23   ;;  %s1341_s22 = sphi %s1421_s22, %s1678_s22   ;;  %s1337_s21 = sphi %s1419_s21, %s1677_s21  }
   0x7   : > { %s1444_s27 = sadd.s32 1, %s1349_s24   ;;  %s305_s28 = sadd.s32 1, %s1345_s23 }
   0x8   : > { %s302_s29 = ssub.s32 %s1349_s24, %s1444_s27  ;;  %p315_p0 = scmp.ne.s32.totalorder %s1345_s23, %s1341_s22 }
   0x9   : > { %p303_p1 = scmp.eq.s32.totalorder %s302_s29, 0  ;;  %p316_p2 = scmp.eq.s32.totalorder %s1440_s25, 1 }
   0xa   : > { %p321_p3 = scmp.ne.s32.totalorder %s1341_s22, %s1337_s21  ;;  %p322_p4 = scmp.eq.s32.totalorder %s1123_s26, 1 }
   0xb   : > { %s1455_s30 = scalar_select %p303_p1, %s1345_s23, %s305_s28  }
   0xc   : > { %p1457_p5 = por %p316_p2, %p315_p0  ;;  %p1461_p6 = por %p322_p4, %p321_p3 }
   0xd   : > { %1670 = sst [smem:[#allocation5_spill]] %s1455_s30  ;;  %p1126_p7 = scmp.ge.s32.totalorder %s1349_s24, 1 }
   0xe   : > { %p391_p8 = scmp.lt.s32.totalorder %s1349_s24, 3 }
  0x10   : > { %p392_p9 = pnand %p1126_p7, %p391_p8 }
  0x11   : > { %v483_v0 = vld [vmem:[%s1657_s3 + $0x8] sm:$0xff] (!%p392_p9)  ;;  %vm516_vm0 = vcmask (!%p392_p9), 1043456   ;;  %s1128_s17 = sshll.u32 (!%p392_p9), %s1440_s25, 2  ;;  %v482_v1 = vld [vmem:[%s1657_s3] sm:$0xff] (!%p392_p9)  ;;  %s1673_s1 = sld [smem:[#allocation7_spill]] (!%p392_p9)  ;;  %v484_v5 = vld [vmem:[%s1657_s3 + $0x10] sm:$0xff] (!%p392_p9) }
  0x12   : > { %395 = sbr.rel (%p392_p9) target bundleno = 954 (0x3ba), region = 64  ;;  %v508_v2 = vpack.c.bf16 (!%p392_p9), %v483_v0, %v483_v0  ;;  %p449_p10 = scmp.lt.s32.totalorder (!%p392_p9), %s1128_s17, 7  ;;  %v501_v3 = vpack.c.bf16 (!%p392_p9), %v482_v1, %v482_v1  ;;  %vm509_vm1 = vcmask (!%p392_p9), 64512   ;;  %v629_v16 = vpack.c.bf16 (!%p392_p9), %v484_v5, %v484_v5  ;;  %v486_v27 = vld [vmem:[%s1659_s5] sm:$0xff] (!%p392_p9)  ;;  %v487_v28 = vld [vmem:[%s1659_s5 + $0x8] sm:$0xff] (!%p392_p9)  ;;  %v488_v30 = vld [vmem:[%s1659_s5 + $0x10] sm:$0xff] (!%p392_p9) }
  0x13   : > { %s1674_s0 = sld [smem:[#allocation6_spill]] (!%p392_p9)  ;;  %v708_v29 = vpack.c.bf16 (!%p392_p9), %v487_v28, %v486_v27  ;;  %v489_v31 = vld [vmem:[%s1659_s5 + $0x18] sm:$0xff] (!%p392_p9)  ;;  %v1142_v33 = vld [vmem:[%s1658_s4] ss:$0 sm:$0xff] (!%p392_p9)  ;;  %vm716_vm2 = vcmask (!%p392_p9), 261120   ;;  %v492_v48 = vld [vmem:[%s1661_s7 + $0x8] sm:$0xff] (!%p392_p9) }
  0x14   : > { %1241 = vmatprep.subr.msk.bf16.mxu0 (!%p392_p9), %vm516_vm0, %v508_v2  ;;  %v518_v4 = vsel (!%p392_p9), %vm516_vm0, %v508_v2, 0  ;;  %v576_v14 = vsel (!%p392_p9), %vm516_vm0, %v501_v3, 0  ;;  %v637_v23 = vsel (!%p392_p9), %vm516_vm0, %v629_v16, 0  ;;  %v709_v32 = vpack.c.bf16 (!%p392_p9), %v489_v31, %v488_v30  ;;  %v491_v51 = vld [vmem:[%s1661_s7] sm:$0xff] (!%p392_p9)  ;;  %s1667_s19 = sand.u32 (!%p392_p9), 1, %s1341_s22   ;;  %v495_v2 = vld [vmem:[%s1663_s9 + $0x8] sm:$0xff] (!%p392_p9) }
  0x15   : > { %1184 = vmatpush3.bf16.msra.mxu0 (!%p392_p9), %v518_v4  ;;  %1201 = vmatprep.subr.bf16.mxu1 (!%p392_p9), %v708_v29  ;;  %v783_v49 = vpack.c.bf16 (!%p392_p9), %v492_v48, %v492_v48  ;;  %v780_v52 = vpack.c.bf16 (!%p392_p9), %v491_v51, %v491_v51  ;;  %s1127_s30 = sshll.u32 (!%p392_p9), %s1667_s19, 5  ;;  %v1143_v53 = vld [vmem:[%s1660_s6] ss:$0 sm:$0xff] (!%p392_p9)  ;;  %v496_v4 = vld [vmem:[%s1663_s9 + $0x10] sm:$0xff] (!%p392_p9)  ;;  %v497_v5 = vld [vmem:[%s1663_s9 + $0x18] sm:$0xff] (!%p392_p9)  ;;  %s1159_s16 = sshll.u32 (!%p392_p9), %s1440_s25, 9 }
  0x16   : > { %1242 = vmatprep.subr.msk.bf16.mxu0 (!%p392_p9), %vm516_vm0, %v501_v3  ;;  %1202 = vmatpush3.bf16.msra.mxu1 (!%p392_p9), %v708_v29  ;;  %s1553_s28 = scalar_lea.vmem (!%p392_p9), [#allocation2], %s1127_s30  ;;  %v494_v1 = vld [vmem:[%s1663_s9] sm:$0xff] (!%p392_p9) }
  0x17   : > { %1203 = vmatprep.subr.bf16.mxu1 (!%p392_p9), %v709_v32  ;;  %v791_v50 = vsel (!%p392_p9), %vm516_vm0, %v783_v49, 0  ;;  %v843_v0 = vsel (!%p392_p9), %vm516_vm0, %v780_v52, 0  ;;  %v910_v3 = vpack.c.bf16 (!%p392_p9), %v495_v2, %v494_v1  ;;  %s1012_s19 = sshll.u32 (!%p392_p9), %s1553_s28, 4  ;;  %s1588_s19 = int_to_ptr.vmem [resolvable:$true] %s1012_s19 }
  0x18   : > { %s1287_s15 = scalar_lea.vmem (!%p392_p9), %s1588_s19, 512 }
  0x19   : > { %s1682_s17 = smov (!%p449_p10, %s1128_s17), 7  ;;  %p1288_p11 = scmp.ne.s32.totalorder %s1588_s19, %s1287_s15 }
  0x1a   : > { %s1476_s20 = sshll.u32 %s1682_s17, 3  ;;  %1204 = vmatpush3.bf16.msra.mxu1 %v709_v32  ;;  %s1594_s17 = scalar_lea.hbm %s1666_s12, %s1159_s16 }
  0x1b   : > { %s458_s29 = scalar_lea.vmem %s1673_s1, %s1476_s20  ;;  %s452_s18 = scalar_lea.vmem %s1674_s0, %s1476_s20  ;;  %1244 = vmatprep.subr.msk.bf16.mxu1 %vm516_vm0, %v783_v49 }
  0x1c   : > { %v478_v6 = vld [vmem:[%s458_s29] sm:$0xff]  ;;  %v479_v7 = vld [vmem:[%s458_s29 + $0x8] sm:$0xff]  ;;  %v480_v8 = vld [vmem:[%s458_s29 + $0x10] sm:$0xff]  ;;  %s464_s26 = scalar_lea.vmem %s1656_s2, %s1476_s20  ;;  %p1289_p12 = pnand %p1288_p11, %p1457_p5 }
  0x1d   : > { %v506_v9 = vpack.c.bf16 %v479_v7, %v478_v6  ;;  %v481_v10 = vld [vmem:[%s458_s29 + $0x18] sm:$0xff]  ;;  %v1490_v11 = vld [vmem:[%s452_s18] sm:$0xff]  ;;  %v1492_v12 = vld [vmem:[%s452_s18 + $0x8] sm:$0xff]  ;;  %v911_v6 = vpack.c.bf16 %v497_v5, %v496_v4 }
  0x1e   : > { %v507_v13 = vpack.c.bf16 %v481_v10, %v480_v8  ;;  %v1497_v15 = vpack.c.bf16 %v1492_v12, %v1490_v11  ;;  %v1508_v17 = vld [vmem:[%s452_s18 + $0x10] sm:$0xff]  ;;  %v1510_v18 = vld [vmem:[%s452_s18 + $0x18] sm:$0xff]  ;;  %v502_v19 = vld [vmem:[%s464_s26] sm:$0xff]  ;;  %p1290_p13 = pneg %p1289_p12 }
  0x1f   : > { %1185 = vmatprep.mubr.msk.bf16.mxu0 %vm509_vm1, %v506_v9  ;;  %v503_v20 = vld [vmem:[%s464_s26 + $0x8] sm:$0xff]  ;;  %v1514_v21 = vpack.c.bf16 %v1510_v18, %v1508_v17  ;;  %v504_v24 = vld [vmem:[%s464_s26 + $0x10] sm:$0xff]  ;;  %v505_v25 = vld [vmem:[%s464_s26 + $0x18] sm:$0xff]  ;;  %s1675_s26 = sand.u32 1, %s1341_s22  }
  0x20   : > { %1186 = vmatmul.mubr.msk.bf16.vlgmr.msra.gmra.mrb[0].mxu0 %vm509_vm1, %v507_v13  ;;  %v627_v22 = vpack.c.bf16 %v503_v20, %v502_v19  ;;  %v628_v26 = vpack.c.bf16 %v505_v25, %v504_v24  ;;  %v1150_v7 = vld [vmem:[%s1662_s8] ss:$0 sm:$0xff]  ;;  %s1598_s29 = scalar_lea.sflag [#allocation3], %s1675_s26 }
  0x21   : > { %1190 = vmatpush3.bf16.msra.mxu0 %v576_v14  ;;  %1191 = vmatprep.mubr.msk.bf16.mxu0 %vm509_vm1, %v1497_v15 }
  0x22   : > { %1243 = vmatprep.subr.msk.bf16.mxu0 %vm516_vm0, %v629_v16 }
  0x2c   : > { %1192 = vmatmul.mubr.msk.bf16.vlgmr.msra.gmra.mrb[0].mxu0 %vm509_vm1, %v1514_v21 }
  0x2d   : > { %1196 = vmatpush3.bf16.msra.mxu0 %v637_v23  ;;  %1197 = vmatprep.mubr.msk.bf16.mxu0 %vm509_vm1, %v627_v22 }
  0x2e   : > { %1221 = vmatprep.subr.bf16.mxu0 %v910_v3 }
  0x38   : > { %1198 = vmatmul.mubr.msk.bf16.vlgmr.msra.gmra.mrb[0].mxu0 %vm509_vm1, %v628_v26 }
  0x39   : > { %1222 = vmatpush3.bf16.msra.mxu0 %v910_v3 }
  0x3a   : > { %1223 = vmatprep.subr.bf16.mxu0 %v911_v6 }
  0x3d   : > { %1224 = vmatpush3.bf16.msra.mxu0 %v911_v6 }
 0x10b   : > { %v1199_v34 = vpop.f32.mrb[0].mxu0 }
 0x10c   : > { %v700_v35 = vadd.f32 %v1199_v34, %v1142_v33  ;;  %v673_v36 = vpop.f32.mrb[1].mxu0 }
 0x10d   : > { %v698_v37 = vadd.f32 %v1142_v33, %v673_v36  ;;  %v1200_v38 = vpop.f32.mrb[2].mxu0 }
 0x10e   : > { %v701_v39 = vadd.f32 %v1200_v38, %v1142_v33  ;;  %v676_v40 = vpop.f32.mrb[3].mxu0  ;;  %v704_v42 = vmax.f32 %v700_v35, 0.0 }
 0x10f   : > { %v699_v41 = vadd.f32 %v1142_v33, %v676_v40  ;;  %v702_v44 = vmax.f32 %v698_v37, 0.0 }
 0x110   : > { %v705_v43 = vmax.f32 %v701_v39, 0.0 }
 0x111   : > { %v703_v45 = vmax.f32 %v699_v41, 0.0 }
 0x112   : > { %v707_v46 = vpack.c.bf16 %v705_v43, %v704_v42 }
 0x113   : > { %v706_v47 = vpack.c.bf16 %v703_v45, %v702_v44 }
 0x115   : > { %1205 = vmatprep.mubr.msk.bf16.mxu1 %vm716_vm2, %v706_v47 }
 0x116   : > { %1206 = vmatmul.mubr.msk.bf16.vlgmr.msra.gmra.mrb[0].mxu1 %vm716_vm2, %v707_v46 }
 0x117   : > { %1210 = vmatpush3.bf16.msra.mxu1 %v791_v50 }
 0x118   : > { %1245 = vmatprep.subr.msk.bf16.mxu1 %vm516_vm0, %v780_v52 }
 0x1e9   : > { %v1207_v54 = vpop.f32.mrb[0].mxu1 }
 0x1ea   : > { %v766_v55 = vadd.f32 %v1207_v54, %v1143_v53  ;;  %v757_v56 = vpop.f32.mrb[1].mxu1 }
 0x1eb   : > { %v758_v57 = vadd.f32 %v1143_v53, %v757_v56  ;;  %v1208_v58 = vpop.f32.mrb[2].mxu1 }
 0x1ec   : > { %774 = vst.msk [vmem:[%s1553_s28 + $0x10] sm:$0xff] %vm509_vm1, %v766_v55  ;;  %v769_v59 = vadd.f32 %v1208_v58, %v1143_v53  ;;  %v760_v60 = vpop.f32.mrb[3].mxu1 }
 0x1ed   : > { %772 = vst.msk [vmem:[%s1553_s28] sm:$0xff] %vm509_vm1, %v758_v57  ;;  %v761_v61 = vadd.f32 %v1143_v53, %v760_v60 }
 0x1ee   : > { %775 = vst.msk [vmem:[%s1553_s28 + $0x18] sm:$0xff] %vm509_vm1, %v769_v59  ;;  %v782_v62 = vpack.c.bf16 %v769_v59, %v766_v55 }
 0x1ef   : > { %773 = vst.msk [vmem:[%s1553_s28 + $0x8] sm:$0xff] %vm509_vm1, %v761_v61  ;;  %v781_v63 = vpack.c.bf16 %v761_v61, %v758_v57  ;;  %s1351_s28 = smov [#allocation2]  }
 0x1f0   : > { %s1291_s0 = sshll.u32 %s1351_s28, 4  ;;  %s1292_s0 = int_to_ptr.vmem [resolvable:$false] %s1291_s0 }
 0x1f1   : > { %1211 = vmatprep.mubr.msk.bf16.mxu1 %vm509_vm1, %v781_v63  ;;  %s1293_s1 = scalar_lea.vmem %s1292_s0, 1024  ;;  %p1294_p0 = scmp.lt.s32.totalorder %s1588_s19, %s1292_s0 }
 0x1f2   : > { %1212 = vmatmul.mubr.msk.bf16.vlgmr.msra.gmra.mrb[4].mxu1 %vm509_vm1, %v782_v62  ;;  %p1295_p1 = scmp.lt.s32.totalorder %s1293_s1, %s1287_s15 }
 0x1f3   : > { %1216 = vmatpush3.bf16.msra.mxu1 %v843_v0  ;;  %1217 = vmatprep.mubr.msk.bf16.mxu1 %vm509_vm1, %v1497_v15 }
 0x1f4   : > { %p1296_p2 = por %p1295_p1, %p1294_p0 }
 0x1f6   : > { %p1297_p3 = pnand %p1296_p2, %p1290_p13 }
 0x1fe   : > { %1218 = vmatmul.mubr.msk.bf16.vlgmr.msra.gmra.mrb[4].mxu1 %vm509_vm1, %v1514_v21 }
 0x2d1   : > { %v1219_v8 = vpop.f32.mrb[4].mxu1 }
 0x2d2   : > { %v902_v9 = vadd.f32 %v1219_v8, %v1150_v7  ;;  %v879_v10 = vpop.f32.mrb[5].mxu1 }
 0x2d3   : > { %v900_v13 = vadd.f32 %v1150_v7, %v879_v10  ;;  %v1220_v14 = vpop.f32.mrb[6].mxu1 }
 0x2d4   : > { %v903_v15 = vadd.f32 %v1220_v14, %v1150_v7  ;;  %v882_v16 = vpop.f32.mrb[7].mxu1  ;;  %v906_v20 = vmax.f32 %v902_v9, 0.0 }
 0x2d5   : > { %v901_v19 = vadd.f32 %v1150_v7, %v882_v16  ;;  %v904_v22 = vmax.f32 %v900_v13, 0.0 }
 0x2d6   : > { %v907_v21 = vmax.f32 %v903_v15, 0.0 }
 0x2d7   : > { %v905_v23 = vmax.f32 %v901_v19, 0.0 }
 0x2d8   : > { %v909_v24 = vpack.c.bf16 %v907_v21, %v906_v20 }
 0x2d9   : > { %v908_v25 = vpack.c.bf16 %v905_v23, %v904_v22 }
 0x2db   : > { %1225 = vmatprep.mubr.msk.bf16.mxu0 %vm716_vm2, %v908_v25 }
 0x2dc   : > { %1226 = vmatmul.mubr.msk.bf16.vlgmr.msra.gmra.mrb[4].mxu0 %vm716_vm2, %v909_v24 }
 0x2dd   : > { %1300 = shalt.err (!%p1297_p3)
}
 0x2de   : > { %s1301_s25 = scalar_lea.hbm %s1594_s17, 512  ;;  %s1305_s30 = scalar_lea.hbm %s1666_s12, 1024 }
 0x2df   : > { %p1302_p4 = scmp.ne.s32.totalorder %s1594_s17, %s1301_s25  ;;  %p1306_p9 = scmp.lt.u32.totalorder %s1594_s17, %s1666_s12 }
 0x2e0   : > { %p1307_p10 = scmp.lt.u32.totalorder %s1305_s30, %s1301_s25  ;;  %p1309_p12 = scmp.lt.u32.totalorder %s1301_s25, %s1594_s17 }
 0x2e1   : > { %p1303_p7 = pnand %p1302_p4, %p1457_p5 }
 0x2e2   : > { %p1308_p11 = por %p1307_p10, %p1306_p9 }
 0x2e3   : > { %p1304_p8 = pneg %p1303_p7 }
 0x2e4   : > { %p1310_p13 = por %p1309_p12, %p1308_p11 }
 0x2e6   : > { %p1311_p0 = pnand %p1310_p13, %p1304_p8 }
 0x2e8   : > { %1314 = shalt.err (!%p1311_p0)
}
 0x2e9   : > { %s1352_s1 = smov 128   ;;  %s1353_s15 = smov 8   ;;  %v1151_v26 = vld [vmem:[%s1664_s10] ss:$0 sm:$0xff]  ;;  %v973_v31 = vmul.f32 0.5, %v1490_v11  ;;  %v974_v37 = vmul.f32 0.5, %v1492_v12 }
 0x2ea   : > { %1246 = dma.vmem_to_hbm [thread:$0]  (%p1457_p5), %s1588_s19, 512, %s1594_s17, %s1598_s29, %s1352_s1, %s1352_s1, %s1353_s15   ;;  %v975_v38 = vmul.f32 0.5, %v1508_v17  ;;  %v976_v41 = vmul.f32 0.5, %v1510_v18 }
 0x2eb   : > { %s470_s17 = scalar_lea.vmem %s1665_s11, %s1476_s20 }
 0x3af   : > { %v1227_v27 = vpop.f32.mrb[4].mxu0 }
 0x3b0   : > { %v967_v28 = vadd.f32 %v1227_v27, %v1151_v26  ;;  %v958_v29 = vpop.f32.mrb[5].mxu0 }
 0x3b1   : > { %v959_v30 = vadd.f32 %v1151_v26, %v958_v29  ;;  %v1228_v32 = vpop.f32.mrb[6].mxu0 }
 0x3b2   : > { %v970_v33 = vadd.f32 %v1228_v32, %v1151_v26  ;;  %v961_v34 = vpop.f32.mrb[7].mxu0  ;;  %v979_v39 = vmul.f32 0.5, %v967_v28 }
 0x3b3   : > { %v977_v35 = vmul.f32 0.5, %v959_v30  ;;  %v962_v36 = vadd.f32 %v1151_v26, %v961_v34 }
 0x3b4   : > { %v980_v42 = vmul.f32 0.5, %v970_v33  ;;  %v983_v44 = vadd.f32 %v979_v39, %v975_v38 }
 0x3b5   : > { %v981_v40 = vadd.f32 %v977_v35, %v973_v31  ;;  %v978_v43 = vmul.f32 0.5, %v962_v36 }
 0x3b6   : > { %v984_v45 = vadd.f32 %v980_v42, %v976_v41  ;;  %987 = vst.msk [vmem:[%s470_s17 + $0x10] sm:$0xff] %vm509_vm1, %v983_v44 }
 0x3b7   : > { %985 = vst.msk [vmem:[%s470_s17] sm:$0xff] %vm509_vm1, %v981_v40  ;;  %v982_v11 = vadd.f32 %v978_v43, %v974_v37 }
 0x3b8   : > { %988 = vst.msk [vmem:[%s470_s17 + $0x18] sm:$0xff] %vm509_vm1, %v984_v45 }
 0x3b9   : > { %986 = vst.msk [vmem:[%s470_s17 + $0x8] sm:$0xff] %vm509_vm1, %v982_v11 }
 0x3ba PF: > { %p1252_p5 = scmp.ge.s32.totalorder %s1349_s24, 2  ;;  %s1035_s20 = sand.u32 1, %s1337_s21  }
 0x3bb   : > { %s1036_s29 = scalar_lea.sflag [#allocation3], %s1035_s20 }
 0x3bc   : > { %p1249_p1 = pnand %p1252_p5, %p1461_p6 }
 0x3be   : > { %1332 = dma.done.wait (!%p1249_p1), %s1036_s29, 512  }
 0x3bf   : > { %1334 = vsyncadd (!%p1249_p1), %s1036_s29, 4294966784  ;;  %s1676_s25 = sld [smem:[#allocation5_spill]]  ;;  %p23_p2 = scmp.ge.s32.totalorder %s1444_s27, 4  }
 0x3c0   : > { %s1677_s21 = smov %s1341_s22  ;;  %s1678_s22 = smov %s1345_s23 }
 0x3c1   : > { %s1680_s24 = smov %s1444_s27  ;;  %25 = sbr.rel (!%p23_p2) target bundleno = 6 (0x6), region = 117 }
 0x3c5   : > { %s1679_s23 = smov %s1676_s25 }
 0x3c8   :  { %1041 = vsyncpa [#allocation3], 1 }
 0x3c9   :  { %1043 = vsyncpa [#allocation3 + $0x1], 1 }

// kernel: _lambda_.23
= control target key start
LH: loop header
LB: loop body
LE: loop exit
PB: predicated region body
PF: predicated region fallthrough
CT: control target
= control target key end

     0   :  { %s1604_s18 = smov 0   ;;  %s1776_s0 = inlined_call_operand.vmem [shape: f32[64,8], index: 0, kind: input, shape index: {}]   ;;  %s1777_s1 = inlined_call_operand.vmem [shape: f32[64,8], index: 1, kind: input, shape index: {}]   ;;  %s1778_s2 = inlined_call_operand.vmem [shape: f32[16,32], index: 2, kind: input, shape index: {}]   ;;  %s1779_s3 = inlined_call_operand.vmem [shape: f32[1,32], index: 3, kind: input, shape index: {}, may-alias: {3,7,11}]   ;;  %s1780_s4 = inlined_call_operand.vmem [shape: f32[32,8], index: 4, kind: input, shape index: {}]   ;;  %s1781_s5 = inlined_call_operand.vmem [shape: f32[1,8], index: 5, kind: input, shape index: {}, may-alias: {5,9,13}]   ;;  %s1782_s6 = inlined_call_operand.vmem [shape: f32[24,32], index: 6, kind: input, shape index: {}]   ;;  %s1783_s7 = inlined_call_operand.vmem [shape: f32[1,32], index: 7, kind: input, shape index: {}, may-alias: {3,7,11}]   ;;  %s1784_s8 = inlined_call_operand.vmem [shape: f32[32,8], index: 8, kind: input, shape index: {}]   ;;  %s1785_s9 = inlined_call_operand.vmem [shape: f32[1,8], index: 9, kind: input, shape index: {}, may-alias: {5,9,13}]   ;;  %s1786_s10 = inlined_call_operand.vmem [shape: f32[16,32], index: 10, kind: input, shape index: {}]   ;;  %s1787_s11 = inlined_call_operand.vmem [shape: f32[1,32], index: 11, kind: input, shape index: {}, may-alias: {3,7,11}]   ;;  %s1788_s12 = inlined_call_operand.vmem [shape: f32[32,8], index: 12, kind: input, shape index: {}]   ;;  %s1789_s13 = inlined_call_operand.vmem [shape: f32[1,8], index: 13, kind: input, shape index: {}, may-alias: {5,9,13}]   ;;  %s1790_s14 = inlined_call_operand.vmem [shape: f32[64,8], index: 14, kind: output, shape index: {0}]   ;;  %s1791_s15 = inlined_call_operand.vmem [shape: f32[64,8], index: 15, kind: output, shape index: {1}]  }
   0x1 LB: > { %s1345_s19 = sadd.s32 4294967295, %s1522_s18   ;;  %p1349_p0 = scmp.ge.s32.totalorder %s1522_s18, 1  ;;  %s1522_s18 = sphi %s1604_s18, %s26_s18  }
   0x2   : > { %p452_p1 = scmp.lt.s32.totalorder %s1522_s18, 3 }
   0x4   : > { %p453_p2 = pnand %p1349_p0, %p452_p1 }
   0x5   : > { %v564_v0 = vld [vmem:[%s1778_s2 + $0x8] sm:$0xff] (!%p453_p2)  ;;  %vm579_vm0 = vcmask (!%p453_p2), 1043456   ;;  %s1350_s22 = sshll.u32 (!%p453_p2), %s1345_s19, 2  ;;  %v563_v1 = vld [vmem:[%s1778_s2] sm:$0xff] (!%p453_p2)  ;;  %vm572_vm1 = vcmask (!%p453_p2), 64512   ;;  %v568_v21 = vld [vmem:[%s1780_s4 + $0x10] sm:$0xff] (!%p453_p2) }
   0x6   : > { %456 = sbr.rel (%p453_p2) target bundleno = 1374 (0x55e), region = 76  ;;  %v571_v2 = vpack.c.bf16 (!%p453_p2), %v564_v0, %v564_v0  ;;  %p511_p3 = scmp.lt.s32.totalorder (!%p453_p2), %s1350_s22, 7  ;;  %v634_v3 = vpack.c.bf16 (!%p453_p2), %v563_v1, %v563_v1  ;;  %v566_v18 = vld [vmem:[%s1780_s4] sm:$0xff] (!%p453_p2)  ;;  %v567_v19 = vld [vmem:[%s1780_s4 + $0x8] sm:$0xff] (!%p453_p2)  ;;  %v569_v22 = vld [vmem:[%s1780_s4 + $0x18] sm:$0xff] (!%p453_p2)  ;;  %vm717_vm2 = vcmask (!%p453_p2), 261120  }
   0x7   : > { %v709_v20 = vpack.c.bf16 (!%p453_p2), %v567_v19, %v566_v18  ;;  %v710_v23 = vpack.c.bf16 (!%p453_p2), %v569_v22, %v568_v21  ;;  %v544_v24 = vld [vmem:[%s1782_s6 + $0x8] sm:$0xff] (!%p453_p2)  ;;  %v1362_v26 = vld [vmem:[%s1779_s3] ss:$0 sm:$0xff] (!%p453_p2)  ;;  %v545_v44 = vld [vmem:[%s1782_s6 + $0x10] sm:$0xff] (!%p453_p2) }
   0x8   : > { %1501 = vmatprep.subr.msk.bf16.mxu0 (!%p453_p2), %vm579_vm0, %v571_v2  ;;  %v581_v4 = vsel (!%p453_p2), %vm579_vm0, %v571_v2, 0  ;;  %v642_v13 = vsel (!%p453_p2), %vm579_vm0, %v634_v3, 0  ;;  %v777_v25 = vpack.c.bf16 (!%p453_p2), %v544_v24, %v544_v24  ;;  %v543_v39 = vld [vmem:[%s1782_s6] sm:$0xff] (!%p453_p2)  ;;  %v884_v46 = vpack.c.bf16 (!%p453_p2), %v545_v44, %v545_v44  ;;  %v548_v0 = vld [vmem:[%s1784_s8 + $0x8] sm:$0xff] (!%p453_p2)  ;;  %v549_v2 = vld [vmem:[%s1784_s8 + $0x10] sm:$0xff] (!%p453_p2) }
   0x9   : > { %1420 = vmatpush3.bf16.msra.mxu0 (!%p453_p2), %v581_v4  ;;  %1431 = vmatprep.subr.bf16.mxu1 (!%p453_p2), %v709_v20  ;;  %v562_v43 = vpack.c.bf16 (!%p453_p2), %v543_v39, %v543_v39  ;;  %v1363_v48 = vld [vmem:[%s1781_s5] ss:$0 sm:$0xff] (!%p453_p2)  ;;  %v556_v44 = vld [vmem:[%s1788_s12 + $0x8] sm:$0xff] (!%p453_p2) }
   0xa   : > { %1502 = vmatprep.subr.msk.bf16.mxu0 (!%p453_p2), %vm579_vm0, %v634_v3  ;;  %1432 = vmatpush3.bf16.msra.mxu1 (!%p453_p2), %v709_v20  ;;  %v779_v42 = vsel (!%p453_p2), %vm579_vm0, %v777_v25, 0  ;;  %v892_v47 = vsel (!%p453_p2), %vm579_vm0, %v884_v46, 0  ;;  %v547_v63 = vld [vmem:[%s1784_s8] sm:$0xff] (!%p453_p2)  ;;  %v550_v3 = vld [vmem:[%s1784_s8 + $0x18] sm:$0xff] (!%p453_p2) }
   0xb   : > { %1433 = vmatprep.subr.bf16.mxu1 (!%p453_p2), %v710_v23  ;;  %v831_v45 = vsel (!%p453_p2), %vm579_vm0, %v562_v43, 0  ;;  %v963_v1 = vpack.c.bf16 (!%p453_p2), %v548_v0, %v547_v63  ;;  %v964_v4 = vpack.c.bf16 (!%p453_p2), %v550_v3, %v549_v2 }
   0xd   : > { %s1793_s22 = smov (!%p511_p3, %s1350_s22), 7 }
   0xe   : > { %s1620_s25 = sshll.u32 %s1793_s22, 3  ;;  %1434 = vmatpush3.bf16.msra.mxu1 %v710_v23 }
   0xf   : > { %s514_s28 = scalar_lea.vmem %s1776_s0, %s1620_s25  ;;  %s520_s16 = scalar_lea.vmem %s1777_s1, %s1620_s25  ;;  %1503 = vmatprep.subr.msk.bf16.mxu1 %vm579_vm0, %v777_v25 }
  0x10   : > { %v1631_v5 = vld [vmem:[%s514_s28] sm:$0xff]  ;;  %v1633_v6 = vld [vmem:[%s514_s28 + $0x8] sm:$0xff]  ;;  %v1635_v7 = vld [vmem:[%s514_s28 + $0x10] sm:$0xff]  ;;  %s532_s29 = scalar_lea.vmem %s1791_s15, %s1620_s25 }
  0x11   : > { %v1639_v8 = vpack.c.bf16 %v1633_v6, %v1631_v5  ;;  %v1641_v9 = vld [vmem:[%s514_s28 + $0x18] sm:$0xff]  ;;  %v539_v10 = vld [vmem:[%s520_s16] sm:$0xff]  ;;  %v540_v11 = vld [vmem:[%s520_s16 + $0x8] sm:$0xff]  ;;  %v1227_v3 = vmul.f32 0.5, %v1631_v5 }
  0x12   : > { %v1645_v12 = vpack.c.bf16 %v1641_v9, %v1635_v7  ;;  %v632_v14 = vpack.c.bf16 %v540_v11, %v539_v10  ;;  %v541_v15 = vld [vmem:[%s520_s16 + $0x10] sm:$0xff]  ;;  %v542_v16 = vld [vmem:[%s520_s16 + $0x18] sm:$0xff]  ;;  %v1372_v10 = vld [vmem:[%s1783_s7] ss:$0 sm:$0xff]  ;;  %s526_s16 = scalar_lea.vmem %s1790_s14, %s1620_s25 }
  0x13   : > { %1421 = vmatprep.mubr.msk.bf16.mxu0 %vm572_vm1, %v1639_v8  ;;  %v633_v17 = vpack.c.bf16 %v542_v16, %v541_v15 }
  0x14   : > { %1422 = vmatmul.mubr.msk.bf16.vlgmr.msra.gmra.mrb[0].mxu0 %vm572_vm1, %v1645_v12 }
  0x15   : > { %1426 = vmatpush3.bf16.msra.mxu0 %v642_v13  ;;  %1427 = vmatprep.mubr.msk.bf16.mxu0 %vm572_vm1, %v632_v14 }
  0x16   : > { %1457 = vmatprep.subr.bf16.mxu0 %v963_v1 }
  0x20   : > { %1428 = vmatmul.mubr.msk.bf16.vlgmr.msra.gmra.mrb[0].mxu0 %vm572_vm1, %v633_v17 }
  0x21   : > { %1458 = vmatpush3.bf16.msra.mxu0 %v963_v1 }
  0x22   : > { %1459 = vmatprep.subr.bf16.mxu0 %v964_v4 }
  0x25   : > { %1460 = vmatpush3.bf16.msra.mxu0 %v964_v4 }
  0xf3   : > { %v1429_v27 = vpop.f32.mrb[0].mxu0 }
  0xf4   : > { %v701_v28 = vadd.f32 %v1429_v27, %v1362_v26  ;;  %v678_v29 = vpop.f32.mrb[1].mxu0 }
  0xf5   : > { %v699_v30 = vadd.f32 %v1362_v26, %v678_v29  ;;  %v1430_v31 = vpop.f32.mrb[2].mxu0  ;;  %v552_v29 = vld [vmem:[%s1786_s10] sm:$0xff] }
  0xf6   : > { %v702_v32 = vadd.f32 %v1430_v31, %v1362_v26  ;;  %v681_v33 = vpop.f32.mrb[3].mxu0  ;;  %v705_v35 = vmax.f32 %v701_v28, 0.0  ;;  %v1373_v31 = vld [vmem:[%s1785_s9] ss:$0 sm:$0xff] }
  0xf7   : > { %v700_v34 = vadd.f32 %v1362_v26, %v681_v33  ;;  %v703_v37 = vmax.f32 %v699_v30, 0.0  ;;  %v553_v26 = vld [vmem:[%s1786_s10 + $0x8] sm:$0xff]  ;;  %v1034_v30 = vpack.c.bf16 %v552_v29, %v552_v29 }
  0xf8   : > { %v706_v36 = vmax.f32 %v702_v32, 0.0  ;;  %v1037_v27 = vpack.c.bf16 %v553_v26, %v553_v26 }
  0xf9   : > { %v704_v38 = vmax.f32 %v700_v34, 0.0 }
  0xfa   : > { %v708_v40 = vpack.c.bf16 %v706_v36, %v705_v35  ;;  %1506 = vmatprep.subr.msk.bf16.mxu0 %vm579_vm0, %v1037_v27  ;;  %v1045_v28 = vsel %vm579_vm0, %v1037_v27, 0 }
  0xfb   : > { %v707_v41 = vpack.c.bf16 %v704_v38, %v703_v37 }
  0xfd   : > { %1435 = vmatprep.mubr.msk.bf16.mxu1 %vm717_vm2, %v707_v41 }
  0xfe   : > { %1436 = vmatmul.mubr.msk.bf16.vlgmr.msra.gmra.mrb[0].mxu1 %vm717_vm2, %v708_v40 }
  0xff   : > { %1440 = vmatpush3.bf16.msra.mxu1 %v779_v42  ;;  %1441 = vmatprep.mubr.msk.bf16.mxu1 %vm572_vm1, %v632_v14  ;;  %v1097_v42 = vsel %vm579_vm0, %v1034_v30, 0 }
 0x100   : > { %1504 = vmatprep.subr.msk.bf16.mxu1 %vm579_vm0, %v562_v43  ;;  %v555_v43 = vld [vmem:[%s1788_s12] sm:$0xff] }
 0x106   : > { %1442 = vmatmul.mubr.msk.bf16.vlgmr.msra.gmra.mrb[4].mxu1 %vm572_vm1, %v633_v17 }
 0x107   : > { %1446 = vmatpush3.bf16.msra.mxu1 %v831_v45  ;;  %1447 = vmatprep.mubr.msk.bf16.mxu1 %vm572_vm1, %v1639_v8  ;;  %v1164_v45 = vpack.c.bf16 %v556_v44, %v555_v43 }
 0x108   : > { %1505 = vmatprep.subr.msk.bf16.mxu1 %vm579_vm0, %v884_v46  ;;  %v557_v46 = vld [vmem:[%s1788_s12 + $0x10] sm:$0xff] }
 0x112   : > { %1448 = vmatmul.mubr.msk.bf16.vlgmr.msra.gmra.mrb[4].mxu1 %vm572_vm1, %v1645_v12 }
 0x113   : > { %1452 = vmatpush3.bf16.msra.mxu1 %v892_v47  ;;  %v1380_v47 = vld [vmem:[%s1787_s11] ss:$0 sm:$0xff] }
 0x114   : > { %1477 = vmatprep.subr.bf16.mxu1 %v1164_v45 }
 0x1d1   : > { %v1437_v49 = vpop.f32.mrb[0].mxu1 }
 0x1d2   : > { %v767_v50 = vadd.f32 %v1437_v49, %v1363_v48  ;;  %v758_v51 = vpop.f32.mrb[1].mxu1 }
 0x1d3   : > { %v759_v52 = vadd.f32 %v1363_v48, %v758_v51  ;;  %v1438_v53 = vpop.f32.mrb[2].mxu1 }
 0x1d4   : > { %v770_v54 = vadd.f32 %v1438_v53, %v1363_v48  ;;  %v761_v55 = vpop.f32.mrb[3].mxu1  ;;  %v775_v57 = vmax.f32 %v767_v50, 0.0 }
 0x1d5   : > { %v762_v56 = vadd.f32 %v1363_v48, %v761_v55  ;;  %v773_v59 = vmax.f32 %v759_v52, 0.0 }
 0x1d6   : > { %v776_v58 = vmax.f32 %v770_v54, 0.0 }
 0x1d7   : > { %v774_v60 = vmax.f32 %v762_v56, 0.0 }
 0x1d8   : > { %v883_v61 = vpack.c.bf16 %v776_v58, %v775_v57 }
 0x1d9   : > { %v882_v62 = vpack.c.bf16 %v774_v60, %v773_v59 }
 0x1db   : > { %1453 = vmatprep.mubr.msk.bf16.mxu1 %vm572_vm1, %v882_v62  ;;  %v1381_v62 = vld [vmem:[%s1789_s13] ss:$0 sm:$0xff] }
 0x1dc   : > { %1454 = vmatmul.mubr.msk.bf16.vlgmr.msra.gmra.mrb[4].mxu1 %vm572_vm1, %v883_v61 }
 0x1dd   : > { %1478 = vmatpush3.bf16.msra.mxu1 %v1164_v45 }
 0x2af   : > { %v1455_v11 = vpop.f32.mrb[4].mxu1 }
 0x2b0   : > { %v955_v13 = vadd.f32 %v1455_v11, %v1372_v10  ;;  %v928_v14 = vpop.f32.mrb[5].mxu1 }
 0x2b1   : > { %v953_v15 = vadd.f32 %v1372_v10, %v928_v14  ;;  %v1456_v16 = vpop.f32.mrb[6].mxu1 }
 0x2b2   : > { %v956_v17 = vadd.f32 %v1456_v16, %v1372_v10  ;;  %v931_v18 = vpop.f32.mrb[7].mxu1  ;;  %v959_v20 = vmax.f32 %v955_v13, 0.0  ;;  %v1229_v16 = vmul.f32 0.5, %v1635_v7 }
 0x2b3   : > { %v954_v19 = vadd.f32 %v1372_v10, %v931_v18  ;;  %v957_v22 = vmax.f32 %v953_v15, 0.0  ;;  %v1228_v15 = vmul.f32 0.5, %v1633_v6 }
 0x2b4   : > { %v960_v21 = vmax.f32 %v956_v17, 0.0 }
 0x2b5   : > { %v958_v23 = vmax.f32 %v954_v19, 0.0  ;;  %v1230_v19 = vmul.f32 0.5, %v1641_v9 }
 0x2b6   : > { %v962_v24 = vpack.c.bf16 %v960_v21, %v959_v20 }
 0x2b7   : > { %v961_v25 = vpack.c.bf16 %v958_v23, %v957_v22 }
 0x2b9   : > { %1461 = vmatprep.mubr.msk.bf16.mxu0 %vm717_vm2, %v961_v25 }
 0x2ba   : > { %1462 = vmatmul.mubr.msk.bf16.vlgmr.msra.gmra.mrb[4].mxu0 %vm717_vm2, %v962_v24 }
 0x2bb   : > { %1466 = vmatpush3.bf16.msra.mxu0 %v1045_v28 }
 0x2bc   : > { %1507 = vmatprep.subr.msk.bf16.mxu0 %vm579_vm0, %v1034_v30 }
 0x38d   : > { %v1463_v32 = vpop.f32.mrb[4].mxu0 }
 0x38e   : > { %v1011_v33 = vpop.f32.mrb[5].mxu0  ;;  %v1020_v36 = vadd.f32 %v1463_v32, %v1373_v31 }
 0x38f   : > { %v1012_v34 = vadd.f32 %v1373_v31, %v1011_v33  ;;  %v1464_v35 = vpop.f32.mrb[6].mxu0 }
 0x390   : > { %v1023_v37 = vadd.f32 %v1464_v35, %v1373_v31  ;;  %v1014_v38 = vpop.f32.mrb[7].mxu0  ;;  %1028 = vst.msk [vmem:[%s532_s29 + $0x10] sm:$0xff] %vm572_vm1, %v1020_v36 }
 0x391   : > { %1026 = vst.msk [vmem:[%s532_s29] sm:$0xff] %vm572_vm1, %v1012_v34  ;;  %v1015_v39 = vadd.f32 %v1373_v31, %v1014_v38 }
 0x392   : > { %v1036_v40 = vpack.c.bf16 %v1023_v37, %v1020_v36  ;;  %1029 = vst.msk [vmem:[%s532_s29 + $0x18] sm:$0xff] %vm572_vm1, %v1023_v37 }
 0x393   : > { %1027 = vst.msk [vmem:[%s532_s29 + $0x8] sm:$0xff] %vm572_vm1, %v1015_v39  ;;  %v1035_v41 = vpack.c.bf16 %v1015_v39, %v1012_v34 }
 0x395   : > { %1467 = vmatprep.mubr.msk.bf16.mxu0 %vm572_vm1, %v1035_v41 }
 0x396   : > { %1468 = vmatmul.mubr.msk.bf16.vlgmr.msra.gmra.mrb[8].mxu0 %vm572_vm1, %v1036_v40 }
 0x397   : > { %1472 = vmatpush3.bf16.msra.mxu0 %v1097_v42  ;;  %1473 = vmatprep.mubr.msk.bf16.mxu0 %vm572_vm1, %v1639_v8  ;;  %v558_v8 = vld [vmem:[%s1788_s12 + $0x18] sm:$0xff] }
 0x3a2   : > { %1474 = vmatmul.mubr.msk.bf16.vlgmr.msra.gmra.mrb[8].mxu0 %vm572_vm1, %v1645_v12  ;;  %v1165_v12 = vpack.c.bf16 %v558_v8, %v557_v46 }
 0x3a4   : > { %1479 = vmatprep.subr.bf16.mxu1 %v1165_v12 }
 0x3a5   : > { %1480 = vmatpush3.bf16.msra.mxu1 %v1165_v12 }
 0x475   : > { %v1475_v48 = vpop.f32.mrb[8].mxu0 }
 0x476   : > { %v1156_v49 = vadd.f32 %v1475_v48, %v1380_v47  ;;  %v1133_v50 = vpop.f32.mrb[9].mxu0 }
 0x477   : > { %v1154_v51 = vadd.f32 %v1380_v47, %v1133_v50  ;;  %v1476_v52 = vpop.f32.mrb[10].mxu0 }
 0x478   : > { %v1157_v53 = vadd.f32 %v1476_v52, %v1380_v47  ;;  %v1136_v54 = vpop.f32.mrb[11].mxu0  ;;  %v1160_v56 = vmax.f32 %v1156_v49, 0.0 }
 0x479   : > { %v1155_v55 = vadd.f32 %v1380_v47, %v1136_v54  ;;  %v1158_v58 = vmax.f32 %v1154_v51, 0.0 }
 0x47a   : > { %v1161_v57 = vmax.f32 %v1157_v53, 0.0 }
 0x47b   : > { %v1159_v59 = vmax.f32 %v1155_v55, 0.0 }
 0x47c   : > { %v1163_v60 = vpack.c.bf16 %v1161_v57, %v1160_v56 }
 0x47d   : > { %v1162_v61 = vpack.c.bf16 %v1159_v59, %v1158_v58 }
 0x47f   : > { %1481 = vmatprep.mubr.msk.bf16.mxu1 %vm717_vm2, %v1162_v61 }
 0x480   : > { %1482 = vmatmul.mubr.msk.bf16.vlgmr.msra.gmra.mrb[8].mxu1 %vm717_vm2, %v1163_v60 }
 0x553   : > { %v1483_v63 = vpop.f32.mrb[8].mxu1 }
 0x554   : > { %v1221_v0 = vadd.f32 %v1483_v63, %v1381_v62  ;;  %v1212_v1 = vpop.f32.mrb[9].mxu1 }
 0x555   : > { %v1213_v2 = vadd.f32 %v1381_v62, %v1212_v1  ;;  %v1484_v4 = vpop.f32.mrb[10].mxu1 }
 0x556   : > { %v1224_v10 = vadd.f32 %v1484_v4, %v1381_v62  ;;  %v1215_v11 = vpop.f32.mrb[11].mxu1  ;;  %v1233_v17 = vmul.f32 0.5, %v1221_v0 }
 0x557   : > { %v1231_v13 = vmul.f32 0.5, %v1213_v2  ;;  %v1216_v14 = vadd.f32 %v1381_v62, %v1215_v11 }
 0x558   : > { %v1234_v20 = vmul.f32 0.5, %v1224_v10  ;;  %v1237_v22 = vadd.f32 %v1233_v17, %v1229_v16 }
 0x559   : > { %v1235_v18 = vadd.f32 %v1231_v13, %v1227_v3  ;;  %v1232_v21 = vmul.f32 0.5, %v1216_v14 }
 0x55a   : > { %v1238_v23 = vadd.f32 %v1234_v20, %v1230_v19  ;;  %1241 = vst.msk [vmem:[%s526_s16 + $0x10] sm:$0xff] %vm572_vm1, %v1237_v22 }
 0x55b   : > { %1239 = vst.msk [vmem:[%s526_s16] sm:$0xff] %vm572_vm1, %v1235_v18  ;;  %v1236_v5 = vadd.f32 %v1232_v21, %v1228_v15 }
 0x55c   : > { %1242 = vst.msk [vmem:[%s526_s16 + $0x18] sm:$0xff] %vm572_vm1, %v1238_v23 }
 0x55d   : > { %1240 = vst.msk [vmem:[%s526_s16 + $0x8] sm:$0xff] %vm572_vm1, %v1236_v5 }
 0x55e PF: > { %s26_s18 = sadd.s32 1, %s1522_s18  }
 0x55f   : > { %p23_p4 = scmp.ge.s32.totalorder %s26_s18, 4  }
 0x561   :  { %25 = sbr.rel (!%p23_p4) target bundleno = 1 (0x1), region = 121 }

// kernel: _lambda_.25
= control target key start
LH: loop header
LB: loop body
LE: loop exit
PB: predicated region body
PF: predicated region fallthrough
CT: control target
= control target key end

     0   :  { %s1504_s26 = smov 0   ;;  %s1672_s0 = inlined_call_operand.vmem [shape: f32[64,8], index: 0, kind: input, shape index: {}]   ;;  %s1673_s1 = inlined_call_operand.vmem [shape: f32[8,32], index: 1, kind: input, shape index: {}]   ;;  %s1674_s2 = inlined_call_operand.vmem [shape: f32[1,32], index: 2, kind: input, shape index: {}, may-alias: {2,4,6,10,12,14}]   ;;  %s1675_s3 = inlined_call_operand.vmem [shape: f32[32,32], index: 3, kind: input, shape index: {}]   ;;  %s1676_s4 = inlined_call_operand.vmem [shape: f32[1,32], index: 4, kind: input, shape index: {}, may-alias: {2,4,6,10,12,14}]   ;;  %s1677_s5 = inlined_call_operand.vmem [shape: f32[32,32], index: 5, kind: input, shape index: {}]   ;;  %s1678_s6 = inlined_call_operand.vmem [shape: f32[1,32], index: 6, kind: input, shape index: {}, may-alias: {2,4,6,10,12,14}]   ;;  %s1679_s7 = inlined_call_operand.vmem [shape: f32[32,1], index: 7, kind: input, shape index: {}]   ;;  %s1680_s8 = inlined_call_operand.<no memory space> [shape: f32[1,1], index: 8, kind: input, shape index: {}]   ;;  %s1681_s9 = inlined_call_operand.vmem [shape: f32[8,32], index: 9, kind: input, shape index: {}]   ;;  %s1682_s10 = inlined_call_operand.vmem [shape: f32[1,32], index: 10, kind: input, shape index: {}, may-alias: {2,4,6,10,12,14}]   ;;  %s1683_s11 = inlined_call_operand.vmem [shape: f32[32,32], index: 11, kind: input, shape index: {}]   ;;  %s1684_s12 = inlined_call_operand.vmem [shape: f32[1,32], index: 12, kind: input, shape index: {}, may-alias: {2,4,6,10,12,14}]   ;;  %s1685_s13 = inlined_call_operand.vmem [shape: f32[32,32], index: 13, kind: input, shape index: {}]   ;;  %s1686_s14 = inlined_call_operand.vmem [shape: f32[1,32], index: 14, kind: input, shape index: {}, may-alias: {2,4,6,10,12,14}]   ;;  %s1687_s15 = inlined_call_operand.vmem [shape: f32[32,4], index: 15, kind: input, shape index: {}]   ;;  %s1688_s16 = inlined_call_operand.vmem [shape: f32[1,4], index: 16, kind: input, shape index: {}]   ;;  %s1689_s17 = inlined_call_operand.vmem [shape: f32[64,128], index: 17, kind: output, shape index: {}]  }
   0x1   :  { %1690 = sst [smem:[#allocation3_spill]] %s1672_s0  ;;  %v22_v0 = vstv %s1680_s8 }
   0x2   :  { %1691 = sst [smem:[#allocation4_spill]] %s1673_s1  ;;  %23 = vst [vmem:[#allocation2] sm:$0x1] %v22_v0 }
   0x3 LB: > { %s1246_s27 = sadd.s32 4294967295, %s1408_s26   ;;  %p1250_p0 = scmp.ge.s32.totalorder %s1408_s26, 1  ;;  %s1408_s26 = sphi %s1504_s26, %s29_s26  }
   0x4   : > { %p490_p1 = scmp.lt.s32.totalorder %s1408_s26, 3 }
   0x6   : > { %p491_p2 = pnand %p1250_p0, %p490_p1 }
   0x7   : > { %s1692_s0 = sld [smem:[#allocation4_spill]] (!%p491_p2)  ;;  %vm577_vm0 = vcmask (!%p491_p2), 1043456   ;;  %s1251_s8 = sshll.u32 (!%p491_p2), %s1246_s27, 2  ;;  %vm570_vm1 = vcmask (!%p491_p2), 64512   ;;  %v634_v10 = vld [vmem:[%s1675_s3] sm:$0xff] (!%p491_p2)  ;;  %v635_v11 = vld [vmem:[%s1675_s3 + $0x8] sm:$0xff] (!%p491_p2) }
   0x8   : > { %494 = sbr.rel (%p491_p2) target bundleno = 1477 (0x5c5), region = 88  ;;  %p543_p3 = scmp.lt.s32.totalorder (!%p491_p2), %s1251_s8, 7  ;;  %v640_v12 = vpack.c.bf16 (!%p491_p2), %v635_v11, %v634_v10  ;;  %v636_v13 = vld [vmem:[%s1675_s3 + $0x10] sm:$0xff] (!%p491_p2)  ;;  %v637_v14 = vld [vmem:[%s1675_s3 + $0x18] sm:$0xff] (!%p491_p2)  ;;  %v1255_v16 = vld [vmem:[%s1674_s2] ss:$0 sm:$0xff] (!%p491_p2) }
   0x9   : > { %s1693_s1 = sld [smem:[#allocation3_spill]] (!%p491_p2)  ;;  %v641_v15 = vpack.c.bf16 (!%p491_p2), %v637_v14, %v636_v13  ;;  %vm649_vm2 = vcmask (!%p491_p2), 261120   ;;  %v709_v31 = vld [vmem:[%s1677_s5] sm:$0xff] (!%p491_p2)  ;;  %v710_v32 = vld [vmem:[%s1677_s5 + $0x8] sm:$0xff] (!%p491_p2)  ;;  %v711_v34 = vld [vmem:[%s1677_s5 + $0x10] sm:$0xff] (!%p491_p2)  ;;  %vm1176_vm3 = vcmask (!%p491_p2), 7168  }
   0xa   : > { %1321 = vmatprep.subr.bf16.mxu1 (!%p491_p2), %v640_v12  ;;  %v715_v33 = vpack.c.bf16 (!%p491_p2), %v710_v32, %v709_v31  ;;  %v712_v35 = vld [vmem:[%s1677_s5 + $0x18] sm:$0xff] (!%p491_p2)  ;;  %v877_v37 = vld [vmem:[%s1681_s9] sm:$0xff] (!%p491_p2)  ;;  %v784_v56 = vld [vmem:[%s1679_s7 + $0x8] sm:$0xff] (!%p491_p2)  ;;  %vm1181_vm4 = vcmask (!%p491_p2), 39936  }
   0xb   : > { %1322 = vmatpush3.bf16.msra.mxu1 (!%p491_p2), %v640_v12  ;;  %v716_v36 = vpack.c.bf16 (!%p491_p2), %v712_v35, %v711_v34  ;;  %v878_v38 = vpack.c.bf16 (!%p491_p2), %v877_v37, %v877_v37  ;;  %v1258_v39 = vld [vmem:[%s1676_s4] ss:$0 sm:$0xff] (!%p491_p2)  ;;  %v785_v58 = vld [vmem:[%s1679_s7 + $0x10] sm:$0xff] (!%p491_p2)  ;;  %v786_v59 = vld [vmem:[%s1679_s7 + $0x18] sm:$0xff] (!%p491_p2) }
   0xc   : > { %1323 = vmatprep.subr.bf16.mxu1 (!%p491_p2), %v641_v15  ;;  %v783_v55 = vld [vmem:[%s1679_s7] sm:$0xff] (!%p491_p2)  ;;  %v790_v60 = vpack.c.bf16 (!%p491_p2), %v786_v59, %v785_v58  ;;  %v943_v62 = vld [vmem:[%s1683_s11 + $0x8] sm:$0xff] (!%p491_p2)  ;;  %v944_v14 = vld [vmem:[%s1683_s11 + $0x10] sm:$0xff] (!%p491_p2) }
   0xd   : > { %v559_v1 = vld [vmem:[%s1692_s0] sm:$0xff] (!%p491_p2)  ;;  %v887_v54 = vsel (!%p491_p2), %vm577_vm0, %v878_v38, 0  ;;  %v789_v57 = vpack.c.bf16 (!%p491_p2), %v784_v56, %v783_v55  ;;  %v1017_v34 = vld [vmem:[%s1685_s13 + $0x8] sm:$0xff] (!%p491_p2)  ;;  %v1019_v37 = vld [vmem:[%s1685_s13 + $0x18] sm:$0xff] (!%p491_p2) }
   0xe   : > { %v562_v2 = vpack.c.bf16 (!%p491_p2), %v559_v1, %v559_v1  ;;  %v942_v61 = vld [vmem:[%s1683_s11] sm:$0xff] (!%p491_p2)  ;;  %v1091_v59 = vld [vmem:[%s1687_s15 + $0x8] sm:$0xff] (!%p491_p2) }
   0xf   : > { %s1695_s8 = smov (!%p543_p3, %s1251_s8), 7  ;;  %1324 = vmatpush3.bf16.msra.mxu1 %v641_v15  ;;  %v948_v63 = vpack.c.bf16 %v943_v62, %v942_v61  ;;  %v1261_v0 = vld [vmem:[%s1678_s6] ss:$0 sm:$0xff]  ;;  %v945_v15 = vld [vmem:[%s1683_s11 + $0x18] sm:$0xff]  ;;  %v1092_v61 = vld [vmem:[%s1687_s15 + $0x10] sm:$0xff] }
  0x10   : > { %1375 = vmatprep.subr.msk.bf16.mxu0 %vm577_vm0, %v562_v2  ;;  %v579_v3 = vsel %vm577_vm0, %v562_v2, 0  ;;  %s1252_s30 = sshll.u32 %s1695_s8, 3  ;;  %1337 = vmatprep.subr.bf16.mxu1 %v789_v57  ;;  %v1271_v13 = vld [vmem:[%s1682_s10] ss:$0 sm:$0xff]  ;;  %v1093_v62 = vld [vmem:[%s1687_s15 + $0x18] sm:$0xff] }
  0x11   : > { %1316 = vmatpush3.bf16.msra.mxu0 %v579_v3  ;;  %s546_s20 = scalar_lea.vmem %s1693_s1, %s1252_s30  ;;  %v1090_v58 = vld [vmem:[%s1687_s15] sm:$0xff]  ;;  %s552_s23 = scalar_lea.vmem %s1689_s17, %s1252_s30 }
  0x12   : > { %v555_v4 = vld [vmem:[%s546_s20] sm:$0xff]  ;;  %v556_v5 = vld [vmem:[%s546_s20 + $0x8] sm:$0xff]  ;;  %v557_v6 = vld [vmem:[%s546_s20 + $0x10] sm:$0xff]  ;;  %1329 = vmatprep.subr.bf16.mxu0 %v715_v33 }
  0x13   : > { %v1525_v7 = vpack.c.bf16 %v556_v5, %v555_v4  ;;  %v558_v8 = vld [vmem:[%s546_s20 + $0x18] sm:$0xff]  ;;  %s1410_s20 = smov 1  }
  0x14   : > { %v1527_v9 = vpack.c.bf16 %v558_v8, %v557_v6 }
  0x15   : > { %1317 = vmatprep.mubr.msk.bf16.mxu0 %vm570_vm1, %v1525_v7 }
  0x16   : > { %1318 = vmatmul.mubr.msk.bf16.vlgmr.msra.gmra.mrb[0].mxu0 %vm570_vm1, %v1527_v9 }
  0x17   : > { %1330 = vmatpush3.bf16.msra.mxu0 %v715_v33  ;;  %v1016_v33 = vld [vmem:[%s1685_s13] sm:$0xff] }
  0x18   : > { %1331 = vmatprep.subr.bf16.mxu0 %v716_v36  ;;  %v1022_v35 = vpack.c.bf16 %v1017_v34, %v1016_v33 }
  0x1b   : > { %1332 = vmatpush3.bf16.msra.mxu0 %v716_v36  ;;  %v1018_v36 = vld [vmem:[%s1685_s13 + $0x10] sm:$0xff] }
  0x1c   : > { %1376 = vmatprep.subr.msk.bf16.mxu0 %vm577_vm0, %v878_v38  ;;  %v1023_v38 = vpack.c.bf16 %v1019_v37, %v1018_v36 }
  0xe9   : > { %v1319_v17 = vpop.f32.mrb[0].mxu0 }
  0xea   : > { %v624_v18 = vadd.f32 %v1319_v17, %v1255_v16  ;;  %v615_v19 = vpop.f32.mrb[1].mxu0 }
  0xeb   : > { %v616_v20 = vadd.f32 %v1255_v16, %v615_v19  ;;  %v1320_v21 = vpop.f32.mrb[2].mxu0 }
  0xec   : > { %v627_v22 = vadd.f32 %v1320_v21, %v1255_v16  ;;  %v618_v23 = vpop.f32.mrb[3].mxu0  ;;  %v632_v25 = vmax.f32 %v624_v18, 0.0  ;;  %v949_v21 = vpack.c.bf16 %v945_v15, %v944_v14  ;;  %v1280_v15 = vld [vmem:[%s1688_s16] ss:$0 sm:$0xff] }
  0xed   : > { %v619_v24 = vadd.f32 %v1255_v16, %v618_v23  ;;  %v630_v27 = vmax.f32 %v616_v20, 0.0 }
  0xee   : > { %v633_v26 = vmax.f32 %v627_v22, 0.0 }
  0xef   : > { %v631_v28 = vmax.f32 %v619_v24, 0.0 }
  0xf0   : > { %v639_v29 = vpack.c.bf16 %v633_v26, %v632_v25 }
  0xf1   : > { %v638_v30 = vpack.c.bf16 %v631_v28, %v630_v27 }
  0xf3   : > { %1325 = vmatprep.mubr.msk.bf16.mxu1 %vm649_vm2, %v638_v30 }
  0xf4   : > { %1326 = vmatmul.mubr.msk.bf16.vlgmr.msra.gmra.mrb[0].mxu1 %vm649_vm2, %v639_v29 }
  0xf5   : > { %1338 = vmatpush3.bf16.msra.mxu1 %v789_v57 }
  0xf6   : > { %1339 = vmatprep.subr.bf16.mxu1 %v790_v60 }
  0xf9   : > { %1340 = vmatpush3.bf16.msra.mxu1 %v790_v60  ;;  %v1096_v60 = vpack.c.bf16 %v1091_v59, %v1090_v58 }
  0xfa   : > { %1351 = vmatprep.subr.bf16.mxu1 %v948_v63 }
 0x1c7   : > { %v1327_v40 = vpop.f32.mrb[0].mxu1 }
 0x1c8   : > { %v699_v41 = vadd.f32 %v1327_v40, %v1258_v39  ;;  %v690_v42 = vpop.f32.mrb[1].mxu1 }
 0x1c9   : > { %v691_v43 = vadd.f32 %v1258_v39, %v690_v42  ;;  %v1328_v44 = vpop.f32.mrb[2].mxu1 }
 0x1ca   : > { %v702_v45 = vadd.f32 %v1328_v44, %v1258_v39  ;;  %v693_v46 = vpop.f32.mrb[3].mxu1  ;;  %v707_v48 = vmax.f32 %v699_v41, 0.0 }
 0x1cb   : > { %v694_v47 = vadd.f32 %v1258_v39, %v693_v46  ;;  %v705_v50 = vmax.f32 %v691_v43, 0.0  ;;  %v1274_v43 = vld [vmem:[%s1684_s12] ss:$0 sm:$0xff] }
 0x1cc   : > { %v708_v49 = vmax.f32 %v702_v45, 0.0 }
 0x1cd   : > { %v706_v51 = vmax.f32 %v694_v47, 0.0 }
 0x1ce   : > { %v714_v52 = vpack.c.bf16 %v708_v49, %v707_v48 }
 0x1cf   : > { %v713_v53 = vpack.c.bf16 %v706_v51, %v705_v50 }
 0x1d1   : > { %1333 = vmatprep.mubr.msk.bf16.mxu0 %vm649_vm2, %v713_v53 }
 0x1d2   : > { %1334 = vmatmul.mubr.msk.bf16.vlgmr.msra.gmra.mrb[4].mxu0 %vm649_vm2, %v714_v52 }
 0x1d3   : > { %1346 = vmatpush3.bf16.msra.mxu0 %v887_v54  ;;  %1347 = vmatprep.mubr.msk.bf16.mxu0 %vm570_vm1, %v1525_v7 }
 0x1d4   : > { %1359 = vmatprep.subr.bf16.mxu0 %v1022_v35 }
 0x1da   : > { %1348 = vmatmul.mubr.msk.bf16.vlgmr.msra.gmra.mrb[8].mxu0 %vm570_vm1, %v1527_v9 }
 0x1db   : > { %1360 = vmatpush3.bf16.msra.mxu0 %v1022_v35 }
 0x1dc   : > { %1361 = vmatprep.subr.bf16.mxu0 %v1023_v38 }
 0x1df   : > { %1362 = vmatpush3.bf16.msra.mxu0 %v1023_v38 }
 0x2a5   : > { %v1335_v1 = vpop.f32.mrb[4].mxu0 }
 0x2a6   : > { %v773_v2 = vadd.f32 %v1335_v1, %v1261_v0  ;;  %v764_v3 = vpop.f32.mrb[5].mxu0 }
 0x2a7   : > { %v765_v4 = vadd.f32 %v1261_v0, %v764_v3  ;;  %v1336_v5 = vpop.f32.mrb[6].mxu0 }
 0x2a8   : > { %v776_v6 = vadd.f32 %v1336_v5, %v1261_v0  ;;  %v767_v7 = vpop.f32.mrb[7].mxu0  ;;  %v781_v9 = vmax.f32 %v773_v2, 0.0 }
 0x2a9   : > { %v768_v8 = vadd.f32 %v1261_v0, %v767_v7  ;;  %v779_v11 = vmax.f32 %v765_v4, 0.0  ;;  %v1277_v0 = vld [vmem:[%s1686_s14] ss:$0 sm:$0xff] }
 0x2aa   : > { %v782_v10 = vmax.f32 %v776_v6, 0.0 }
 0x2ab   : > { %v780_v12 = vmax.f32 %v768_v8, 0.0 }
 0x2ac   : > { %v788_v16 = vpack.c.bf16 %v782_v10, %v781_v9 }
 0x2ad   : > { %v787_v17 = vpack.c.bf16 %v780_v12, %v779_v11  ;;  %v1349_v18 = vpop.f32.mrb[8].mxu0 }
 0x2ae   : > { %v932_v19 = vadd.f32 %v1349_v18, %v1271_v13  ;;  %v923_v20 = vpop.f32.mrb[9].mxu0 }
 0x2af   : > { %v924_v22 = vadd.f32 %v1271_v13, %v923_v20  ;;  %1341 = vmatprep.mubr.msk.bf16.mxu1 %vm649_vm2, %v787_v17  ;;  %v1350_v23 = vpop.f32.mrb[10].mxu0 }
 0x2b0   : > { %v935_v24 = vadd.f32 %v1350_v23, %v1271_v13  ;;  %1342 = vmatmul.mubr.msk.bf16.vlgmr.msra.gmra.mrb[4].mxu1 %vm649_vm2, %v788_v16  ;;  %v926_v25 = vpop.f32.mrb[11].mxu0  ;;  %v940_v27 = vmax.f32 %v932_v19, 0.0 }
 0x2b1   : > { %v927_v26 = vadd.f32 %v1271_v13, %v926_v25  ;;  %1352 = vmatpush3.bf16.msra.mxu1 %v948_v63  ;;  %v938_v29 = vmax.f32 %v924_v22, 0.0  ;;  %v1097_v63 = vpack.c.bf16 %v1093_v62, %v1092_v61 }
 0x2b2   : > { %v941_v28 = vmax.f32 %v935_v24, 0.0  ;;  %1353 = vmatprep.subr.bf16.mxu1 %v949_v21  ;;  %v1264_v24 = vld [vmem:[#allocation2] ss:$0 sm:$0xff] }
 0x2b3   : > { %v939_v30 = vmax.f32 %v927_v26, 0.0 }
 0x2b4   : > { %v947_v31 = vpack.c.bf16 %v941_v28, %v940_v27 }
 0x2b5   : > { %v946_v32 = vpack.c.bf16 %v939_v30, %v938_v29  ;;  %1354 = vmatpush3.bf16.msra.mxu1 %v949_v21 }
 0x2b6   : > { %1367 = vmatprep.subr.bf16.mxu1 %v1096_v60 }
 0x2b7   : > { %1355 = vmatprep.mubr.msk.bf16.mxu1 %vm649_vm2, %v946_v32 }
 0x2b8   : > { %1356 = vmatmul.mubr.msk.bf16.vlgmr.msra.gmra.mrb[8].mxu1 %vm649_vm2, %v947_v31 }
 0x2b9   : > { %1368 = vmatpush3.bf16.msra.mxu1 %v1096_v60 }
 0x2ba   : > { %1369 = vmatprep.subr.bf16.mxu1 %v1097_v63 }
 0x2bd   : > { %1370 = vmatpush3.bf16.msra.mxu1 %v1097_v63 }
 0x383   : > { %v1622_v39 = vpop.f32.mrb[4].mxu1 }
 0x384   : > { %v838_v40 = vpop.f32.mrb[5].mxu1  ;;  %v847_v26 = vadd.f32 %v1622_v39, %v1264_v24 }
 0x385   : > { %v1624_v41 = vpop.f32.mrb[6].mxu1  ;;  %v839_v25 = vadd.f32 %v1264_v24, %v838_v40 }
 0x386   : > { %v1626_v42 = vpop.f32.mrb[7].mxu1  ;;  %v850_v27 = vadd.f32 %v1624_v41, %v1264_v24  ;;  %v1269_v30 = vmul.f32 -1.442695, %v847_v26 }
 0x387   : > { %v1267_v28 = vmul.f32 -1.442695, %v839_v25  ;;  %v842_v29 = vadd.f32 %v1264_v24, %v1626_v42 }
 0x388   : > { %v1270_v31 = vmul.f32 -1.442695, %v850_v27 }
 0x389   : > { %1386 = vpow2.f32 %v1267_v28  ;;  %v1268_v32 = vmul.f32 -1.442695, %v842_v29 }
 0x38a   : > { %1388 = vpow2.f32 %v1269_v30 }
 0x38b   : > { %v1357_v44 = vpop.f32.mrb[8].mxu1  ;;  %1390 = vpow2.f32 %v1270_v31 }
 0x38c   : > { %v1006_v45 = vadd.f32 %v1357_v44, %v1274_v43  ;;  %v997_v46 = vpop.f32.mrb[9].mxu1  ;;  %1392 = vpow2.f32 %v1268_v32 }
 0x38d   : > { %v998_v47 = vadd.f32 %v1274_v43, %v997_v46  ;;  %v1358_v48 = vpop.f32.mrb[10].mxu1 }
 0x38e   : > { %v1009_v49 = vadd.f32 %v1358_v48, %v1274_v43  ;;  %v1000_v50 = vpop.f32.mrb[11].mxu1  ;;  %v1014_v52 = vmax.f32 %v1006_v45, 0.0 }
 0x38f   : > { %v1001_v51 = vadd.f32 %v1274_v43, %v1000_v50  ;;  %v1012_v54 = vmax.f32 %v998_v47, 0.0 }
 0x390   : > { %v1015_v53 = vmax.f32 %v1009_v49, 0.0 }
 0x391   : > { %v1013_v55 = vmax.f32 %v1001_v51, 0.0 }
 0x392   : > { %v1021_v56 = vpack.c.bf16 %v1015_v53, %v1014_v52 }
 0x393   : > { %v1020_v57 = vpack.c.bf16 %v1013_v55, %v1012_v54  ;;  %v1387_v33 = vpop.eup %1386 }
 0x394   : > { %v1389_v34 = vpop.eup %1388  ;;  %v865_v36 = vadd.f32 1.0, %v1387_v33 }
 0x395   : > { %1363 = vmatprep.mubr.msk.bf16.mxu0 %vm649_vm2, %v1020_v57  ;;  %v1391_v35 = vpop.eup %1390  ;;  %v867_v38 = vadd.f32 1.0, %v1389_v34 }
 0x396   : > { %1364 = vmatmul.mubr.msk.bf16.vlgmr.msra.gmra.mrb[12].mxu0 %vm649_vm2, %v1021_v56  ;;  %v1393_v37 = vpop.eup %1392  ;;  %v868_v39 = vadd.f32 1.0, %v1391_v35  ;;  %1394 = vrcp.f32 %v865_v36 }
 0x397   : > { %v866_v40 = vadd.f32 1.0, %v1393_v37  ;;  %1396 = vrcp.f32 %v867_v38 }
 0x398   : > { %1398 = vrcp.f32 %v868_v39 }
 0x399   : > { %1400 = vrcp.f32 %v866_v40 }
 0x3a0   : > { %v1395_v42 = vpop.eup %1394 }
 0x3a1   : > { %v1397_v45 = vpop.eup %1396 }
 0x3a2   : > { %v1399_v47 = vpop.eup %1398 }
 0x3a3   : > { %v1401_v49 = vpop.eup %1400 }
 0x469   : > { %v1365_v1 = vpop.f32.mrb[12].mxu0 }
 0x46a   : > { %v1080_v2 = vadd.f32 %v1365_v1, %v1277_v0  ;;  %v1071_v3 = vpop.f32.mrb[13].mxu0 }
 0x46b   : > { %v1072_v4 = vadd.f32 %v1277_v0, %v1071_v3  ;;  %v1366_v5 = vpop.f32.mrb[14].mxu0 }
 0x46c   : > { %v1083_v6 = vadd.f32 %v1366_v5, %v1277_v0  ;;  %v1074_v7 = vpop.f32.mrb[15].mxu0  ;;  %v1088_v9 = vmax.f32 %v1080_v2, 0.0 }
 0x46d   : > { %v1075_v8 = vadd.f32 %v1277_v0, %v1074_v7  ;;  %v1086_v11 = vmax.f32 %v1072_v4, 0.0 }
 0x46e   : > { %v1089_v10 = vmax.f32 %v1083_v6, 0.0 }
 0x46f   : > { %v1087_v12 = vmax.f32 %v1075_v8, 0.0 }
 0x470   : > { %v1095_v13 = vpack.c.bf16 %v1089_v10, %v1088_v9 }
 0x471   : > { %v1094_v14 = vpack.c.bf16 %v1087_v12, %v1086_v11 }
 0x473   : > { %1371 = vmatprep.mubr.msk.bf16.mxu1 %vm649_vm2, %v1094_v14 }
 0x474   : > { %1372 = vmatmul.mubr.msk.bf16.vlgmr.msra.gmra.mrb[12].mxu1 %vm649_vm2, %v1095_v13 }
 0x547   : > { %v1373_v16 = vpop.f32.mrb[12].mxu1 }
 0x548   : > { %v1154_v17 = vadd.f32 %v1373_v16, %v1280_v15  ;;  %v1145_v18 = vpop.f32.mrb[13].mxu1 }
 0x549   : > { %v1146_v19 = vadd.f32 %v1280_v15, %v1145_v18  ;;  %v1374_v20 = vpop.f32.mrb[14].mxu1 }
 0x54a   : > { %1168 = vrot.lane.b32.xlu1 %v1154_v17, %s1410_s20  ;;  %v1148_v21 = vpop.f32.mrb[15].mxu1  ;;  %v1157_v22 = vadd.f32 %v1374_v20, %v1280_v15 }
 0x54b   : > { %1164 = vrot.lane.b32.xlu0 %v1146_v19, %s1410_s20  ;;  %v1149_v23 = vadd.f32 %v1280_v15, %v1148_v21 }
 0x54e   : > { %1170 = vrot.lane.b32.xlu1 %v1157_v22, %s1410_s20 }
 0x54f   : > { %1166 = vrot.lane.b32.xlu0 %v1149_v23, %s1410_s20 }
 0x5bc   : > { %v1169_v41 = vpop.permute.xlu1 %1168 }
 0x5bd   : > { %v1165_v43 = vpop.permute.xlu0 %1164  ;;  %v1179_v50 = vsel %vm1176_vm3, %v1397_v45, %v1169_v41 }
 0x5be   : > { %v1177_v44 = vsel %vm1176_vm3, %v1395_v42, %v1165_v43  ;;  %v1184_v55 = vsel %vm1181_vm4, %v1179_v50, 0.0 }
 0x5bf   : > { %v1182_v46 = vsel %vm1181_vm4, %v1177_v44, 0.0  ;;  %1188 = vst [vmem:[%s552_s23 + $0x10] sm:$0xff] %v1184_v55 }
 0x5c0   : > { %1186 = vst [vmem:[%s552_s23] sm:$0xff] %v1182_v46  ;;  %v1171_v48 = vpop.permute.xlu1 %1170 }
 0x5c1   : > { %v1167_v51 = vpop.permute.xlu0 %1166  ;;  %v1180_v52 = vsel %vm1176_vm3, %v1399_v47, %v1171_v48 }
 0x5c2   : > { %v1178_v53 = vsel %vm1176_vm3, %v1401_v49, %v1167_v51  ;;  %v1185_v56 = vsel %vm1181_vm4, %v1180_v52, 0.0 }
 0x5c3   : > { %v1183_v54 = vsel %vm1181_vm4, %v1178_v53, 0.0  ;;  %1189 = vst [vmem:[%s552_s23 + $0x18] sm:$0xff] %v1185_v56 }
 0x5c4   : > { %1187 = vst [vmem:[%s552_s23 + $0x8] sm:$0xff] %v1183_v54 }
 0x5c5 PF: > { %s29_s26 = sadd.s32 1, %s1408_s26  }
 0x5c6   : > { %p26_p4 = scmp.ge.s32.totalorder %s29_s26, 4  }
 0x5c8   :  { %28 = sbr.rel (!%p26_p4) target bundleno = 3 (0x3), region = 118 }

</bundles_post_ra>
